<compile_context>
chip_gen: v6e
topology: v6e:2x2x1
jax: 0.10.0
libtpu: 0.0.40
codegen_flags: <defaults>
</compile_context>

<pallas_src>
from typing import NamedTuple, Optional, Tuple

import numpy as np
import jax
import jax.numpy as jnp
from jax.experimental import pallas as pl
from jax.experimental.pallas import tpu as pltpu


# ----------------------------- static helpers ------------------------------ #

class _StageCfg(NamedTuple):
    identity: bool
    C: int
    H: int
    W: int
    h0: Optional[Tuple[int, ...]]
    h1: Optional[Tuple[int, ...]]
    fh: Optional[Tuple[float, ...]]


def _bilinear_taps(out_size, in_size):
    """2-tap indices/weights of F.interpolate(mode='bilinear', align_corners=False)."""
    scale = in_size / out_size
    src = np.maximum((np.arange(out_size, dtype=np.float64) + 0.5) * scale - 0.5, 0.0)
    i0 = np.clip(np.floor(src).astype(np.int64), 0, in_size - 1)
    i1 = np.minimum(i0 + 1, in_size - 1)
    frac = (src - i0).astype(np.float32)
    return [int(v) for v in i0], [int(v) for v in i1], [float(v) for v in frac]


def _bilinear_matrix(out_size, in_size):
    i0, i1, f = _bilinear_taps(out_size, in_size)
    m = np.zeros((out_size, in_size), np.float32)
    for t in range(out_size):
        m[t, i0[t]] += 1.0 - f[t]
        m[t, i1[t]] += f[t]
    return m


# ------------------------------ Pallas kernel ------------------------------ #

def _make_decoder_kernel(cfgs, Ht, Wt):
    """Fused decoder kernel: per-stage folded MLP + separable bilinear resize
    + accumulate + bias + ReLU, one batch element per grid step."""
    n = len(cfgs)
    coarse = [i for i, c in enumerate(cfgs) if not c.identity]
    ident = [i for i, c in enumerate(cfgs) if c.identity]

    def kernel(*refs):
        x_refs = refs[:n]
        a_refs = refs[n:2 * n]
        pos = 2 * n
        rw_refs = {}
        for si in coarse:
            rw_refs[si] = refs[pos]
            pos += 1
        bias_ref = refs[pos]; pos += 1
        out_ref = refs[pos]; pos += 1
        y_refs = {}
        for si in coarse:
            y_refs[si] = refs[pos]; pos += 1
        acc_ref = refs[pos] if (ident and coarse) else None

        out2 = out_ref.at[0]              # (S, Ht*Wt) view for this batch element
        bias = bias_ref[...]              # (S, 1) f32

        # -- stages already at target resolution: one big MXU matmul each -----
        if ident:
            acc = None
            for si in ident:
                v = jnp.dot(a_refs[si][...], x_refs[si][0],
                            preferred_element_type=jnp.float32)
                acc = v if acc is None else acc + v
            if not coarse:
                out2[...] = jnp.maximum(acc + bias, 0.0).astype(out_ref.dtype)
                return
            acc_ref[...] = acc

        # -- coarse stages: folded channel mix once into VMEM scratch ---------
        for si in coarse:
            y_refs[si][...] = jnp.dot(a_refs[si][...], x_refs[si][0],
                                      preferred_element_type=jnp.float32)

        # -- per target row: 2-tap height lerp + (W, Wt) width matmul,
        #    accumulate all stages, fused bias + ReLU, lane-dense store -------
        # TODO(synk): for very large targets switch this static unroll to a
        # lax.fori_loop with SMEM tap tables and add a second ("parallel")
        # spatial grid axis so blocks fit v7x's 64 MiB VMEM / feed both cores.
        for t in range(Ht):
            col = pl.ds(t * Wt, Wt)
            tot = acc_ref[:, col] if ident else None
            for si in coarse:
                c = cfgs[si]
                h0, h1, f = c.h0[t], c.h1[t], c.fh[t]
                r0 = y_refs[si][:, pl.ds(h0 * c.W, c.W)]
                if f == 0.0 or h0 == h1:
                    row = r0
                else:
                    r1 = y_refs[si][:, pl.ds(h1 * c.W, c.W)]
                    row = r0 * (1.0 - f) + r1 * f
                contrib = jnp.dot(row.astype(jnp.bfloat16), rw_refs[si][...],
                                  preferred_element_type=jnp.float32)
                tot = contrib if tot is None else tot + contrib
            out2[:, col] = jnp.maximum(tot + bias, 0.0).astype(out_ref.dtype)

    return kernel


# ------------------------------- module class ------------------------------ #

class SegformerDecoderPallas:
    """Pallas TPU implementation of SegformerDecoder.forward."""

    def __init__(self, encoder_channels, encoder_depth=5,
                 segmentation_channels=256, key=jax.random.PRNGKey(0)):
        if encoder_depth < 3:
            raise ValueError(
                "Encoder depth for Segformer decoder cannot be less than 3, "
                "got {}.".format(encoder_depth))
        if encoder_channels[1] == 0:
            encoder_channels = tuple(
                c for i, c in enumerate(encoder_channels) if i != 1)
        encoder_channels = encoder_channels[::-1]
        S = segmentation_channels
        self.seg_ch = S
        self.mlp_channels = encoder_channels[:-1]
        n_stage = len(self.mlp_channels)

        keys = jax.random.split(key, 2 * n_stage + 4)

        # MLP stages: nn.Linear(c, S) -> weight (S, c), bias (S,)
        mlp_w, mlp_b = [], []
        for idx, c in enumerate(self.mlp_channels):
            kw, kb = keys[2 * idx], keys[2 * idx + 1]
            bound = 1.0 / float(c) ** 0.5
            mlp_w.append(jax.random.uniform(kw, (S, c), jnp.float32, -bound, bound))
            mlp_b.append(jax.random.uniform(kb, (S,), jnp.float32, -bound, bound))

        # Fuse stage: Conv2d(n*S, S, 1, bias=False) + BatchNorm + ReLU
        k_in = n_stage * S
        kconv, kg, kbeta, krv = keys[-4], keys[-3], keys[-2], keys[-1]
        bound = 1.0 / float(k_in) ** 0.5
        conv_w = jax.random.uniform(kconv, (S, k_in), jnp.float32, -bound, bound)
        gamma = jax.random.uniform(kg, (S,), jnp.float32, 0.5, 1.5)
        beta = jax.random.uniform(kbeta, (S,), jnp.float32, -0.5, 0.5)
        running_mean = jnp.zeros((S,), jnp.float32)
        running_var = jax.random.uniform(krv, (S,), jnp.float32, 0.5, 1.5)
        eps = 1e-5
        # TODO(synk): BatchNorm is folded with eval-mode running stats; a fresh
        # torch module in train() would use batch statistics instead.
        scale = gamma / jnp.sqrt(running_var + eps)

        # Fold the 1x1 fuse conv + BN into each stage's MLP:
        #   A_i = diag(scale) @ Wfuse[:, i*S:(i+1)*S] @ W_i         (S, C_i)
        # The per-stage MLP bias commutes with the resize (bilinear rows sum
        # to 1), so it folds into a single constant bias as well.
        self.stage_w = []
        bias_total = beta - running_mean * scale
        for i in range(n_stage):
            wf_i = conv_w[:, i * S:(i + 1) * S] * scale[:, None]
            self.stage_w.append((wf_i @ mlp_w[i]).astype(jnp.bfloat16))
            bias_total = bias_total + wf_i @ mlp_b[i]
        self.fold_bias = bias_total.reshape(S, 1).astype(jnp.float32)

        self._forward = jax.jit(self._forward_impl)

    def __call__(self, *features):
        return self._forward(*features)

    def _forward_impl(self, *features):
        B = features[0].shape[0]
        th = features[0].shape[2] // 4
        tw = features[0].shape[3] // 4
        P = th * tw
        S = self.seg_ch
        feats = features[2:] if features[1].shape[1] == 0 else features[1:]
        feats = feats[::-1]
        feats = feats[:len(self.stage_w)]

        cfgs, xs, rws, scratch = [], [], [], []
        for feat in feats:
            Bf, C, H, W = feat.shape
            xs.append(feat.reshape(Bf, C, H * W).astype(jnp.bfloat16))
            if H == th and W == tw:
                # Already at target resolution: identity resize is skipped.
                cfgs.append(_StageCfg(True, C, H, W, None, None, None))
            else:
                h0, h1, fh = _bilinear_taps(th, H)
                rws.append(jnp.asarray(_bilinear_matrix(tw, W).T,
                                       dtype=jnp.bfloat16))        # (W, tw)
                cfgs.append(_StageCfg(False, C, H, W,
                                      tuple(h0), tuple(h1), tuple(fh)))
                scratch.append(pltpu.VMEM((S, H * W), jnp.float32))
        n_id = sum(1 for c in cfgs if c.identity)
        n_coarse = len(cfgs) - n_id
        if n_id and n_coarse:
            scratch.append(pltpu.VMEM((S, P), jnp.float32))

        a_used = self.stage_w[:len(cfgs)]
        kernel = _make_decoder_kernel(tuple(cfgs), th, tw)

        inputs, in_specs = [], []
        for x, c in zip(xs, cfgs):
            inputs.append(x)
            in_specs.append(pl.BlockSpec((1, c.C, c.H * c.W),
                                         lambda b: (b, 0, 0)))
        for a in a_used:
            inputs.append(a)
            in_specs.append(pl.BlockSpec(a.shape, lambda b: (0, 0)))
        for rw in rws:
            inputs.append(rw)
            in_specs.append(pl.BlockSpec(rw.shape, lambda b: (0, 0)))
        inputs.append(self.fold_bias)
        in_specs.append(pl.BlockSpec((S, 1), lambda b: (0, 0)))

        out = pl.pallas_call(
            kernel,
            out_shape=jax.ShapeDtypeStruct((B, S, P), jnp.float32),
            grid=(B,),
            in_specs=in_specs,
            out_specs=pl.BlockSpec((1, S, P), lambda b: (b, 0, 0)),
            scratch_shapes=scratch,
            compiler_params=pltpu.CompilerParams(
                dimension_semantics=("parallel",),
                vmem_limit_bytes=64 * 1024 * 1024),
        )(*inputs)
        # (B, S, Ht*Wt) is row-major identical to NCHW (B, S, Ht, Wt).
        return out.reshape(B, S, th, tw)


# ---------------------------------- main ----------------------------------- #

if __name__ == "__main__":
    key = jax.random.PRNGKey(0)
    encoder_channels = (3, 0, 16, 24, 32, 48)   # Segformer-style: stage-1 empty
    seg_ch = 32
    B, H, W = 2, 64, 64

    feat_shapes = [
        (B, 3, H, W),                 # input image
        (B, 0, H // 2, W // 2),       # zero-channel dummy stage
        (B, 16, H // 4, W // 4),
        (B, 24, H // 8, W // 8),
        (B, 32, H // 16, W // 16),
        (B, 48, H // 32, W // 32),
    ]
    keys = jax.random.split(key, len(feat_shapes) + 1)
    features = [jax.random.normal(k, s, jnp.float32)
                for k, s in zip(keys[:-1], feat_shapes)]

    decoder = SegformerDecoderPallas(encoder_channels, encoder_depth=5,
                                     segmentation_channels=seg_ch,
                                     key=keys[-1])
    out = decoder(*features)
    out = jax.block_until_ready(out)
    assert out.shape == (B, seg_ch, H // 4, W // 4), out.shape
    assert bool(jnp.all(jnp.isfinite(out)))
    print("KERNEL_OK")
</pallas_src>

<mosaic_0001>
module attributes {stable_mosaic.version = 11 : i64} {
  func.func @kernel(%arg0: i32, %arg1: memref<1x48x4xbf16, #tpu.memory_space<vmem>>, %arg2: memref<1x32x16xbf16, #tpu.memory_space<vmem>>, %arg3: memref<1x24x64xbf16, #tpu.memory_space<vmem>>, %arg4: memref<1x16x256xbf16, #tpu.memory_space<vmem>>, %arg5: memref<32x48xbf16, #tpu.memory_space<vmem>>, %arg6: memref<32x32xbf16, #tpu.memory_space<vmem>>, %arg7: memref<32x24xbf16, #tpu.memory_space<vmem>>, %arg8: memref<32x16xbf16, #tpu.memory_space<vmem>>, %arg9: memref<2x16xbf16, #tpu.memory_space<vmem>>, %arg10: memref<4x16xbf16, #tpu.memory_space<vmem>>, %arg11: memref<8x16xbf16, #tpu.memory_space<vmem>>, %arg12: memref<32x1xf32, #tpu.memory_space<vmem>>, %arg13: memref<1x32x256xf32, #tpu.memory_space<vmem>>, %arg14: memref<32x4xf32, #tpu.memory_space<vmem>>, %arg15: memref<32x16xf32, #tpu.memory_space<vmem>>, %arg16: memref<32x64xf32, #tpu.memory_space<vmem>>, %arg17: memref<32x256xf32, #tpu.memory_space<vmem>>) attributes {dimension_semantics = [#tpu.dimension_semantics<parallel>], iteration_bounds = array<i64: 2>, scalar_prefetch = 0 : i64, scratch_operands = 4 : i64, tpu.core_type = #tpu.core_type<tc>, window_params = [{transform_indices = @transform_0, window_bounds = array<i64: 1, 48, 4>}, {transform_indices = @transform_1, window_bounds = array<i64: 1, 32, 16>}, {transform_indices = @transform_2, window_bounds = array<i64: 1, 24, 64>}, {transform_indices = @transform_3, window_bounds = array<i64: 1, 16, 256>}, {pipeline_mode = #tpu.pipeline_mode<synchronous>, transform_indices = @transform_4, window_bounds = array<i64: 32, 48>}, {pipeline_mode = #tpu.pipeline_mode<synchronous>, transform_indices = @transform_5, window_bounds = array<i64: 32, 32>}, {pipeline_mode = #tpu.pipeline_mode<synchronous>, transform_indices = @transform_6, window_bounds = array<i64: 32, 24>}, {pipeline_mode = #tpu.pipeline_mode<synchronous>, transform_indices = @transform_7, window_bounds = array<i64: 32, 16>}, {pipeline_mode = #tpu.pipeline_mode<synchronous>, transform_indices = @transform_8, window_bounds = array<i64: 2, 16>}, {pipeline_mode = #tpu.pipeline_mode<synchronous>, transform_indices = @transform_9, window_bounds = array<i64: 4, 16>}, {pipeline_mode = #tpu.pipeline_mode<synchronous>, transform_indices = @transform_10, window_bounds = array<i64: 8, 16>}, {pipeline_mode = #tpu.pipeline_mode<synchronous>, transform_indices = @transform_11, window_bounds = array<i64: 32, 1>}, {transform_indices = @transform_12, window_bounds = array<i64: 1, 32, 256>}]} {
    %c0 = arith.constant 0 : index
    %c0_0 = arith.constant 0 : index
    %0 = vector.load %arg12[%c0, %c0_0] : memref<32x1xf32, #tpu.memory_space<vmem>>, vector<32x1xf32>
    %c0_1 = arith.constant 0 : index
    %c0_2 = arith.constant 0 : index
    %1 = vector.load %arg8[%c0_1, %c0_2] : memref<32x16xbf16, #tpu.memory_space<vmem>>, vector<32x16xbf16>
    %c0_3 = arith.constant 0 : index
    %c0_4 = arith.constant 0 : index
    %c0_5 = arith.constant 0 : index
    %2 = vector.load %arg4[%c0_3, %c0_4, %c0_5] : memref<1x16x256xbf16, #tpu.memory_space<vmem>>, vector<1x16x256xbf16>
    %3 = vector.shape_cast %2 : vector<1x16x256xbf16> to vector<16x256xbf16>
    %cst = arith.constant dense<0.000000e+00> : vector<32x256xf32>
    %4 = tpu.matmul %1, %3, %cst {dimension_numbers = #tpu.dot_dimension_numbers<[1], [0], [0], [1], [0, 0, 1, 1], [], []>} : vector<32x16xbf16>, vector<16x256xbf16>, vector<32x256xf32> -> vector<32x256xf32>
    %c0_6 = arith.constant 0 : index
    %c0_7 = arith.constant 0 : index
    %5 = vector.load %arg17[%c0_6, %c0_7] : memref<32x256xf32, #tpu.memory_space<vmem>>, vector<32x256xf32>
    tpu.vector_store %arg17[%c0_6, %c0_7], %4 {strides = array<i32>} : memref<32x256xf32, #tpu.memory_space<vmem>>, vector<32x256xf32>,
    %c0_8 = arith.constant 0 : index
    %c0_9 = arith.constant 0 : index
    %6 = vector.load %arg5[%c0_8, %c0_9] : memref<32x48xbf16, #tpu.memory_space<vmem>>, vector<32x48xbf16>
    %c0_10 = arith.constant 0 : index
    %c0_11 = arith.constant 0 : index
    %c0_12 = arith.constant 0 : index
    %7 = vector.load %arg1[%c0_10, %c0_11, %c0_12] : memref<1x48x4xbf16, #tpu.memory_space<vmem>>, vector<1x48x4xbf16>
    %8 = vector.shape_cast %7 : vector<1x48x4xbf16> to vector<48x4xbf16>
    %cst_13 = arith.constant dense<0.000000e+00> : vector<32x4xf32>
    %9 = tpu.matmul %6, %8, %cst_13 {dimension_numbers = #tpu.dot_dimension_numbers<[1], [0], [0], [1], [0, 0, 1, 1], [], []>} : vector<32x48xbf16>, vector<48x4xbf16>, vector<32x4xf32> -> vector<32x4xf32>
    %c0_14 = arith.constant 0 : index
    %c0_15 = arith.constant 0 : index
    %10 = vector.load %arg14[%c0_14, %c0_15] : memref<32x4xf32, #tpu.memory_space<vmem>>, vector<32x4xf32>
    tpu.vector_store %arg14[%c0_14, %c0_15], %9 {strides = array<i32>} : memref<32x4xf32, #tpu.memory_space<vmem>>, vector<32x4xf32>,
    %c0_16 = arith.constant 0 : index
    %c0_17 = arith.constant 0 : index
    %11 = vector.load %arg6[%c0_16, %c0_17] : memref<32x32xbf16, #tpu.memory_space<vmem>>, vector<32x32xbf16>
    %c0_18 = arith.constant 0 : index
    %c0_19 = arith.constant 0 : index
    %c0_20 = arith.constant 0 : index
    %12 = vector.load %arg2[%c0_18, %c0_19, %c0_20] : memref<1x32x16xbf16, #tpu.memory_space<vmem>>, vector<1x32x16xbf16>
    %13 = vector.shape_cast %12 : vector<1x32x16xbf16> to vector<32x16xbf16>
    %cst_21 = arith.constant dense<0.000000e+00> : vector<32x16xf32>
    %14 = tpu.matmul %11, %13, %cst_21 {dimension_numbers = #tpu.dot_dimension_numbers<[1], [0], [0], [1], [0, 0, 1, 1], [], []>} : vector<32x32xbf16>, vector<32x16xbf16>, vector<32x16xf32> -> vector<32x16xf32>
    %c0_22 = arith.constant 0 : index
    %c0_23 = arith.constant 0 : index
    %15 = vector.load %arg15[%c0_22, %c0_23] : memref<32x16xf32, #tpu.memory_space<vmem>>, vector<32x16xf32>
    tpu.vector_store %arg15[%c0_22, %c0_23], %14 {strides = array<i32>} : memref<32x16xf32, #tpu.memory_space<vmem>>, vector<32x16xf32>,
    %c0_24 = arith.constant 0 : index
    %c0_25 = arith.constant 0 : index
    %16 = vector.load %arg7[%c0_24, %c0_25] : memref<32x24xbf16, #tpu.memory_space<vmem>>, vector<32x24xbf16>
    %c0_26 = arith.constant 0 : index
    %c0_27 = arith.constant 0 : index
    %c0_28 = arith.constant 0 : index
    %17 = vector.load %arg3[%c0_26, %c0_27, %c0_28] : memref<1x24x64xbf16, #tpu.memory_space<vmem>>, vector<1x24x64xbf16>
    %18 = vector.shape_cast %17 : vector<1x24x64xbf16> to vector<24x64xbf16>
    %cst_29 = arith.constant dense<0.000000e+00> : vector<32x64xf32>
    %19 = tpu.matmul %16, %18, %cst_29 {dimension_numbers = #tpu.dot_dimension_numbers<[1], [0], [0], [1], [0, 0, 1, 1], [], []>} : vector<32x24xbf16>, vector<24x64xbf16>, vector<32x64xf32> -> vector<32x64xf32>
    %c0_30 = arith.constant 0 : index
    %c0_31 = arith.constant 0 : index
    %20 = vector.load %arg16[%c0_30, %c0_31] : memref<32x64xf32, #tpu.memory_space<vmem>>, vector<32x64xf32>
    tpu.vector_store %arg16[%c0_30, %c0_31], %19 {strides = array<i32>} : memref<32x64xf32, #tpu.memory_space<vmem>>, vector<32x64xf32>,
    %c0_32 = arith.constant 0 : index
    %c0_33 = arith.constant 0 : index
    %21 = vector.load %arg17[%c0_32, %c0_33] : memref<32x256xf32, #tpu.memory_space<vmem>>, vector<32x16xf32>
    %c0_34 = arith.constant 0 : index
    %c0_35 = arith.constant 0 : index
    %22 = vector.load %arg14[%c0_34, %c0_35] : memref<32x4xf32, #tpu.memory_space<vmem>>, vector<32x2xf32>
    %23 = arith.truncf %22 : vector<32x2xf32> to vector<32x2xbf16>
    %c0_36 = arith.constant 0 : index
    %c0_37 = arith.constant 0 : index
    %24 = vector.load %arg9[%c0_36, %c0_37] : memref<2x16xbf16, #tpu.memory_space<vmem>>, vector<2x16xbf16>
    %cst_38 = arith.constant dense<0.000000e+00> : vector<32x16xf32>
    %25 = tpu.matmul %23, %24, %cst_38 {dimension_numbers = #tpu.dot_dimension_numbers<[1], [0], [0], [1], [0, 0, 1, 1], [], []>} : vector<32x2xbf16>, vector<2x16xbf16>, vector<32x16xf32> -> vector<32x16xf32>
    %26 = arith.addf %21, %25 : vector<32x16xf32>
    %c0_39 = arith.constant 0 : index
    %c0_40 = arith.constant 0 : index
    %27 = vector.load %arg15[%c0_39, %c0_40] : memref<32x16xf32, #tpu.memory_space<vmem>>, vector<32x4xf32>
    %28 = arith.truncf %27 : vector<32x4xf32> to vector<32x4xbf16>
    %c0_41 = arith.constant 0 : index
    %c0_42 = arith.constant 0 : index
    %29 = vector.load %arg10[%c0_41, %c0_42] : memref<4x16xbf16, #tpu.memory_space<vmem>>, vector<4x16xbf16>
    %cst_43 = arith.constant dense<0.000000e+00> : vector<32x16xf32>
    %30 = tpu.matmul %28, %29, %cst_43 {dimension_numbers = #tpu.dot_dimension_numbers<[1], [0], [0], [1], [0, 0, 1, 1], [], []>} : vector<32x4xbf16>, vector<4x16xbf16>, vector<32x16xf32> -> vector<32x16xf32>
    %31 = arith.addf %26, %30 : vector<32x16xf32>
    %c0_44 = arith.constant 0 : index
    %c0_45 = arith.constant 0 : index
    %32 = vector.load %arg16[%c0_44, %c0_45] : memref<32x64xf32, #tpu.memory_space<vmem>>, vector<32x8xf32>
    %33 = arith.truncf %32 : vector<32x8xf32> to vector<32x8xbf16>
    %c0_46 = arith.constant 0 : index
    %c0_47 = arith.constant 0 : index
    %34 = vector.load %arg11[%c0_46, %c0_47] : memref<8x16xbf16, #tpu.memory_space<vmem>>, vector<8x16xbf16>
    %cst_48 = arith.constant dense<0.000000e+00> : vector<32x16xf32>
    %35 = tpu.matmul %33, %34, %cst_48 {dimension_numbers = #tpu.dot_dimension_numbers<[1], [0], [0], [1], [0, 0, 1, 1], [], []>} : vector<32x8xbf16>, vector<8x16xbf16>, vector<32x16xf32> -> vector<32x16xf32>
    %36 = arith.addf %31, %35 : vector<32x16xf32>
    %37 = vector.broadcast %0 : vector<32x1xf32> to vector<32x16xf32>
    %38 = arith.addf %36, %37 : vector<32x16xf32>
    %cst_49 = arith.constant 0.000000e+00 : f32
    %39 = vector.broadcast %cst_49 : f32 to vector<32x16xf32>
    %40 = arith.maximumf %38, %39 : vector<32x16xf32>
    %c0_i32 = arith.constant 0 : i32
    %c0_i32_50 = arith.constant 0 : i32
    %c0_i32_51 = arith.constant 0 : i32
    %41 = tpu.memref_slice %arg13[%c0_i32, %c0_i32_50, %c0_i32_51] : memref<1x32x256xf32, #tpu.memory_space<vmem>> -> memref<1x32x256xf32, #tpu.memory_space<vmem>>
    %42 = tpu.memref_squeeze %41 : memref<1x32x256xf32, #tpu.memory_space<vmem>> -> memref<32x256xf32, #tpu.memory_space<vmem>>
    %c0_52 = arith.constant 0 : index
    %c0_53 = arith.constant 0 : index
    %43 = vector.load %42[%c0_52, %c0_53] : memref<32x256xf32, #tpu.memory_space<vmem>>, vector<32x16xf32>
    tpu.vector_store %42[%c0_52, %c0_53], %40 {strides = array<i32>} : memref<32x256xf32, #tpu.memory_space<vmem>>, vector<32x16xf32>,
    %c0_54 = arith.constant 0 : index
    %c16 = arith.constant 16 : index
    %44 = vector.load %arg17[%c0_54, %c16] : memref<32x256xf32, #tpu.memory_space<vmem>>, vector<32x16xf32>
    %c0_55 = arith.constant 0 : index
    %c0_56 = arith.constant 0 : index
    %45 = vector.load %arg14[%c0_55, %c0_56] : memref<32x4xf32, #tpu.memory_space<vmem>>, vector<32x2xf32>
    %46 = arith.truncf %45 : vector<32x2xf32> to vector<32x2xbf16>
    %c0_57 = arith.constant 0 : index
    %c0_58 = arith.constant 0 : index
    %47 = vector.load %arg9[%c0_57, %c0_58] : memref<2x16xbf16, #tpu.memory_space<vmem>>, vector<2x16xbf16>
    %cst_59 = arith.constant dense<0.000000e+00> : vector<32x16xf32>
    %48 = tpu.matmul %46, %47, %cst_59 {dimension_numbers = #tpu.dot_dimension_numbers<[1], [0], [0], [1], [0, 0, 1, 1], [], []>} : vector<32x2xbf16>, vector<2x16xbf16>, vector<32x16xf32> -> vector<32x16xf32>
    %49 = arith.addf %44, %48 : vector<32x16xf32>
    %c0_60 = arith.constant 0 : index
    %c0_61 = arith.constant 0 : index
    %50 = vector.load %arg15[%c0_60, %c0_61] : memref<32x16xf32, #tpu.memory_space<vmem>>, vector<32x4xf32>
    %51 = arith.truncf %50 : vector<32x4xf32> to vector<32x4xbf16>
    %c0_62 = arith.constant 0 : index
    %c0_63 = arith.constant 0 : index
    %52 = vector.load %arg10[%c0_62, %c0_63] : memref<4x16xbf16, #tpu.memory_space<vmem>>, vector<4x16xbf16>
    %cst_64 = arith.constant dense<0.000000e+00> : vector<32x16xf32>
    %53 = tpu.matmul %51, %52, %cst_64 {dimension_numbers = #tpu.dot_dimension_numbers<[1], [0], [0], [1], [0, 0, 1, 1], [], []>} : vector<32x4xbf16>, vector<4x16xbf16>, vector<32x16xf32> -> vector<32x16xf32>
    %54 = arith.addf %49, %53 : vector<32x16xf32>
    %c0_65 = arith.constant 0 : index
    %c0_66 = arith.constant 0 : index
    %55 = vector.load %arg16[%c0_65, %c0_66] : memref<32x64xf32, #tpu.memory_space<vmem>>, vector<32x8xf32>
    %c0_67 = arith.constant 0 : index
    %c8 = arith.constant 8 : index
    %56 = vector.load %arg16[%c0_67, %c8] : memref<32x64xf32, #tpu.memory_space<vmem>>, vector<32x8xf32>
    %cst_68 = arith.constant 7.500000e-01 : f32
    %57 = vector.broadcast %cst_68 : f32 to vector<32x8xf32>
    %58 = arith.mulf %55, %57 : vector<32x8xf32>
    %cst_69 = arith.constant 2.500000e-01 : f32
    %59 = vector.broadcast %cst_69 : f32 to vector<32x8xf32>
    %60 = arith.mulf %56, %59 : vector<32x8xf32>
    %61 = arith.addf %58, %60 : vector<32x8xf32>
    %62 = arith.truncf %61 : vector<32x8xf32> to vector<32x8xbf16>
    %c0_70 = arith.constant 0 : index
    %c0_71 = arith.constant 0 : index
    %63 = vector.load %arg11[%c0_70, %c0_71] : memref<8x16xbf16, #tpu.memory_space<vmem>>, vector<8x16xbf16>
    %cst_72 = arith.constant dense<0.000000e+00> : vector<32x16xf32>
    %64 = tpu.matmul %62, %63, %cst_72 {dimension_numbers = #tpu.dot_dimension_numbers<[1], [0], [0], [1], [0, 0, 1, 1], [], []>} : vector<32x8xbf16>, vector<8x16xbf16>, vector<32x16xf32> -> vector<32x16xf32>
    %65 = arith.addf %54, %64 : vector<32x16xf32>
    %66 = vector.broadcast %0 : vector<32x1xf32> to vector<32x16xf32>
    %67 = arith.addf %65, %66 : vector<32x16xf32>
    %cst_73 = arith.constant 0.000000e+00 : f32
    %68 = vector.broadcast %cst_73 : f32 to vector<32x16xf32>
    %69 = arith.maximumf %67, %68 : vector<32x16xf32>
    %c0_i32_74 = arith.constant 0 : i32
    %c0_i32_75 = arith.constant 0 : i32
    %c0_i32_76 = arith.constant 0 : i32
    %70 = tpu.memref_slice %arg13[%c0_i32_74, %c0_i32_75, %c0_i32_76] : memref<1x32x256xf32, #tpu.memory_space<vmem>> -> memref<1x32x256xf32, #tpu.memory_space<vmem>>
    %71 = tpu.memref_squeeze %70 : memref<1x32x256xf32, #tpu.memory_space<vmem>> -> memref<32x256xf32, #tpu.memory_space<vmem>>
    %c0_77 = arith.constant 0 : index
    %c16_78 = arith.constant 16 : index
    %72 = vector.load %71[%c0_77, %c16_78] : memref<32x256xf32, #tpu.memory_space<vmem>>, vector<32x16xf32>
    tpu.vector_store %71[%c0_77, %c16_78], %69 {strides = array<i32>} : memref<32x256xf32, #tpu.memory_space<vmem>>, vector<32x16xf32>,
    %c0_79 = arith.constant 0 : index
    %c32 = arith.constant 32 : index
    %73 = vector.load %arg17[%c0_79, %c32] : memref<32x256xf32, #tpu.memory_space<vmem>>, vector<32x16xf32>
    %c0_80 = arith.constant 0 : index
    %c0_81 = arith.constant 0 : index
    %74 = vector.load %arg14[%c0_80, %c0_81] : memref<32x4xf32, #tpu.memory_space<vmem>>, vector<32x2xf32>
    %75 = arith.truncf %74 : vector<32x2xf32> to vector<32x2xbf16>
    %c0_82 = arith.constant 0 : index
    %c0_83 = arith.constant 0 : index
    %76 = vector.load %arg9[%c0_82, %c0_83] : memref<2x16xbf16, #tpu.memory_space<vmem>>, vector<2x16xbf16>
    %cst_84 = arith.constant dense<0.000000e+00> : vector<32x16xf32>
    %77 = tpu.matmul %75, %76, %cst_84 {dimension_numbers = #tpu.dot_dimension_numbers<[1], [0], [0], [1], [0, 0, 1, 1], [], []>} : vector<32x2xbf16>, vector<2x16xbf16>, vector<32x16xf32> -> vector<32x16xf32>
    %78 = arith.addf %73, %77 : vector<32x16xf32>
    %c0_85 = arith.constant 0 : index
    %c0_86 = arith.constant 0 : index
    %79 = vector.load %arg15[%c0_85, %c0_86] : memref<32x16xf32, #tpu.memory_space<vmem>>, vector<32x4xf32>
    %c0_87 = arith.constant 0 : index
    %c4 = arith.constant 4 : index
    %80 = vector.load %arg15[%c0_87, %c4] : memref<32x16xf32, #tpu.memory_space<vmem>>, vector<32x4xf32>
    %cst_88 = arith.constant 8.750000e-01 : f32
    %81 = vector.broadcast %cst_88 : f32 to vector<32x4xf32>
    %82 = arith.mulf %79, %81 : vector<32x4xf32>
    %cst_89 = arith.constant 1.250000e-01 : f32
    %83 = vector.broadcast %cst_89 : f32 to vector<32x4xf32>
    %84 = arith.mulf %80, %83 : vector<32x4xf32>
    %85 = arith.addf %82, %84 : vector<32x4xf32>
    %86 = arith.truncf %85 : vector<32x4xf32> to vector<32x4xbf16>
    %c0_90 = arith.constant 0 : index
    %c0_91 = arith.constant 0 : index
    %87 = vector.load %arg10[%c0_90, %c0_91] : memref<4x16xbf16, #tpu.memory_space<vmem>>, vector<4x16xbf16>
    %cst_92 = arith.constant dense<0.000000e+00> : vector<32x16xf32>
    %88 = tpu.matmul %86, %87, %cst_92 {dimension_numbers = #tpu.dot_dimension_numbers<[1], [0], [0], [1], [0, 0, 1, 1], [], []>} : vector<32x4xbf16>, vector<4x16xbf16>, vector<32x16xf32> -> vector<32x16xf32>
    %89 = arith.addf %78, %88 : vector<32x16xf32>
    %c0_93 = arith.constant 0 : index
    %c0_94 = arith.constant 0 : index
    %90 = vector.load %arg16[%c0_93, %c0_94] : memref<32x64xf32, #tpu.memory_space<vmem>>, vector<32x8xf32>
    %c0_95 = arith.constant 0 : index
    %c8_96 = arith.constant 8 : index
    %91 = vector.load %arg16[%c0_95, %c8_96] : memref<32x64xf32, #tpu.memory_space<vmem>>, vector<32x8xf32>
    %cst_97 = arith.constant 2.500000e-01 : f32
    %92 = vector.broadcast %cst_97 : f32 to vector<32x8xf32>
    %93 = arith.mulf %90, %92 : vector<32x8xf32>
    %cst_98 = arith.constant 7.500000e-01 : f32
    %94 = vector.broadcast %cst_98 : f32 to vector<32x8xf32>
    %95 = arith.mulf %91, %94 : vector<32x8xf32>
    %96 = arith.addf %93, %95 : vector<32x8xf32>
    %97 = arith.truncf %96 : vector<32x8xf32> to vector<32x8xbf16>
    %c0_99 = arith.constant 0 : index
    %c0_100 = arith.constant 0 : index
    %98 = vector.load %arg11[%c0_99, %c0_100] : memref<8x16xbf16, #tpu.memory_space<vmem>>, vector<8x16xbf16>
    %cst_101 = arith.constant dense<0.000000e+00> : vector<32x16xf32>
    %99 = tpu.matmul %97, %98, %cst_101 {dimension_numbers = #tpu.dot_dimension_numbers<[1], [0], [0], [1], [0, 0, 1, 1], [], []>} : vector<32x8xbf16>, vector<8x16xbf16>, vector<32x16xf32> -> vector<32x16xf32>
    %100 = arith.addf %89, %99 : vector<32x16xf32>
    %101 = vector.broadcast %0 : vector<32x1xf32> to vector<32x16xf32>
    %102 = arith.addf %100, %101 : vector<32x16xf32>
    %cst_102 = arith.constant 0.000000e+00 : f32
    %103 = vector.broadcast %cst_102 : f32 to vector<32x16xf32>
    %104 = arith.maximumf %102, %103 : vector<32x16xf32>
    %c0_i32_103 = arith.constant 0 : i32
    %c0_i32_104 = arith.constant 0 : i32
    %c0_i32_105 = arith.constant 0 : i32
    %105 = tpu.memref_slice %arg13[%c0_i32_103, %c0_i32_104, %c0_i32_105] : memref<1x32x256xf32, #tpu.memory_space<vmem>> -> memref<1x32x256xf32, #tpu.memory_space<vmem>>
    %106 = tpu.memref_squeeze %105 : memref<1x32x256xf32, #tpu.memory_space<vmem>> -> memref<32x256xf32, #tpu.memory_space<vmem>>
    %c0_106 = arith.constant 0 : index
    %c32_107 = arith.constant 32 : index
    %107 = vector.load %106[%c0_106, %c32_107] : memref<32x256xf32, #tpu.memory_space<vmem>>, vector<32x16xf32>
    tpu.vector_store %106[%c0_106, %c32_107], %104 {strides = array<i32>} : memref<32x256xf32, #tpu.memory_space<vmem>>, vector<32x16xf32>,
    %c0_108 = arith.constant 0 : index
    %c48 = arith.constant 48 : index
    %108 = vector.load %arg17[%c0_108, %c48] : memref<32x256xf32, #tpu.memory_space<vmem>>, vector<32x16xf32>
    %c0_109 = arith.constant 0 : index
    %c0_110 = arith.constant 0 : index
    %109 = vector.load %arg14[%c0_109, %c0_110] : memref<32x4xf32, #tpu.memory_space<vmem>>, vector<32x2xf32>
    %110 = arith.truncf %109 : vector<32x2xf32> to vector<32x2xbf16>
    %c0_111 = arith.constant 0 : index
    %c0_112 = arith.constant 0 : index
    %111 = vector.load %arg9[%c0_111, %c0_112] : memref<2x16xbf16, #tpu.memory_space<vmem>>, vector<2x16xbf16>
    %cst_113 = arith.constant dense<0.000000e+00> : vector<32x16xf32>
    %112 = tpu.matmul %110, %111, %cst_113 {dimension_numbers = #tpu.dot_dimension_numbers<[1], [0], [0], [1], [0, 0, 1, 1], [], []>} : vector<32x2xbf16>, vector<2x16xbf16>, vector<32x16xf32> -> vector<32x16xf32>
    %113 = arith.addf %108, %112 : vector<32x16xf32>
    %c0_114 = arith.constant 0 : index
    %c0_115 = arith.constant 0 : index
    %114 = vector.load %arg15[%c0_114, %c0_115] : memref<32x16xf32, #tpu.memory_space<vmem>>, vector<32x4xf32>
    %c0_116 = arith.constant 0 : index
    %c4_117 = arith.constant 4 : index
    %115 = vector.load %arg15[%c0_116, %c4_117] : memref<32x16xf32, #tpu.memory_space<vmem>>, vector<32x4xf32>
    %cst_118 = arith.constant 6.250000e-01 : f32
    %116 = vector.broadcast %cst_118 : f32 to vector<32x4xf32>
    %117 = arith.mulf %114, %116 : vector<32x4xf32>
    %cst_119 = arith.constant 3.750000e-01 : f32
    %118 = vector.broadcast %cst_119 : f32 to vector<32x4xf32>
    %119 = arith.mulf %115, %118 : vector<32x4xf32>
    %120 = arith.addf %117, %119 : vector<32x4xf32>
    %121 = arith.truncf %120 : vector<32x4xf32> to vector<32x4xbf16>
    %c0_120 = arith.constant 0 : index
    %c0_121 = arith.constant 0 : index
    %122 = vector.load %arg10[%c0_120, %c0_121] : memref<4x16xbf16, #tpu.memory_space<vmem>>, vector<4x16xbf16>
    %cst_122 = arith.constant dense<0.000000e+00> : vector<32x16xf32>
    %123 = tpu.matmul %121, %122, %cst_122 {dimension_numbers = #tpu.dot_dimension_numbers<[1], [0], [0], [1], [0, 0, 1, 1], [], []>} : vector<32x4xbf16>, vector<4x16xbf16>, vector<32x16xf32> -> vector<32x16xf32>
    %124 = arith.addf %113, %123 : vector<32x16xf32>
    %c0_123 = arith.constant 0 : index
    %c8_124 = arith.constant 8 : index
    %125 = vector.load %arg16[%c0_123, %c8_124] : memref<32x64xf32, #tpu.memory_space<vmem>>, vector<32x8xf32>
    %c0_125 = arith.constant 0 : index
    %c16_126 = arith.constant 16 : index
    %126 = vector.load %arg16[%c0_125, %c16_126] : memref<32x64xf32, #tpu.memory_space<vmem>>, vector<32x8xf32>
    %cst_127 = arith.constant 7.500000e-01 : f32
    %127 = vector.broadcast %cst_127 : f32 to vector<32x8xf32>
    %128 = arith.mulf %125, %127 : vector<32x8xf32>
    %cst_128 = arith.constant 2.500000e-01 : f32
    %129 = vector.broadcast %cst_128 : f32 to vector<32x8xf32>
    %130 = arith.mulf %126, %129 : vector<32x8xf32>
    %131 = arith.addf %128, %130 : vector<32x8xf32>
    %132 = arith.truncf %131 : vector<32x8xf32> to vector<32x8xbf16>
    %c0_129 = arith.constant 0 : index
    %c0_130 = arith.constant 0 : index
    %133 = vector.load %arg11[%c0_129, %c0_130] : memref<8x16xbf16, #tpu.memory_space<vmem>>, vector<8x16xbf16>
    %cst_131 = arith.constant dense<0.000000e+00> : vector<32x16xf32>
    %134 = tpu.matmul %132, %133, %cst_131 {dimension_numbers = #tpu.dot_dimension_numbers<[1], [0], [0], [1], [0, 0, 1, 1], [], []>} : vector<32x8xbf16>, vector<8x16xbf16>, vector<32x16xf32> -> vector<32x16xf32>
    %135 = arith.addf %124, %134 : vector<32x16xf32>
    %136 = vector.broadcast %0 : vector<32x1xf32> to vector<32x16xf32>
    %137 = arith.addf %135, %136 : vector<32x16xf32>
    %cst_132 = arith.constant 0.000000e+00 : f32
    %138 = vector.broadcast %cst_132 : f32 to vector<32x16xf32>
    %139 = arith.maximumf %137, %138 : vector<32x16xf32>
    %c0_i32_133 = arith.constant 0 : i32
    %c0_i32_134 = arith.constant 0 : i32
    %c0_i32_135 = arith.constant 0 : i32
    %140 = tpu.memref_slice %arg13[%c0_i32_133, %c0_i32_134, %c0_i32_135] : memref<1x32x256xf32, #tpu.memory_space<vmem>> -> memref<1x32x256xf32, #tpu.memory_space<vmem>>
    %141 = tpu.memref_squeeze %140 : memref<1x32x256xf32, #tpu.memory_space<vmem>> -> memref<32x256xf32, #tpu.memory_space<vmem>>
    %c0_136 = arith.constant 0 : index
    %c48_137 = arith.constant 48 : index
    %142 = vector.load %141[%c0_136, %c48_137] : memref<32x256xf32, #tpu.memory_space<vmem>>, vector<32x16xf32>
    tpu.vector_store %141[%c0_136, %c48_137], %139 {strides = array<i32>} : memref<32x256xf32, #tpu.memory_space<vmem>>, vector<32x16xf32>,
    %c0_138 = arith.constant 0 : index
    %c64 = arith.constant 64 : index
    %143 = vector.load %arg17[%c0_138, %c64] : memref<32x256xf32, #tpu.memory_space<vmem>>, vector<32x16xf32>
    %c0_139 = arith.constant 0 : index
    %c0_140 = arith.constant 0 : index
    %144 = vector.load %arg14[%c0_139, %c0_140] : memref<32x4xf32, #tpu.memory_space<vmem>>, vector<32x2xf32>
    %c0_141 = arith.constant 0 : index
    %c2 = arith.constant 2 : index
    %145 = vector.load %arg14[%c0_141, %c2] : memref<32x4xf32, #tpu.memory_space<vmem>>, vector<32x2xf32>
    %cst_142 = arith.constant 9.375000e-01 : f32
    %146 = vector.broadcast %cst_142 : f32 to vector<32x2xf32>
    %147 = arith.mulf %144, %146 : vector<32x2xf32>
    %cst_143 = arith.constant 6.250000e-02 : f32
    %148 = vector.broadcast %cst_143 : f32 to vector<32x2xf32>
    %149 = arith.mulf %145, %148 : vector<32x2xf32>
    %150 = arith.addf %147, %149 : vector<32x2xf32>
    %151 = arith.truncf %150 : vector<32x2xf32> to vector<32x2xbf16>
    %c0_144 = arith.constant 0 : index
    %c0_145 = arith.constant 0 : index
    %152 = vector.load %arg9[%c0_144, %c0_145] : memref<2x16xbf16, #tpu.memory_space<vmem>>, vector<2x16xbf16>
    %cst_146 = arith.constant dense<0.000000e+00> : vector<32x16xf32>
    %153 = tpu.matmul %151, %152, %cst_146 {dimension_numbers = #tpu.dot_dimension_numbers<[1], [0], [0], [1], [0, 0, 1, 1], [], []>} : vector<32x2xbf16>, vector<2x16xbf16>, vector<32x16xf32> -> vector<32x16xf32>
    %154 = arith.addf %143, %153 : vector<32x16xf32>
    %c0_147 = arith.constant 0 : index
    %c0_148 = arith.constant 0 : index
    %155 = vector.load %arg15[%c0_147, %c0_148] : memref<32x16xf32, #tpu.memory_space<vmem>>, vector<32x4xf32>
    %c0_149 = arith.constant 0 : index
    %c4_150 = arith.constant 4 : index
    %156 = vector.load %arg15[%c0_149, %c4_150] : memref<32x16xf32, #tpu.memory_space<vmem>>, vector<32x4xf32>
    %cst_151 = arith.constant 3.750000e-01 : f32
    %157 = vector.broadcast %cst_151 : f32 to vector<32x4xf32>
    %158 = arith.mulf %155, %157 : vector<32x4xf32>
    %cst_152 = arith.constant 6.250000e-01 : f32
    %159 = vector.broadcast %cst_152 : f32 to vector<32x4xf32>
    %160 = arith.mulf %156, %159 : vector<32x4xf32>
    %161 = arith.addf %158, %160 : vector<32x4xf32>
    %162 = arith.truncf %161 : vector<32x4xf32> to vector<32x4xbf16>
    %c0_153 = arith.constant 0 : index
    %c0_154 = arith.constant 0 : index
    %163 = vector.load %arg10[%c0_153, %c0_154] : memref<4x16xbf16, #tpu.memory_space<vmem>>, vector<4x16xbf16>
    %cst_155 = arith.constant dense<0.000000e+00> : vector<32x16xf32>
    %164 = tpu.matmul %162, %163, %cst_155 {dimension_numbers = #tpu.dot_dimension_numbers<[1], [0], [0], [1], [0, 0, 1, 1], [], []>} : vector<32x4xbf16>, vector<4x16xbf16>, vector<32x16xf32> -> vector<32x16xf32>
    %165 = arith.addf %154, %164 : vector<32x16xf32>
    %c0_156 = arith.constant 0 : index
    %c8_157 = arith.constant 8 : index
    %166 = vector.load %arg16[%c0_156, %c8_157] : memref<32x64xf32, #tpu.memory_space<vmem>>, vector<32x8xf32>
    %c0_158 = arith.constant 0 : index
    %c16_159 = arith.constant 16 : index
    %167 = vector.load %arg16[%c0_158, %c16_159] : memref<32x64xf32, #tpu.memory_space<vmem>>, vector<32x8xf32>
    %cst_160 = arith.constant 2.500000e-01 : f32
    %168 = vector.broadcast %cst_160 : f32 to vector<32x8xf32>
    %169 = arith.mulf %166, %168 : vector<32x8xf32>
    %cst_161 = arith.constant 7.500000e-01 : f32
    %170 = vector.broadcast %cst_161 : f32 to vector<32x8xf32>
    %171 = arith.mulf %167, %170 : vector<32x8xf32>
    %172 = arith.addf %169, %171 : vector<32x8xf32>
    %173 = arith.truncf %172 : vector<32x8xf32> to vector<32x8xbf16>
    %c0_162 = arith.constant 0 : index
    %c0_163 = arith.constant 0 : index
    %174 = vector.load %arg11[%c0_162, %c0_163] : memref<8x16xbf16, #tpu.memory_space<vmem>>, vector<8x16xbf16>
    %cst_164 = arith.constant dense<0.000000e+00> : vector<32x16xf32>
    %175 = tpu.matmul %173, %174, %cst_164 {dimension_numbers = #tpu.dot_dimension_numbers<[1], [0], [0], [1], [0, 0, 1, 1], [], []>} : vector<32x8xbf16>, vector<8x16xbf16>, vector<32x16xf32> -> vector<32x16xf32>
    %176 = arith.addf %165, %175 : vector<32x16xf32>
    %177 = vector.broadcast %0 : vector<32x1xf32> to vector<32x16xf32>
    %178 = arith.addf %176, %177 : vector<32x16xf32>
    %cst_165 = arith.constant 0.000000e+00 : f32
    %179 = vector.broadcast %cst_165 : f32 to vector<32x16xf32>
    %180 = arith.maximumf %178, %179 : vector<32x16xf32>
    %c0_i32_166 = arith.constant 0 : i32
    %c0_i32_167 = arith.constant 0 : i32
    %c0_i32_168 = arith.constant 0 : i32
    %181 = tpu.memref_slice %arg13[%c0_i32_166, %c0_i32_167, %c0_i32_168] : memref<1x32x256xf32, #tpu.memory_space<vmem>> -> memref<1x32x256xf32, #tpu.memory_space<vmem>>
    %182 = tpu.memref_squeeze %181 : memref<1x32x256xf32, #tpu.memory_space<vmem>> -> memref<32x256xf32, #tpu.memory_space<vmem>>
    %c0_169 = arith.constant 0 : index
    %c64_170 = arith.constant 64 : index
    %183 = vector.load %182[%c0_169, %c64_170] : memref<32x256xf32, #tpu.memory_space<vmem>>, vector<32x16xf32>
    tpu.vector_store %182[%c0_169, %c64_170], %180 {strides = array<i32>} : memref<32x256xf32, #tpu.memory_space<vmem>>, vector<32x16xf32>,
    %c0_171 = arith.constant 0 : index
    %c80 = arith.constant 80 : index
    %184 = vector.load %arg17[%c0_171, %c80] : memref<32x256xf32, #tpu.memory_space<vmem>>, vector<32x16xf32>
    %c0_172 = arith.constant 0 : index
    %c0_173 = arith.constant 0 : index
    %185 = vector.load %arg14[%c0_172, %c0_173] : memref<32x4xf32, #tpu.memory_space<vmem>>, vector<32x2xf32>
    %c0_174 = arith.constant 0 : index
    %c2_175 = arith.constant 2 : index
    %186 = vector.load %arg14[%c0_174, %c2_175] : memref<32x4xf32, #tpu.memory_space<vmem>>, vector<32x2xf32>
    %cst_176 = arith.constant 8.125000e-01 : f32
    %187 = vector.broadcast %cst_176 : f32 to vector<32x2xf32>
    %188 = arith.mulf %185, %187 : vector<32x2xf32>
    %cst_177 = arith.constant 1.875000e-01 : f32
    %189 = vector.broadcast %cst_177 : f32 to vector<32x2xf32>
    %190 = arith.mulf %186, %189 : vector<32x2xf32>
    %191 = arith.addf %188, %190 : vector<32x2xf32>
    %192 = arith.truncf %191 : vector<32x2xf32> to vector<32x2xbf16>
    %c0_178 = arith.constant 0 : index
    %c0_179 = arith.constant 0 : index
    %193 = vector.load %arg9[%c0_178, %c0_179] : memref<2x16xbf16, #tpu.memory_space<vmem>>, vector<2x16xbf16>
    %cst_180 = arith.constant dense<0.000000e+00> : vector<32x16xf32>
    %194 = tpu.matmul %192, %193, %cst_180 {dimension_numbers = #tpu.dot_dimension_numbers<[1], [0], [0], [1], [0, 0, 1, 1], [], []>} : vector<32x2xbf16>, vector<2x16xbf16>, vector<32x16xf32> -> vector<32x16xf32>
    %195 = arith.addf %184, %194 : vector<32x16xf32>
    %c0_181 = arith.constant 0 : index
    %c0_182 = arith.constant 0 : index
    %196 = vector.load %arg15[%c0_181, %c0_182] : memref<32x16xf32, #tpu.memory_space<vmem>>, vector<32x4xf32>
    %c0_183 = arith.constant 0 : index
    %c4_184 = arith.constant 4 : index
    %197 = vector.load %arg15[%c0_183, %c4_184] : memref<32x16xf32, #tpu.memory_space<vmem>>, vector<32x4xf32>
    %cst_185 = arith.constant 1.250000e-01 : f32
    %198 = vector.broadcast %cst_185 : f32 to vector<32x4xf32>
    %199 = arith.mulf %196, %198 : vector<32x4xf32>
    %cst_186 = arith.constant 8.750000e-01 : f32
    %200 = vector.broadcast %cst_186 : f32 to vector<32x4xf32>
    %201 = arith.mulf %197, %200 : vector<32x4xf32>
    %202 = arith.addf %199, %201 : vector<32x4xf32>
    %203 = arith.truncf %202 : vector<32x4xf32> to vector<32x4xbf16>
    %c0_187 = arith.constant 0 : index
    %c0_188 = arith.constant 0 : index
    %204 = vector.load %arg10[%c0_187, %c0_188] : memref<4x16xbf16, #tpu.memory_space<vmem>>, vector<4x16xbf16>
    %cst_189 = arith.constant dense<0.000000e+00> : vector<32x16xf32>
    %205 = tpu.matmul %203, %204, %cst_189 {dimension_numbers = #tpu.dot_dimension_numbers<[1], [0], [0], [1], [0, 0, 1, 1], [], []>} : vector<32x4xbf16>, vector<4x16xbf16>, vector<32x16xf32> -> vector<32x16xf32>
    %206 = arith.addf %195, %205 : vector<32x16xf32>
    %c0_190 = arith.constant 0 : index
    %c16_191 = arith.constant 16 : index
    %207 = vector.load %arg16[%c0_190, %c16_191] : memref<32x64xf32, #tpu.memory_space<vmem>>, vector<32x8xf32>
    %c0_192 = arith.constant 0 : index
    %c24 = arith.constant 24 : index
    %208 = vector.load %arg16[%c0_192, %c24] : memref<32x64xf32, #tpu.memory_space<vmem>>, vector<32x8xf32>
    %cst_193 = arith.constant 7.500000e-01 : f32
    %209 = vector.broadcast %cst_193 : f32 to vector<32x8xf32>
    %210 = arith.mulf %207, %209 : vector<32x8xf32>
    %cst_194 = arith.constant 2.500000e-01 : f32
    %211 = vector.broadcast %cst_194 : f32 to vector<32x8xf32>
    %212 = arith.mulf %208, %211 : vector<32x8xf32>
    %213 = arith.addf %210, %212 : vector<32x8xf32>
    %214 = arith.truncf %213 : vector<32x8xf32> to vector<32x8xbf16>
    %c0_195 = arith.constant 0 : index
    %c0_196 = arith.constant 0 : index
    %215 = vector.load %arg11[%c0_195, %c0_196] : memref<8x16xbf16, #tpu.memory_space<vmem>>, vector<8x16xbf16>
    %cst_197 = arith.constant dense<0.000000e+00> : vector<32x16xf32>
    %216 = tpu.matmul %214, %215, %cst_197 {dimension_numbers = #tpu.dot_dimension_numbers<[1], [0], [0], [1], [0, 0, 1, 1], [], []>} : vector<32x8xbf16>, vector<8x16xbf16>, vector<32x16xf32> -> vector<32x16xf32>
    %217 = arith.addf %206, %216 : vector<32x16xf32>
    %218 = vector.broadcast %0 : vector<32x1xf32> to vector<32x16xf32>
    %219 = arith.addf %217, %218 : vector<32x16xf32>
    %cst_198 = arith.constant 0.000000e+00 : f32
    %220 = vector.broadcast %cst_198 : f32 to vector<32x16xf32>
    %221 = arith.maximumf %219, %220 : vector<32x16xf32>
    %c0_i32_199 = arith.constant 0 : i32
    %c0_i32_200 = arith.constant 0 : i32
    %c0_i32_201 = arith.constant 0 : i32
    %222 = tpu.memref_slice %arg13[%c0_i32_199, %c0_i32_200, %c0_i32_201] : memref<1x32x256xf32, #tpu.memory_space<vmem>> -> memref<1x32x256xf32, #tpu.memory_space<vmem>>
    %223 = tpu.memref_squeeze %222 : memref<1x32x256xf32, #tpu.memory_space<vmem>> -> memref<32x256xf32, #tpu.memory_space<vmem>>
    %c0_202 = arith.constant 0 : index
    %c80_203 = arith.constant 80 : index
    %224 = vector.load %223[%c0_202, %c80_203] : memref<32x256xf32, #tpu.memory_space<vmem>>, vector<32x16xf32>
    tpu.vector_store %223[%c0_202, %c80_203], %221 {strides = array<i32>} : memref<32x256xf32, #tpu.memory_space<vmem>>, vector<32x16xf32>,
    %c0_204 = arith.constant 0 : index
    %c96 = arith.constant 96 : index
    %225 = vector.load %arg17[%c0_204, %c96] : memref<32x256xf32, #tpu.memory_space<vmem>>, vector<32x16xf32>
    %c0_205 = arith.constant 0 : index
    %c0_206 = arith.constant 0 : index
    %226 = vector.load %arg14[%c0_205, %c0_206] : memref<32x4xf32, #tpu.memory_space<vmem>>, vector<32x2xf32>
    %c0_207 = arith.constant 0 : index
    %c2_208 = arith.constant 2 : index
    %227 = vector.load %arg14[%c0_207, %c2_208] : memref<32x4xf32, #tpu.memory_space<vmem>>, vector<32x2xf32>
    %cst_209 = arith.constant 6.875000e-01 : f32
    %228 = vector.broadcast %cst_209 : f32 to vector<32x2xf32>
    %229 = arith.mulf %226, %228 : vector<32x2xf32>
    %cst_210 = arith.constant 3.125000e-01 : f32
    %230 = vector.broadcast %cst_210 : f32 to vector<32x2xf32>
    %231 = arith.mulf %227, %230 : vector<32x2xf32>
    %232 = arith.addf %229, %231 : vector<32x2xf32>
    %233 = arith.truncf %232 : vector<32x2xf32> to vector<32x2xbf16>
    %c0_211 = arith.constant 0 : index
    %c0_212 = arith.constant 0 : index
    %234 = vector.load %arg9[%c0_211, %c0_212] : memref<2x16xbf16, #tpu.memory_space<vmem>>, vector<2x16xbf16>
    %cst_213 = arith.constant dense<0.000000e+00> : vector<32x16xf32>
    %235 = tpu.matmul %233, %234, %cst_213 {dimension_numbers = #tpu.dot_dimension_numbers<[1], [0], [0], [1], [0, 0, 1, 1], [], []>} : vector<32x2xbf16>, vector<2x16xbf16>, vector<32x16xf32> -> vector<32x16xf32>
    %236 = arith.addf %225, %235 : vector<32x16xf32>
    %c0_214 = arith.constant 0 : index
    %c4_215 = arith.constant 4 : index
    %237 = vector.load %arg15[%c0_214, %c4_215] : memref<32x16xf32, #tpu.memory_space<vmem>>, vector<32x4xf32>
    %c0_216 = arith.constant 0 : index
    %c8_217 = arith.constant 8 : index
    %238 = vector.load %arg15[%c0_216, %c8_217] : memref<32x16xf32, #tpu.memory_space<vmem>>, vector<32x4xf32>
    %cst_218 = arith.constant 8.750000e-01 : f32
    %239 = vector.broadcast %cst_218 : f32 to vector<32x4xf32>
    %240 = arith.mulf %237, %239 : vector<32x4xf32>
    %cst_219 = arith.constant 1.250000e-01 : f32
    %241 = vector.broadcast %cst_219 : f32 to vector<32x4xf32>
    %242 = arith.mulf %238, %241 : vector<32x4xf32>
    %243 = arith.addf %240, %242 : vector<32x4xf32>
    %244 = arith.truncf %243 : vector<32x4xf32> to vector<32x4xbf16>
    %c0_220 = arith.constant 0 : index
    %c0_221 = arith.constant 0 : index
    %245 = vector.load %arg10[%c0_220, %c0_221] : memref<4x16xbf16, #tpu.memory_space<vmem>>, vector<4x16xbf16>
    %cst_222 = arith.constant dense<0.000000e+00> : vector<32x16xf32>
    %246 = tpu.matmul %244, %245, %cst_222 {dimension_numbers = #tpu.dot_dimension_numbers<[1], [0], [0], [1], [0, 0, 1, 1], [], []>} : vector<32x4xbf16>, vector<4x16xbf16>, vector<32x16xf32> -> vector<32x16xf32>
    %247 = arith.addf %236, %246 : vector<32x16xf32>
    %c0_223 = arith.constant 0 : index
    %c16_224 = arith.constant 16 : index
    %248 = vector.load %arg16[%c0_223, %c16_224] : memref<32x64xf32, #tpu.memory_space<vmem>>, vector<32x8xf32>
    %c0_225 = arith.constant 0 : index
    %c24_226 = arith.constant 24 : index
    %249 = vector.load %arg16[%c0_225, %c24_226] : memref<32x64xf32, #tpu.memory_space<vmem>>, vector<32x8xf32>
    %cst_227 = arith.constant 2.500000e-01 : f32
    %250 = vector.broadcast %cst_227 : f32 to vector<32x8xf32>
    %251 = arith.mulf %248, %250 : vector<32x8xf32>
    %cst_228 = arith.constant 7.500000e-01 : f32
    %252 = vector.broadcast %cst_228 : f32 to vector<32x8xf32>
    %253 = arith.mulf %249, %252 : vector<32x8xf32>
    %254 = arith.addf %251, %253 : vector<32x8xf32>
    %255 = arith.truncf %254 : vector<32x8xf32> to vector<32x8xbf16>
    %c0_229 = arith.constant 0 : index
    %c0_230 = arith.constant 0 : index
    %256 = vector.load %arg11[%c0_229, %c0_230] : memref<8x16xbf16, #tpu.memory_space<vmem>>, vector<8x16xbf16>
    %cst_231 = arith.constant dense<0.000000e+00> : vector<32x16xf32>
    %257 = tpu.matmul %255, %256, %cst_231 {dimension_numbers = #tpu.dot_dimension_numbers<[1], [0], [0], [1], [0, 0, 1, 1], [], []>} : vector<32x8xbf16>, vector<8x16xbf16>, vector<32x16xf32> -> vector<32x16xf32>
    %258 = arith.addf %247, %257 : vector<32x16xf32>
    %259 = vector.broadcast %0 : vector<32x1xf32> to vector<32x16xf32>
    %260 = arith.addf %258, %259 : vector<32x16xf32>
    %cst_232 = arith.constant 0.000000e+00 : f32
    %261 = vector.broadcast %cst_232 : f32 to vector<32x16xf32>
    %262 = arith.maximumf %260, %261 : vector<32x16xf32>
    %c0_i32_233 = arith.constant 0 : i32
    %c0_i32_234 = arith.constant 0 : i32
    %c0_i32_235 = arith.constant 0 : i32
    %263 = tpu.memref_slice %arg13[%c0_i32_233, %c0_i32_234, %c0_i32_235] : memref<1x32x256xf32, #tpu.memory_space<vmem>> -> memref<1x32x256xf32, #tpu.memory_space<vmem>>
    %264 = tpu.memref_squeeze %263 : memref<1x32x256xf32, #tpu.memory_space<vmem>> -> memref<32x256xf32, #tpu.memory_space<vmem>>
    %c0_236 = arith.constant 0 : index
    %c96_237 = arith.constant 96 : index
    %265 = vector.load %264[%c0_236, %c96_237] : memref<32x256xf32, #tpu.memory_space<vmem>>, vector<32x16xf32>
    tpu.vector_store %264[%c0_236, %c96_237], %262 {strides = array<i32>} : memref<32x256xf32, #tpu.memory_space<vmem>>, vector<32x16xf32>,
    %c0_238 = arith.constant 0 : index
    %c112 = arith.constant 112 : index
    %266 = vector.load %arg17[%c0_238, %c112] : memref<32x256xf32, #tpu.memory_space<vmem>>, vector<32x16xf32>
    %c0_239 = arith.constant 0 : index
    %c0_240 = arith.constant 0 : index
    %267 = vector.load %arg14[%c0_239, %c0_240] : memref<32x4xf32, #tpu.memory_space<vmem>>, vector<32x2xf32>
    %c0_241 = arith.constant 0 : index
    %c2_242 = arith.constant 2 : index
    %268 = vector.load %arg14[%c0_241, %c2_242] : memref<32x4xf32, #tpu.memory_space<vmem>>, vector<32x2xf32>
    %cst_243 = arith.constant 5.625000e-01 : f32
    %269 = vector.broadcast %cst_243 : f32 to vector<32x2xf32>
    %270 = arith.mulf %267, %269 : vector<32x2xf32>
    %cst_244 = arith.constant 4.375000e-01 : f32
    %271 = vector.broadcast %cst_244 : f32 to vector<32x2xf32>
    %272 = arith.mulf %268, %271 : vector<32x2xf32>
    %273 = arith.addf %270, %272 : vector<32x2xf32>
    %274 = arith.truncf %273 : vector<32x2xf32> to vector<32x2xbf16>
    %c0_245 = arith.constant 0 : index
    %c0_246 = arith.constant 0 : index
    %275 = vector.load %arg9[%c0_245, %c0_246] : memref<2x16xbf16, #tpu.memory_space<vmem>>, vector<2x16xbf16>
    %cst_247 = arith.constant dense<0.000000e+00> : vector<32x16xf32>
    %276 = tpu.matmul %274, %275, %cst_247 {dimension_numbers = #tpu.dot_dimension_numbers<[1], [0], [0], [1], [0, 0, 1, 1], [], []>} : vector<32x2xbf16>, vector<2x16xbf16>, vector<32x16xf32> -> vector<32x16xf32>
    %277 = arith.addf %266, %276 : vector<32x16xf32>
    %c0_248 = arith.constant 0 : index
    %c4_249 = arith.constant 4 : index
    %278 = vector.load %arg15[%c0_248, %c4_249] : memref<32x16xf32, #tpu.memory_space<vmem>>, vector<32x4xf32>
    %c0_250 = arith.constant 0 : index
    %c8_251 = arith.constant 8 : index
    %279 = vector.load %arg15[%c0_250, %c8_251] : memref<32x16xf32, #tpu.memory_space<vmem>>, vector<32x4xf32>
    %cst_252 = arith.constant 6.250000e-01 : f32
    %280 = vector.broadcast %cst_252 : f32 to vector<32x4xf32>
    %281 = arith.mulf %278, %280 : vector<32x4xf32>
    %cst_253 = arith.constant 3.750000e-01 : f32
    %282 = vector.broadcast %cst_253 : f32 to vector<32x4xf32>
    %283 = arith.mulf %279, %282 : vector<32x4xf32>
    %284 = arith.addf %281, %283 : vector<32x4xf32>
    %285 = arith.truncf %284 : vector<32x4xf32> to vector<32x4xbf16>
    %c0_254 = arith.constant 0 : index
    %c0_255 = arith.constant 0 : index
    %286 = vector.load %arg10[%c0_254, %c0_255] : memref<4x16xbf16, #tpu.memory_space<vmem>>, vector<4x16xbf16>
    %cst_256 = arith.constant dense<0.000000e+00> : vector<32x16xf32>
    %287 = tpu.matmul %285, %286, %cst_256 {dimension_numbers = #tpu.dot_dimension_numbers<[1], [0], [0], [1], [0, 0, 1, 1], [], []>} : vector<32x4xbf16>, vector<4x16xbf16>, vector<32x16xf32> -> vector<32x16xf32>
    %288 = arith.addf %277, %287 : vector<32x16xf32>
    %c0_257 = arith.constant 0 : index
    %c24_258 = arith.constant 24 : index
    %289 = vector.load %arg16[%c0_257, %c24_258] : memref<32x64xf32, #tpu.memory_space<vmem>>, vector<32x8xf32>
    %c0_259 = arith.constant 0 : index
    %c32_260 = arith.constant 32 : index
    %290 = vector.load %arg16[%c0_259, %c32_260] : memref<32x64xf32, #tpu.memory_space<vmem>>, vector<32x8xf32>
    %cst_261 = arith.constant 7.500000e-01 : f32
    %291 = vector.broadcast %cst_261 : f32 to vector<32x8xf32>
    %292 = arith.mulf %289, %291 : vector<32x8xf32>
    %cst_262 = arith.constant 2.500000e-01 : f32
    %293 = vector.broadcast %cst_262 : f32 to vector<32x8xf32>
    %294 = arith.mulf %290, %293 : vector<32x8xf32>
    %295 = arith.addf %292, %294 : vector<32x8xf32>
    %296 = arith.truncf %295 : vector<32x8xf32> to vector<32x8xbf16>
    %c0_263 = arith.constant 0 : index
    %c0_264 = arith.constant 0 : index
    %297 = vector.load %arg11[%c0_263, %c0_264] : memref<8x16xbf16, #tpu.memory_space<vmem>>, vector<8x16xbf16>
    %cst_265 = arith.constant dense<0.000000e+00> : vector<32x16xf32>
    %298 = tpu.matmul %296, %297, %cst_265 {dimension_numbers = #tpu.dot_dimension_numbers<[1], [0], [0], [1], [0, 0, 1, 1], [], []>} : vector<32x8xbf16>, vector<8x16xbf16>, vector<32x16xf32> -> vector<32x16xf32>
    %299 = arith.addf %288, %298 : vector<32x16xf32>
    %300 = vector.broadcast %0 : vector<32x1xf32> to vector<32x16xf32>
    %301 = arith.addf %299, %300 : vector<32x16xf32>
    %cst_266 = arith.constant 0.000000e+00 : f32
    %302 = vector.broadcast %cst_266 : f32 to vector<32x16xf32>
    %303 = arith.maximumf %301, %302 : vector<32x16xf32>
    %c0_i32_267 = arith.constant 0 : i32
    %c0_i32_268 = arith.constant 0 : i32
    %c0_i32_269 = arith.constant 0 : i32
    %304 = tpu.memref_slice %arg13[%c0_i32_267, %c0_i32_268, %c0_i32_269] : memref<1x32x256xf32, #tpu.memory_space<vmem>> -> memref<1x32x256xf32, #tpu.memory_space<vmem>>
    %305 = tpu.memref_squeeze %304 : memref<1x32x256xf32, #tpu.memory_space<vmem>> -> memref<32x256xf32, #tpu.memory_space<vmem>>
    %c0_270 = arith.constant 0 : index
    %c112_271 = arith.constant 112 : index
    %306 = vector.load %305[%c0_270, %c112_271] : memref<32x256xf32, #tpu.memory_space<vmem>>, vector<32x16xf32>
    tpu.vector_store %305[%c0_270, %c112_271], %303 {strides = array<i32>} : memref<32x256xf32, #tpu.memory_space<vmem>>, vector<32x16xf32>,
    %c0_272 = arith.constant 0 : index
    %c128 = arith.constant 128 : index
    %307 = vector.load %arg17[%c0_272, %c128] : memref<32x256xf32, #tpu.memory_space<vmem>>, vector<32x16xf32>
    %c0_273 = arith.constant 0 : index
    %c0_274 = arith.constant 0 : index
    %308 = vector.load %arg14[%c0_273, %c0_274] : memref<32x4xf32, #tpu.memory_space<vmem>>, vector<32x2xf32>
    %c0_275 = arith.constant 0 : index
    %c2_276 = arith.constant 2 : index
    %309 = vector.load %arg14[%c0_275, %c2_276] : memref<32x4xf32, #tpu.memory_space<vmem>>, vector<32x2xf32>
    %cst_277 = arith.constant 4.375000e-01 : f32
    %310 = vector.broadcast %cst_277 : f32 to vector<32x2xf32>
    %311 = arith.mulf %308, %310 : vector<32x2xf32>
    %cst_278 = arith.constant 5.625000e-01 : f32
    %312 = vector.broadcast %cst_278 : f32 to vector<32x2xf32>
    %313 = arith.mulf %309, %312 : vector<32x2xf32>
    %314 = arith.addf %311, %313 : vector<32x2xf32>
    %315 = arith.truncf %314 : vector<32x2xf32> to vector<32x2xbf16>
    %c0_279 = arith.constant 0 : index
    %c0_280 = arith.constant 0 : index
    %316 = vector.load %arg9[%c0_279, %c0_280] : memref<2x16xbf16, #tpu.memory_space<vmem>>, vector<2x16xbf16>
    %cst_281 = arith.constant dense<0.000000e+00> : vector<32x16xf32>
    %317 = tpu.matmul %315, %316, %cst_281 {dimension_numbers = #tpu.dot_dimension_numbers<[1], [0], [0], [1], [0, 0, 1, 1], [], []>} : vector<32x2xbf16>, vector<2x16xbf16>, vector<32x16xf32> -> vector<32x16xf32>
    %318 = arith.addf %307, %317 : vector<32x16xf32>
    %c0_282 = arith.constant 0 : index
    %c4_283 = arith.constant 4 : index
    %319 = vector.load %arg15[%c0_282, %c4_283] : memref<32x16xf32, #tpu.memory_space<vmem>>, vector<32x4xf32>
    %c0_284 = arith.constant 0 : index
    %c8_285 = arith.constant 8 : index
    %320 = vector.load %arg15[%c0_284, %c8_285] : memref<32x16xf32, #tpu.memory_space<vmem>>, vector<32x4xf32>
    %cst_286 = arith.constant 3.750000e-01 : f32
    %321 = vector.broadcast %cst_286 : f32 to vector<32x4xf32>
    %322 = arith.mulf %319, %321 : vector<32x4xf32>
    %cst_287 = arith.constant 6.250000e-01 : f32
    %323 = vector.broadcast %cst_287 : f32 to vector<32x4xf32>
    %324 = arith.mulf %320, %323 : vector<32x4xf32>
    %325 = arith.addf %322, %324 : vector<32x4xf32>
    %326 = arith.truncf %325 : vector<32x4xf32> to vector<32x4xbf16>
    %c0_288 = arith.constant 0 : index
    %c0_289 = arith.constant 0 : index
    %327 = vector.load %arg10[%c0_288, %c0_289] : memref<4x16xbf16, #tpu.memory_space<vmem>>, vector<4x16xbf16>
    %cst_290 = arith.constant dense<0.000000e+00> : vector<32x16xf32>
    %328 = tpu.matmul %326, %327, %cst_290 {dimension_numbers = #tpu.dot_dimension_numbers<[1], [0], [0], [1], [0, 0, 1, 1], [], []>} : vector<32x4xbf16>, vector<4x16xbf16>, vector<32x16xf32> -> vector<32x16xf32>
    %329 = arith.addf %318, %328 : vector<32x16xf32>
    %c0_291 = arith.constant 0 : index
    %c24_292 = arith.constant 24 : index
    %330 = vector.load %arg16[%c0_291, %c24_292] : memref<32x64xf32, #tpu.memory_space<vmem>>, vector<32x8xf32>
    %c0_293 = arith.constant 0 : index
    %c32_294 = arith.constant 32 : index
    %331 = vector.load %arg16[%c0_293, %c32_294] : memref<32x64xf32, #tpu.memory_space<vmem>>, vector<32x8xf32>
    %cst_295 = arith.constant 2.500000e-01 : f32
    %332 = vector.broadcast %cst_295 : f32 to vector<32x8xf32>
    %333 = arith.mulf %330, %332 : vector<32x8xf32>
    %cst_296 = arith.constant 7.500000e-01 : f32
    %334 = vector.broadcast %cst_296 : f32 to vector<32x8xf32>
    %335 = arith.mulf %331, %334 : vector<32x8xf32>
    %336 = arith.addf %333, %335 : vector<32x8xf32>
    %337 = arith.truncf %336 : vector<32x8xf32> to vector<32x8xbf16>
    %c0_297 = arith.constant 0 : index
    %c0_298 = arith.constant 0 : index
    %338 = vector.load %arg11[%c0_297, %c0_298] : memref<8x16xbf16, #tpu.memory_space<vmem>>, vector<8x16xbf16>
    %cst_299 = arith.constant dense<0.000000e+00> : vector<32x16xf32>
    %339 = tpu.matmul %337, %338, %cst_299 {dimension_numbers = #tpu.dot_dimension_numbers<[1], [0], [0], [1], [0, 0, 1, 1], [], []>} : vector<32x8xbf16>, vector<8x16xbf16>, vector<32x16xf32> -> vector<32x16xf32>
    %340 = arith.addf %329, %339 : vector<32x16xf32>
    %341 = vector.broadcast %0 : vector<32x1xf32> to vector<32x16xf32>
    %342 = arith.addf %340, %341 : vector<32x16xf32>
    %cst_300 = arith.constant 0.000000e+00 : f32
    %343 = vector.broadcast %cst_300 : f32 to vector<32x16xf32>
    %344 = arith.maximumf %342, %343 : vector<32x16xf32>
    %c0_i32_301 = arith.constant 0 : i32
    %c0_i32_302 = arith.constant 0 : i32
    %c0_i32_303 = arith.constant 0 : i32
    %345 = tpu.memref_slice %arg13[%c0_i32_301, %c0_i32_302, %c0_i32_303] : memref<1x32x256xf32, #tpu.memory_space<vmem>> -> memref<1x32x256xf32, #tpu.memory_space<vmem>>
    %346 = tpu.memref_squeeze %345 : memref<1x32x256xf32, #tpu.memory_space<vmem>> -> memref<32x256xf32, #tpu.memory_space<vmem>>
    %c0_304 = arith.constant 0 : index
    %c128_305 = arith.constant 128 : index
    %347 = vector.load %346[%c0_304, %c128_305] : memref<32x256xf32, #tpu.memory_space<vmem>>, vector<32x16xf32>
    tpu.vector_store %346[%c0_304, %c128_305], %344 {strides = array<i32>} : memref<32x256xf32, #tpu.memory_space<vmem>>, vector<32x16xf32>,
    %c0_306 = arith.constant 0 : index
    %c144 = arith.constant 144 : index
    %348 = vector.load %arg17[%c0_306, %c144] : memref<32x256xf32, #tpu.memory_space<vmem>>, vector<32x16xf32>
    %c0_307 = arith.constant 0 : index
    %c0_308 = arith.constant 0 : index
    %349 = vector.load %arg14[%c0_307, %c0_308] : memref<32x4xf32, #tpu.memory_space<vmem>>, vector<32x2xf32>
    %c0_309 = arith.constant 0 : index
    %c2_310 = arith.constant 2 : index
    %350 = vector.load %arg14[%c0_309, %c2_310] : memref<32x4xf32, #tpu.memory_space<vmem>>, vector<32x2xf32>
    %cst_311 = arith.constant 3.125000e-01 : f32
    %351 = vector.broadcast %cst_311 : f32 to vector<32x2xf32>
    %352 = arith.mulf %349, %351 : vector<32x2xf32>
    %cst_312 = arith.constant 6.875000e-01 : f32
    %353 = vector.broadcast %cst_312 : f32 to vector<32x2xf32>
    %354 = arith.mulf %350, %353 : vector<32x2xf32>
    %355 = arith.addf %352, %354 : vector<32x2xf32>
    %356 = arith.truncf %355 : vector<32x2xf32> to vector<32x2xbf16>
    %c0_313 = arith.constant 0 : index
    %c0_314 = arith.constant 0 : index
    %357 = vector.load %arg9[%c0_313, %c0_314] : memref<2x16xbf16, #tpu.memory_space<vmem>>, vector<2x16xbf16>
    %cst_315 = arith.constant dense<0.000000e+00> : vector<32x16xf32>
    %358 = tpu.matmul %356, %357, %cst_315 {dimension_numbers = #tpu.dot_dimension_numbers<[1], [0], [0], [1], [0, 0, 1, 1], [], []>} : vector<32x2xbf16>, vector<2x16xbf16>, vector<32x16xf32> -> vector<32x16xf32>
    %359 = arith.addf %348, %358 : vector<32x16xf32>
    %c0_316 = arith.constant 0 : index
    %c4_317 = arith.constant 4 : index
    %360 = vector.load %arg15[%c0_316, %c4_317] : memref<32x16xf32, #tpu.memory_space<vmem>>, vector<32x4xf32>
    %c0_318 = arith.constant 0 : index
    %c8_319 = arith.constant 8 : index
    %361 = vector.load %arg15[%c0_318, %c8_319] : memref<32x16xf32, #tpu.memory_space<vmem>>, vector<32x4xf32>
    %cst_320 = arith.constant 1.250000e-01 : f32
    %362 = vector.broadcast %cst_320 : f32 to vector<32x4xf32>
    %363 = arith.mulf %360, %362 : vector<32x4xf32>
    %cst_321 = arith.constant 8.750000e-01 : f32
    %364 = vector.broadcast %cst_321 : f32 to vector<32x4xf32>
    %365 = arith.mulf %361, %364 : vector<32x4xf32>
    %366 = arith.addf %363, %365 : vector<32x4xf32>
    %367 = arith.truncf %366 : vector<32x4xf32> to vector<32x4xbf16>
    %c0_322 = arith.constant 0 : index
    %c0_323 = arith.constant 0 : index
    %368 = vector.load %arg10[%c0_322, %c0_323] : memref<4x16xbf16, #tpu.memory_space<vmem>>, vector<4x16xbf16>
    %cst_324 = arith.constant dense<0.000000e+00> : vector<32x16xf32>
    %369 = tpu.matmul %367, %368, %cst_324 {dimension_numbers = #tpu.dot_dimension_numbers<[1], [0], [0], [1], [0, 0, 1, 1], [], []>} : vector<32x4xbf16>, vector<4x16xbf16>, vector<32x16xf32> -> vector<32x16xf32>
    %370 = arith.addf %359, %369 : vector<32x16xf32>
    %c0_325 = arith.constant 0 : index
    %c32_326 = arith.constant 32 : index
    %371 = vector.load %arg16[%c0_325, %c32_326] : memref<32x64xf32, #tpu.memory_space<vmem>>, vector<32x8xf32>
    %c0_327 = arith.constant 0 : index
    %c40 = arith.constant 40 : index
    %372 = vector.load %arg16[%c0_327, %c40] : memref<32x64xf32, #tpu.memory_space<vmem>>, vector<32x8xf32>
    %cst_328 = arith.constant 7.500000e-01 : f32
    %373 = vector.broadcast %cst_328 : f32 to vector<32x8xf32>
    %374 = arith.mulf %371, %373 : vector<32x8xf32>
    %cst_329 = arith.constant 2.500000e-01 : f32
    %375 = vector.broadcast %cst_329 : f32 to vector<32x8xf32>
    %376 = arith.mulf %372, %375 : vector<32x8xf32>
    %377 = arith.addf %374, %376 : vector<32x8xf32>
    %378 = arith.truncf %377 : vector<32x8xf32> to vector<32x8xbf16>
    %c0_330 = arith.constant 0 : index
    %c0_331 = arith.constant 0 : index
    %379 = vector.load %arg11[%c0_330, %c0_331] : memref<8x16xbf16, #tpu.memory_space<vmem>>, vector<8x16xbf16>
    %cst_332 = arith.constant dense<0.000000e+00> : vector<32x16xf32>
    %380 = tpu.matmul %378, %379, %cst_332 {dimension_numbers = #tpu.dot_dimension_numbers<[1], [0], [0], [1], [0, 0, 1, 1], [], []>} : vector<32x8xbf16>, vector<8x16xbf16>, vector<32x16xf32> -> vector<32x16xf32>
    %381 = arith.addf %370, %380 : vector<32x16xf32>
    %382 = vector.broadcast %0 : vector<32x1xf32> to vector<32x16xf32>
    %383 = arith.addf %381, %382 : vector<32x16xf32>
    %cst_333 = arith.constant 0.000000e+00 : f32
    %384 = vector.broadcast %cst_333 : f32 to vector<32x16xf32>
    %385 = arith.maximumf %383, %384 : vector<32x16xf32>
    %c0_i32_334 = arith.constant 0 : i32
    %c0_i32_335 = arith.constant 0 : i32
    %c0_i32_336 = arith.constant 0 : i32
    %386 = tpu.memref_slice %arg13[%c0_i32_334, %c0_i32_335, %c0_i32_336] : memref<1x32x256xf32, #tpu.memory_space<vmem>> -> memref<1x32x256xf32, #tpu.memory_space<vmem>>
    %387 = tpu.memref_squeeze %386 : memref<1x32x256xf32, #tpu.memory_space<vmem>> -> memref<32x256xf32, #tpu.memory_space<vmem>>
    %c0_337 = arith.constant 0 : index
    %c144_338 = arith.constant 144 : index
    %388 = vector.load %387[%c0_337, %c144_338] : memref<32x256xf32, #tpu.memory_space<vmem>>, vector<32x16xf32>
    tpu.vector_store %387[%c0_337, %c144_338], %385 {strides = array<i32>} : memref<32x256xf32, #tpu.memory_space<vmem>>, vector<32x16xf32>,
    %c0_339 = arith.constant 0 : index
    %c160 = arith.constant 160 : index
    %389 = vector.load %arg17[%c0_339, %c160] : memref<32x256xf32, #tpu.memory_space<vmem>>, vector<32x16xf32>
    %c0_340 = arith.constant 0 : index
    %c0_341 = arith.constant 0 : index
    %390 = vector.load %arg14[%c0_340, %c0_341] : memref<32x4xf32, #tpu.memory_space<vmem>>, vector<32x2xf32>
    %c0_342 = arith.constant 0 : index
    %c2_343 = arith.constant 2 : index
    %391 = vector.load %arg14[%c0_342, %c2_343] : memref<32x4xf32, #tpu.memory_space<vmem>>, vector<32x2xf32>
    %cst_344 = arith.constant 1.875000e-01 : f32
    %392 = vector.broadcast %cst_344 : f32 to vector<32x2xf32>
    %393 = arith.mulf %390, %392 : vector<32x2xf32>
    %cst_345 = arith.constant 8.125000e-01 : f32
    %394 = vector.broadcast %cst_345 : f32 to vector<32x2xf32>
    %395 = arith.mulf %391, %394 : vector<32x2xf32>
    %396 = arith.addf %393, %395 : vector<32x2xf32>
    %397 = arith.truncf %396 : vector<32x2xf32> to vector<32x2xbf16>
    %c0_346 = arith.constant 0 : index
    %c0_347 = arith.constant 0 : index
    %398 = vector.load %arg9[%c0_346, %c0_347] : memref<2x16xbf16, #tpu.memory_space<vmem>>, vector<2x16xbf16>
    %cst_348 = arith.constant dense<0.000000e+00> : vector<32x16xf32>
    %399 = tpu.matmul %397, %398, %cst_348 {dimension_numbers = #tpu.dot_dimension_numbers<[1], [0], [0], [1], [0, 0, 1, 1], [], []>} : vector<32x2xbf16>, vector<2x16xbf16>, vector<32x16xf32> -> vector<32x16xf32>
    %400 = arith.addf %389, %399 : vector<32x16xf32>
    %c0_349 = arith.constant 0 : index
    %c8_350 = arith.constant 8 : index
    %401 = vector.load %arg15[%c0_349, %c8_350] : memref<32x16xf32, #tpu.memory_space<vmem>>, vector<32x4xf32>
    %c0_351 = arith.constant 0 : index
    %c12 = arith.constant 12 : index
    %402 = vector.load %arg15[%c0_351, %c12] : memref<32x16xf32, #tpu.memory_space<vmem>>, vector<32x4xf32>
    %cst_352 = arith.constant 8.750000e-01 : f32
    %403 = vector.broadcast %cst_352 : f32 to vector<32x4xf32>
    %404 = arith.mulf %401, %403 : vector<32x4xf32>
    %cst_353 = arith.constant 1.250000e-01 : f32
    %405 = vector.broadcast %cst_353 : f32 to vector<32x4xf32>
    %406 = arith.mulf %402, %405 : vector<32x4xf32>
    %407 = arith.addf %404, %406 : vector<32x4xf32>
    %408 = arith.truncf %407 : vector<32x4xf32> to vector<32x4xbf16>
    %c0_354 = arith.constant 0 : index
    %c0_355 = arith.constant 0 : index
    %409 = vector.load %arg10[%c0_354, %c0_355] : memref<4x16xbf16, #tpu.memory_space<vmem>>, vector<4x16xbf16>
    %cst_356 = arith.constant dense<0.000000e+00> : vector<32x16xf32>
    %410 = tpu.matmul %408, %409, %cst_356 {dimension_numbers = #tpu.dot_dimension_numbers<[1], [0], [0], [1], [0, 0, 1, 1], [], []>} : vector<32x4xbf16>, vector<4x16xbf16>, vector<32x16xf32> -> vector<32x16xf32>
    %411 = arith.addf %400, %410 : vector<32x16xf32>
    %c0_357 = arith.constant 0 : index
    %c32_358 = arith.constant 32 : index
    %412 = vector.load %arg16[%c0_357, %c32_358] : memref<32x64xf32, #tpu.memory_space<vmem>>, vector<32x8xf32>
    %c0_359 = arith.constant 0 : index
    %c40_360 = arith.constant 40 : index
    %413 = vector.load %arg16[%c0_359, %c40_360] : memref<32x64xf32, #tpu.memory_space<vmem>>, vector<32x8xf32>
    %cst_361 = arith.constant 2.500000e-01 : f32
    %414 = vector.broadcast %cst_361 : f32 to vector<32x8xf32>
    %415 = arith.mulf %412, %414 : vector<32x8xf32>
    %cst_362 = arith.constant 7.500000e-01 : f32
    %416 = vector.broadcast %cst_362 : f32 to vector<32x8xf32>
    %417 = arith.mulf %413, %416 : vector<32x8xf32>
    %418 = arith.addf %415, %417 : vector<32x8xf32>
    %419 = arith.truncf %418 : vector<32x8xf32> to vector<32x8xbf16>
    %c0_363 = arith.constant 0 : index
    %c0_364 = arith.constant 0 : index
    %420 = vector.load %arg11[%c0_363, %c0_364] : memref<8x16xbf16, #tpu.memory_space<vmem>>, vector<8x16xbf16>
    %cst_365 = arith.constant dense<0.000000e+00> : vector<32x16xf32>
    %421 = tpu.matmul %419, %420, %cst_365 {dimension_numbers = #tpu.dot_dimension_numbers<[1], [0], [0], [1], [0, 0, 1, 1], [], []>} : vector<32x8xbf16>, vector<8x16xbf16>, vector<32x16xf32> -> vector<32x16xf32>
    %422 = arith.addf %411, %421 : vector<32x16xf32>
    %423 = vector.broadcast %0 : vector<32x1xf32> to vector<32x16xf32>
    %424 = arith.addf %422, %423 : vector<32x16xf32>
    %cst_366 = arith.constant 0.000000e+00 : f32
    %425 = vector.broadcast %cst_366 : f32 to vector<32x16xf32>
    %426 = arith.maximumf %424, %425 : vector<32x16xf32>
    %c0_i32_367 = arith.constant 0 : i32
    %c0_i32_368 = arith.constant 0 : i32
    %c0_i32_369 = arith.constant 0 : i32
    %427 = tpu.memref_slice %arg13[%c0_i32_367, %c0_i32_368, %c0_i32_369] : memref<1x32x256xf32, #tpu.memory_space<vmem>> -> memref<1x32x256xf32, #tpu.memory_space<vmem>>
    %428 = tpu.memref_squeeze %427 : memref<1x32x256xf32, #tpu.memory_space<vmem>> -> memref<32x256xf32, #tpu.memory_space<vmem>>
    %c0_370 = arith.constant 0 : index
    %c160_371 = arith.constant 160 : index
    %429 = vector.load %428[%c0_370, %c160_371] : memref<32x256xf32, #tpu.memory_space<vmem>>, vector<32x16xf32>
    tpu.vector_store %428[%c0_370, %c160_371], %426 {strides = array<i32>} : memref<32x256xf32, #tpu.memory_space<vmem>>, vector<32x16xf32>,
    %c0_372 = arith.constant 0 : index
    %c176 = arith.constant 176 : index
    %430 = vector.load %arg17[%c0_372, %c176] : memref<32x256xf32, #tpu.memory_space<vmem>>, vector<32x16xf32>
    %c0_373 = arith.constant 0 : index
    %c0_374 = arith.constant 0 : index
    %431 = vector.load %arg14[%c0_373, %c0_374] : memref<32x4xf32, #tpu.memory_space<vmem>>, vector<32x2xf32>
    %c0_375 = arith.constant 0 : index
    %c2_376 = arith.constant 2 : index
    %432 = vector.load %arg14[%c0_375, %c2_376] : memref<32x4xf32, #tpu.memory_space<vmem>>, vector<32x2xf32>
    %cst_377 = arith.constant 6.250000e-02 : f32
    %433 = vector.broadcast %cst_377 : f32 to vector<32x2xf32>
    %434 = arith.mulf %431, %433 : vector<32x2xf32>
    %cst_378 = arith.constant 9.375000e-01 : f32
    %435 = vector.broadcast %cst_378 : f32 to vector<32x2xf32>
    %436 = arith.mulf %432, %435 : vector<32x2xf32>
    %437 = arith.addf %434, %436 : vector<32x2xf32>
    %438 = arith.truncf %437 : vector<32x2xf32> to vector<32x2xbf16>
    %c0_379 = arith.constant 0 : index
    %c0_380 = arith.constant 0 : index
    %439 = vector.load %arg9[%c0_379, %c0_380] : memref<2x16xbf16, #tpu.memory_space<vmem>>, vector<2x16xbf16>
    %cst_381 = arith.constant dense<0.000000e+00> : vector<32x16xf32>
    %440 = tpu.matmul %438, %439, %cst_381 {dimension_numbers = #tpu.dot_dimension_numbers<[1], [0], [0], [1], [0, 0, 1, 1], [], []>} : vector<32x2xbf16>, vector<2x16xbf16>, vector<32x16xf32> -> vector<32x16xf32>
    %441 = arith.addf %430, %440 : vector<32x16xf32>
    %c0_382 = arith.constant 0 : index
    %c8_383 = arith.constant 8 : index
    %442 = vector.load %arg15[%c0_382, %c8_383] : memref<32x16xf32, #tpu.memory_space<vmem>>, vector<32x4xf32>
    %c0_384 = arith.constant 0 : index
    %c12_385 = arith.constant 12 : index
    %443 = vector.load %arg15[%c0_384, %c12_385] : memref<32x16xf32, #tpu.memory_space<vmem>>, vector<32x4xf32>
    %cst_386 = arith.constant 6.250000e-01 : f32
    %444 = vector.broadcast %cst_386 : f32 to vector<32x4xf32>
    %445 = arith.mulf %442, %444 : vector<32x4xf32>
    %cst_387 = arith.constant 3.750000e-01 : f32
    %446 = vector.broadcast %cst_387 : f32 to vector<32x4xf32>
    %447 = arith.mulf %443, %446 : vector<32x4xf32>
    %448 = arith.addf %445, %447 : vector<32x4xf32>
    %449 = arith.truncf %448 : vector<32x4xf32> to vector<32x4xbf16>
    %c0_388 = arith.constant 0 : index
    %c0_389 = arith.constant 0 : index
    %450 = vector.load %arg10[%c0_388, %c0_389] : memref<4x16xbf16, #tpu.memory_space<vmem>>, vector<4x16xbf16>
    %cst_390 = arith.constant dense<0.000000e+00> : vector<32x16xf32>
    %451 = tpu.matmul %449, %450, %cst_390 {dimension_numbers = #tpu.dot_dimension_numbers<[1], [0], [0], [1], [0, 0, 1, 1], [], []>} : vector<32x4xbf16>, vector<4x16xbf16>, vector<32x16xf32> -> vector<32x16xf32>
    %452 = arith.addf %441, %451 : vector<32x16xf32>
    %c0_391 = arith.constant 0 : index
    %c40_392 = arith.constant 40 : index
    %453 = vector.load %arg16[%c0_391, %c40_392] : memref<32x64xf32, #tpu.memory_space<vmem>>, vector<32x8xf32>
    %c0_393 = arith.constant 0 : index
    %c48_394 = arith.constant 48 : index
    %454 = vector.load %arg16[%c0_393, %c48_394] : memref<32x64xf32, #tpu.memory_space<vmem>>, vector<32x8xf32>
    %cst_395 = arith.constant 7.500000e-01 : f32
    %455 = vector.broadcast %cst_395 : f32 to vector<32x8xf32>
    %456 = arith.mulf %453, %455 : vector<32x8xf32>
    %cst_396 = arith.constant 2.500000e-01 : f32
    %457 = vector.broadcast %cst_396 : f32 to vector<32x8xf32>
    %458 = arith.mulf %454, %457 : vector<32x8xf32>
    %459 = arith.addf %456, %458 : vector<32x8xf32>
    %460 = arith.truncf %459 : vector<32x8xf32> to vector<32x8xbf16>
    %c0_397 = arith.constant 0 : index
    %c0_398 = arith.constant 0 : index
    %461 = vector.load %arg11[%c0_397, %c0_398] : memref<8x16xbf16, #tpu.memory_space<vmem>>, vector<8x16xbf16>
    %cst_399 = arith.constant dense<0.000000e+00> : vector<32x16xf32>
    %462 = tpu.matmul %460, %461, %cst_399 {dimension_numbers = #tpu.dot_dimension_numbers<[1], [0], [0], [1], [0, 0, 1, 1], [], []>} : vector<32x8xbf16>, vector<8x16xbf16>, vector<32x16xf32> -> vector<32x16xf32>
    %463 = arith.addf %452, %462 : vector<32x16xf32>
    %464 = vector.broadcast %0 : vector<32x1xf32> to vector<32x16xf32>
    %465 = arith.addf %463, %464 : vector<32x16xf32>
    %cst_400 = arith.constant 0.000000e+00 : f32
    %466 = vector.broadcast %cst_400 : f32 to vector<32x16xf32>
    %467 = arith.maximumf %465, %466 : vector<32x16xf32>
    %c0_i32_401 = arith.constant 0 : i32
    %c0_i32_402 = arith.constant 0 : i32
    %c0_i32_403 = arith.constant 0 : i32
    %468 = tpu.memref_slice %arg13[%c0_i32_401, %c0_i32_402, %c0_i32_403] : memref<1x32x256xf32, #tpu.memory_space<vmem>> -> memref<1x32x256xf32, #tpu.memory_space<vmem>>
    %469 = tpu.memref_squeeze %468 : memref<1x32x256xf32, #tpu.memory_space<vmem>> -> memref<32x256xf32, #tpu.memory_space<vmem>>
    %c0_404 = arith.constant 0 : index
    %c176_405 = arith.constant 176 : index
    %470 = vector.load %469[%c0_404, %c176_405] : memref<32x256xf32, #tpu.memory_space<vmem>>, vector<32x16xf32>
    tpu.vector_store %469[%c0_404, %c176_405], %467 {strides = array<i32>} : memref<32x256xf32, #tpu.memory_space<vmem>>, vector<32x16xf32>,
    %c0_406 = arith.constant 0 : index
    %c192 = arith.constant 192 : index
    %471 = vector.load %arg17[%c0_406, %c192] : memref<32x256xf32, #tpu.memory_space<vmem>>, vector<32x16xf32>
    %c0_407 = arith.constant 0 : index
    %c2_408 = arith.constant 2 : index
    %472 = vector.load %arg14[%c0_407, %c2_408] : memref<32x4xf32, #tpu.memory_space<vmem>>, vector<32x2xf32>
    %473 = arith.truncf %472 : vector<32x2xf32> to vector<32x2xbf16>
    %c0_409 = arith.constant 0 : index
    %c0_410 = arith.constant 0 : index
    %474 = vector.load %arg9[%c0_409, %c0_410] : memref<2x16xbf16, #tpu.memory_space<vmem>>, vector<2x16xbf16>
    %cst_411 = arith.constant dense<0.000000e+00> : vector<32x16xf32>
    %475 = tpu.matmul %473, %474, %cst_411 {dimension_numbers = #tpu.dot_dimension_numbers<[1], [0], [0], [1], [0, 0, 1, 1], [], []>} : vector<32x2xbf16>, vector<2x16xbf16>, vector<32x16xf32> -> vector<32x16xf32>
    %476 = arith.addf %471, %475 : vector<32x16xf32>
    %c0_412 = arith.constant 0 : index
    %c8_413 = arith.constant 8 : index
    %477 = vector.load %arg15[%c0_412, %c8_413] : memref<32x16xf32, #tpu.memory_space<vmem>>, vector<32x4xf32>
    %c0_414 = arith.constant 0 : index
    %c12_415 = arith.constant 12 : index
    %478 = vector.load %arg15[%c0_414, %c12_415] : memref<32x16xf32, #tpu.memory_space<vmem>>, vector<32x4xf32>
    %cst_416 = arith.constant 3.750000e-01 : f32
    %479 = vector.broadcast %cst_416 : f32 to vector<32x4xf32>
    %480 = arith.mulf %477, %479 : vector<32x4xf32>
    %cst_417 = arith.constant 6.250000e-01 : f32
    %481 = vector.broadcast %cst_417 : f32 to vector<32x4xf32>
    %482 = arith.mulf %478, %481 : vector<32x4xf32>
    %483 = arith.addf %480, %482 : vector<32x4xf32>
    %484 = arith.truncf %483 : vector<32x4xf32> to vector<32x4xbf16>
    %c0_418 = arith.constant 0 : index
    %c0_419 = arith.constant 0 : index
    %485 = vector.load %arg10[%c0_418, %c0_419] : memref<4x16xbf16, #tpu.memory_space<vmem>>, vector<4x16xbf16>
    %cst_420 = arith.constant dense<0.000000e+00> : vector<32x16xf32>
    %486 = tpu.matmul %484, %485, %cst_420 {dimension_numbers = #tpu.dot_dimension_numbers<[1], [0], [0], [1], [0, 0, 1, 1], [], []>} : vector<32x4xbf16>, vector<4x16xbf16>, vector<32x16xf32> -> vector<32x16xf32>
    %487 = arith.addf %476, %486 : vector<32x16xf32>
    %c0_421 = arith.constant 0 : index
    %c40_422 = arith.constant 40 : index
    %488 = vector.load %arg16[%c0_421, %c40_422] : memref<32x64xf32, #tpu.memory_space<vmem>>, vector<32x8xf32>
    %c0_423 = arith.constant 0 : index
    %c48_424 = arith.constant 48 : index
    %489 = vector.load %arg16[%c0_423, %c48_424] : memref<32x64xf32, #tpu.memory_space<vmem>>, vector<32x8xf32>
    %cst_425 = arith.constant 2.500000e-01 : f32
    %490 = vector.broadcast %cst_425 : f32 to vector<32x8xf32>
    %491 = arith.mulf %488, %490 : vector<32x8xf32>
    %cst_426 = arith.constant 7.500000e-01 : f32
    %492 = vector.broadcast %cst_426 : f32 to vector<32x8xf32>
    %493 = arith.mulf %489, %492 : vector<32x8xf32>
    %494 = arith.addf %491, %493 : vector<32x8xf32>
    %495 = arith.truncf %494 : vector<32x8xf32> to vector<32x8xbf16>
    %c0_427 = arith.constant 0 : index
    %c0_428 = arith.constant 0 : index
    %496 = vector.load %arg11[%c0_427, %c0_428] : memref<8x16xbf16, #tpu.memory_space<vmem>>, vector<8x16xbf16>
    %cst_429 = arith.constant dense<0.000000e+00> : vector<32x16xf32>
    %497 = tpu.matmul %495, %496, %cst_429 {dimension_numbers = #tpu.dot_dimension_numbers<[1], [0], [0], [1], [0, 0, 1, 1], [], []>} : vector<32x8xbf16>, vector<8x16xbf16>, vector<32x16xf32> -> vector<32x16xf32>
    %498 = arith.addf %487, %497 : vector<32x16xf32>
    %499 = vector.broadcast %0 : vector<32x1xf32> to vector<32x16xf32>
    %500 = arith.addf %498, %499 : vector<32x16xf32>
    %cst_430 = arith.constant 0.000000e+00 : f32
    %501 = vector.broadcast %cst_430 : f32 to vector<32x16xf32>
    %502 = arith.maximumf %500, %501 : vector<32x16xf32>
    %c0_i32_431 = arith.constant 0 : i32
    %c0_i32_432 = arith.constant 0 : i32
    %c0_i32_433 = arith.constant 0 : i32
    %503 = tpu.memref_slice %arg13[%c0_i32_431, %c0_i32_432, %c0_i32_433] : memref<1x32x256xf32, #tpu.memory_space<vmem>> -> memref<1x32x256xf32, #tpu.memory_space<vmem>>
    %504 = tpu.memref_squeeze %503 : memref<1x32x256xf32, #tpu.memory_space<vmem>> -> memref<32x256xf32, #tpu.memory_space<vmem>>
    %c0_434 = arith.constant 0 : index
    %c192_435 = arith.constant 192 : index
    %505 = vector.load %504[%c0_434, %c192_435] : memref<32x256xf32, #tpu.memory_space<vmem>>, vector<32x16xf32>
    tpu.vector_store %504[%c0_434, %c192_435], %502 {strides = array<i32>} : memref<32x256xf32, #tpu.memory_space<vmem>>, vector<32x16xf32>,
    %c0_436 = arith.constant 0 : index
    %c208 = arith.constant 208 : index
    %506 = vector.load %arg17[%c0_436, %c208] : memref<32x256xf32, #tpu.memory_space<vmem>>, vector<32x16xf32>
    %c0_437 = arith.constant 0 : index
    %c2_438 = arith.constant 2 : index
    %507 = vector.load %arg14[%c0_437, %c2_438] : memref<32x4xf32, #tpu.memory_space<vmem>>, vector<32x2xf32>
    %508 = arith.truncf %507 : vector<32x2xf32> to vector<32x2xbf16>
    %c0_439 = arith.constant 0 : index
    %c0_440 = arith.constant 0 : index
    %509 = vector.load %arg9[%c0_439, %c0_440] : memref<2x16xbf16, #tpu.memory_space<vmem>>, vector<2x16xbf16>
    %cst_441 = arith.constant dense<0.000000e+00> : vector<32x16xf32>
    %510 = tpu.matmul %508, %509, %cst_441 {dimension_numbers = #tpu.dot_dimension_numbers<[1], [0], [0], [1], [0, 0, 1, 1], [], []>} : vector<32x2xbf16>, vector<2x16xbf16>, vector<32x16xf32> -> vector<32x16xf32>
    %511 = arith.addf %506, %510 : vector<32x16xf32>
    %c0_442 = arith.constant 0 : index
    %c8_443 = arith.constant 8 : index
    %512 = vector.load %arg15[%c0_442, %c8_443] : memref<32x16xf32, #tpu.memory_space<vmem>>, vector<32x4xf32>
    %c0_444 = arith.constant 0 : index
    %c12_445 = arith.constant 12 : index
    %513 = vector.load %arg15[%c0_444, %c12_445] : memref<32x16xf32, #tpu.memory_space<vmem>>, vector<32x4xf32>
    %cst_446 = arith.constant 1.250000e-01 : f32
    %514 = vector.broadcast %cst_446 : f32 to vector<32x4xf32>
    %515 = arith.mulf %512, %514 : vector<32x4xf32>
    %cst_447 = arith.constant 8.750000e-01 : f32
    %516 = vector.broadcast %cst_447 : f32 to vector<32x4xf32>
    %517 = arith.mulf %513, %516 : vector<32x4xf32>
    %518 = arith.addf %515, %517 : vector<32x4xf32>
    %519 = arith.truncf %518 : vector<32x4xf32> to vector<32x4xbf16>
    %c0_448 = arith.constant 0 : index
    %c0_449 = arith.constant 0 : index
    %520 = vector.load %arg10[%c0_448, %c0_449] : memref<4x16xbf16, #tpu.memory_space<vmem>>, vector<4x16xbf16>
    %cst_450 = arith.constant dense<0.000000e+00> : vector<32x16xf32>
    %521 = tpu.matmul %519, %520, %cst_450 {dimension_numbers = #tpu.dot_dimension_numbers<[1], [0], [0], [1], [0, 0, 1, 1], [], []>} : vector<32x4xbf16>, vector<4x16xbf16>, vector<32x16xf32> -> vector<32x16xf32>
    %522 = arith.addf %511, %521 : vector<32x16xf32>
    %c0_451 = arith.constant 0 : index
    %c48_452 = arith.constant 48 : index
    %523 = vector.load %arg16[%c0_451, %c48_452] : memref<32x64xf32, #tpu.memory_space<vmem>>, vector<32x8xf32>
    %c0_453 = arith.constant 0 : index
    %c56 = arith.constant 56 : index
    %524 = vector.load %arg16[%c0_453, %c56] : memref<32x64xf32, #tpu.memory_space<vmem>>, vector<32x8xf32>
    %cst_454 = arith.constant 7.500000e-01 : f32
    %525 = vector.broadcast %cst_454 : f32 to vector<32x8xf32>
    %526 = arith.mulf %523, %525 : vector<32x8xf32>
    %cst_455 = arith.constant 2.500000e-01 : f32
    %527 = vector.broadcast %cst_455 : f32 to vector<32x8xf32>
    %528 = arith.mulf %524, %527 : vector<32x8xf32>
    %529 = arith.addf %526, %528 : vector<32x8xf32>
    %530 = arith.truncf %529 : vector<32x8xf32> to vector<32x8xbf16>
    %c0_456 = arith.constant 0 : index
    %c0_457 = arith.constant 0 : index
    %531 = vector.load %arg11[%c0_456, %c0_457] : memref<8x16xbf16, #tpu.memory_space<vmem>>, vector<8x16xbf16>
    %cst_458 = arith.constant dense<0.000000e+00> : vector<32x16xf32>
    %532 = tpu.matmul %530, %531, %cst_458 {dimension_numbers = #tpu.dot_dimension_numbers<[1], [0], [0], [1], [0, 0, 1, 1], [], []>} : vector<32x8xbf16>, vector<8x16xbf16>, vector<32x16xf32> -> vector<32x16xf32>
    %533 = arith.addf %522, %532 : vector<32x16xf32>
    %534 = vector.broadcast %0 : vector<32x1xf32> to vector<32x16xf32>
    %535 = arith.addf %533, %534 : vector<32x16xf32>
    %cst_459 = arith.constant 0.000000e+00 : f32
    %536 = vector.broadcast %cst_459 : f32 to vector<32x16xf32>
    %537 = arith.maximumf %535, %536 : vector<32x16xf32>
    %c0_i32_460 = arith.constant 0 : i32
    %c0_i32_461 = arith.constant 0 : i32
    %c0_i32_462 = arith.constant 0 : i32
    %538 = tpu.memref_slice %arg13[%c0_i32_460, %c0_i32_461, %c0_i32_462] : memref<1x32x256xf32, #tpu.memory_space<vmem>> -> memref<1x32x256xf32, #tpu.memory_space<vmem>>
    %539 = tpu.memref_squeeze %538 : memref<1x32x256xf32, #tpu.memory_space<vmem>> -> memref<32x256xf32, #tpu.memory_space<vmem>>
    %c0_463 = arith.constant 0 : index
    %c208_464 = arith.constant 208 : index
    %540 = vector.load %539[%c0_463, %c208_464] : memref<32x256xf32, #tpu.memory_space<vmem>>, vector<32x16xf32>
    tpu.vector_store %539[%c0_463, %c208_464], %537 {strides = array<i32>} : memref<32x256xf32, #tpu.memory_space<vmem>>, vector<32x16xf32>,
    %c0_465 = arith.constant 0 : index
    %c224 = arith.constant 224 : index
    %541 = vector.load %arg17[%c0_465, %c224] : memref<32x256xf32, #tpu.memory_space<vmem>>, vector<32x16xf32>
    %c0_466 = arith.constant 0 : index
    %c2_467 = arith.constant 2 : index
    %542 = vector.load %arg14[%c0_466, %c2_467] : memref<32x4xf32, #tpu.memory_space<vmem>>, vector<32x2xf32>
    %543 = arith.truncf %542 : vector<32x2xf32> to vector<32x2xbf16>
    %c0_468 = arith.constant 0 : index
    %c0_469 = arith.constant 0 : index
    %544 = vector.load %arg9[%c0_468, %c0_469] : memref<2x16xbf16, #tpu.memory_space<vmem>>, vector<2x16xbf16>
    %cst_470 = arith.constant dense<0.000000e+00> : vector<32x16xf32>
    %545 = tpu.matmul %543, %544, %cst_470 {dimension_numbers = #tpu.dot_dimension_numbers<[1], [0], [0], [1], [0, 0, 1, 1], [], []>} : vector<32x2xbf16>, vector<2x16xbf16>, vector<32x16xf32> -> vector<32x16xf32>
    %546 = arith.addf %541, %545 : vector<32x16xf32>
    %c0_471 = arith.constant 0 : index
    %c12_472 = arith.constant 12 : index
    %547 = vector.load %arg15[%c0_471, %c12_472] : memref<32x16xf32, #tpu.memory_space<vmem>>, vector<32x4xf32>
    %548 = arith.truncf %547 : vector<32x4xf32> to vector<32x4xbf16>
    %c0_473 = arith.constant 0 : index
    %c0_474 = arith.constant 0 : index
    %549 = vector.load %arg10[%c0_473, %c0_474] : memref<4x16xbf16, #tpu.memory_space<vmem>>, vector<4x16xbf16>
    %cst_475 = arith.constant dense<0.000000e+00> : vector<32x16xf32>
    %550 = tpu.matmul %548, %549, %cst_475 {dimension_numbers = #tpu.dot_dimension_numbers<[1], [0], [0], [1], [0, 0, 1, 1], [], []>} : vector<32x4xbf16>, vector<4x16xbf16>, vector<32x16xf32> -> vector<32x16xf32>
    %551 = arith.addf %546, %550 : vector<32x16xf32>
    %c0_476 = arith.constant 0 : index
    %c48_477 = arith.constant 48 : index
    %552 = vector.load %arg16[%c0_476, %c48_477] : memref<32x64xf32, #tpu.memory_space<vmem>>, vector<32x8xf32>
    %c0_478 = arith.constant 0 : index
    %c56_479 = arith.constant 56 : index
    %553 = vector.load %arg16[%c0_478, %c56_479] : memref<32x64xf32, #tpu.memory_space<vmem>>, vector<32x8xf32>
    %cst_480 = arith.constant 2.500000e-01 : f32
    %554 = vector.broadcast %cst_480 : f32 to vector<32x8xf32>
    %555 = arith.mulf %552, %554 : vector<32x8xf32>
    %cst_481 = arith.constant 7.500000e-01 : f32
    %556 = vector.broadcast %cst_481 : f32 to vector<32x8xf32>
    %557 = arith.mulf %553, %556 : vector<32x8xf32>
    %558 = arith.addf %555, %557 : vector<32x8xf32>
    %559 = arith.truncf %558 : vector<32x8xf32> to vector<32x8xbf16>
    %c0_482 = arith.constant 0 : index
    %c0_483 = arith.constant 0 : index
    %560 = vector.load %arg11[%c0_482, %c0_483] : memref<8x16xbf16, #tpu.memory_space<vmem>>, vector<8x16xbf16>
    %cst_484 = arith.constant dense<0.000000e+00> : vector<32x16xf32>
    %561 = tpu.matmul %559, %560, %cst_484 {dimension_numbers = #tpu.dot_dimension_numbers<[1], [0], [0], [1], [0, 0, 1, 1], [], []>} : vector<32x8xbf16>, vector<8x16xbf16>, vector<32x16xf32> -> vector<32x16xf32>
    %562 = arith.addf %551, %561 : vector<32x16xf32>
    %563 = vector.broadcast %0 : vector<32x1xf32> to vector<32x16xf32>
    %564 = arith.addf %562, %563 : vector<32x16xf32>
    %cst_485 = arith.constant 0.000000e+00 : f32
    %565 = vector.broadcast %cst_485 : f32 to vector<32x16xf32>
    %566 = arith.maximumf %564, %565 : vector<32x16xf32>
    %c0_i32_486 = arith.constant 0 : i32
    %c0_i32_487 = arith.constant 0 : i32
    %c0_i32_488 = arith.constant 0 : i32
    %567 = tpu.memref_slice %arg13[%c0_i32_486, %c0_i32_487, %c0_i32_488] : memref<1x32x256xf32, #tpu.memory_space<vmem>> -> memref<1x32x256xf32, #tpu.memory_space<vmem>>
    %568 = tpu.memref_squeeze %567 : memref<1x32x256xf32, #tpu.memory_space<vmem>> -> memref<32x256xf32, #tpu.memory_space<vmem>>
    %c0_489 = arith.constant 0 : index
    %c224_490 = arith.constant 224 : index
    %569 = vector.load %568[%c0_489, %c224_490] : memref<32x256xf32, #tpu.memory_space<vmem>>, vector<32x16xf32>
    tpu.vector_store %568[%c0_489, %c224_490], %566 {strides = array<i32>} : memref<32x256xf32, #tpu.memory_space<vmem>>, vector<32x16xf32>,
    %c0_491 = arith.constant 0 : index
    %c240 = arith.constant 240 : index
    %570 = vector.load %arg17[%c0_491, %c240] : memref<32x256xf32, #tpu.memory_space<vmem>>, vector<32x16xf32>
    %c0_492 = arith.constant 0 : index
    %c2_493 = arith.constant 2 : index
    %571 = vector.load %arg14[%c0_492, %c2_493] : memref<32x4xf32, #tpu.memory_space<vmem>>, vector<32x2xf32>
    %572 = arith.truncf %571 : vector<32x2xf32> to vector<32x2xbf16>
    %c0_494 = arith.constant 0 : index
    %c0_495 = arith.constant 0 : index
    %573 = vector.load %arg9[%c0_494, %c0_495] : memref<2x16xbf16, #tpu.memory_space<vmem>>, vector<2x16xbf16>
    %cst_496 = arith.constant dense<0.000000e+00> : vector<32x16xf32>
    %574 = tpu.matmul %572, %573, %cst_496 {dimension_numbers = #tpu.dot_dimension_numbers<[1], [0], [0], [1], [0, 0, 1, 1], [], []>} : vector<32x2xbf16>, vector<2x16xbf16>, vector<32x16xf32> -> vector<32x16xf32>
    %575 = arith.addf %570, %574 : vector<32x16xf32>
    %c0_497 = arith.constant 0 : index
    %c12_498 = arith.constant 12 : index
    %576 = vector.load %arg15[%c0_497, %c12_498] : memref<32x16xf32, #tpu.memory_space<vmem>>, vector<32x4xf32>
    %577 = arith.truncf %576 : vector<32x4xf32> to vector<32x4xbf16>
    %c0_499 = arith.constant 0 : index
    %c0_500 = arith.constant 0 : index
    %578 = vector.load %arg10[%c0_499, %c0_500] : memref<4x16xbf16, #tpu.memory_space<vmem>>, vector<4x16xbf16>
    %cst_501 = arith.constant dense<0.000000e+00> : vector<32x16xf32>
    %579 = tpu.matmul %577, %578, %cst_501 {dimension_numbers = #tpu.dot_dimension_numbers<[1], [0], [0], [1], [0, 0, 1, 1], [], []>} : vector<32x4xbf16>, vector<4x16xbf16>, vector<32x16xf32> -> vector<32x16xf32>
    %580 = arith.addf %575, %579 : vector<32x16xf32>
    %c0_502 = arith.constant 0 : index
    %c56_503 = arith.constant 56 : index
    %581 = vector.load %arg16[%c0_502, %c56_503] : memref<32x64xf32, #tpu.memory_space<vmem>>, vector<32x8xf32>
    %582 = arith.truncf %581 : vector<32x8xf32> to vector<32x8xbf16>
    %c0_504 = arith.constant 0 : index
    %c0_505 = arith.constant 0 : index
    %583 = vector.load %arg11[%c0_504, %c0_505] : memref<8x16xbf16, #tpu.memory_space<vmem>>, vector<8x16xbf16>
    %cst_506 = arith.constant dense<0.000000e+00> : vector<32x16xf32>
    %584 = tpu.matmul %582, %583, %cst_506 {dimension_numbers = #tpu.dot_dimension_numbers<[1], [0], [0], [1], [0, 0, 1, 1], [], []>} : vector<32x8xbf16>, vector<8x16xbf16>, vector<32x16xf32> -> vector<32x16xf32>
    %585 = arith.addf %580, %584 : vector<32x16xf32>
    %586 = vector.broadcast %0 : vector<32x1xf32> to vector<32x16xf32>
    %587 = arith.addf %585, %586 : vector<32x16xf32>
    %cst_507 = arith.constant 0.000000e+00 : f32
    %588 = vector.broadcast %cst_507 : f32 to vector<32x16xf32>
    %589 = arith.maximumf %587, %588 : vector<32x16xf32>
    %c0_i32_508 = arith.constant 0 : i32
    %c0_i32_509 = arith.constant 0 : i32
    %c0_i32_510 = arith.constant 0 : i32
    %590 = tpu.memref_slice %arg13[%c0_i32_508, %c0_i32_509, %c0_i32_510] : memref<1x32x256xf32, #tpu.memory_space<vmem>> -> memref<1x32x256xf32, #tpu.memory_space<vmem>>
    %591 = tpu.memref_squeeze %590 : memref<1x32x256xf32, #tpu.memory_space<vmem>> -> memref<32x256xf32, #tpu.memory_space<vmem>>
    %c0_511 = arith.constant 0 : index
    %c240_512 = arith.constant 240 : index
    %592 = vector.load %591[%c0_511, %c240_512] : memref<32x256xf32, #tpu.memory_space<vmem>>, vector<32x16xf32>
    tpu.vector_store %591[%c0_511, %c240_512], %589 {strides = array<i32>} : memref<32x256xf32, #tpu.memory_space<vmem>>, vector<32x16xf32>,
    return
  }
  func.func @transform_0(%arg0: i32) -> (i32, i32, i32) {
    %c0_i32 = arith.constant 0 : i32
    %c0_i32_0 = arith.constant 0 : i32
    %c0_i32_1 = arith.constant 0 : i32
    return %arg0, %c0_i32, %c0_i32_0 : i32, i32, i32
  }
  func.func @transform_1(%arg0: i32) -> (i32, i32, i32) {
    %c0_i32 = arith.constant 0 : i32
    %c0_i32_0 = arith.constant 0 : i32
    %c0_i32_1 = arith.constant 0 : i32
    return %arg0, %c0_i32, %c0_i32_0 : i32, i32, i32
  }
  func.func @transform_2(%arg0: i32) -> (i32, i32, i32) {
    %c0_i32 = arith.constant 0 : i32
    %c0_i32_0 = arith.constant 0 : i32
    %c0_i32_1 = arith.constant 0 : i32
    return %arg0, %c0_i32, %c0_i32_0 : i32, i32, i32
  }
  func.func @transform_3(%arg0: i32) -> (i32, i32, i32) {
    %c0_i32 = arith.constant 0 : i32
    %c0_i32_0 = arith.constant 0 : i32
    %c0_i32_1 = arith.constant 0 : i32
    return %arg0, %c0_i32, %c0_i32_0 : i32, i32, i32
  }
  func.func @transform_4(%arg0: i32) -> (i32, i32) {
    %c0_i32 = arith.constant 0 : i32
    %c0_i32_0 = arith.constant 0 : i32
    %c0_i32_1 = arith.constant 0 : i32
    return %c0_i32, %c0_i32_0 : i32, i32
  }
  func.func @transform_5(%arg0: i32) -> (i32, i32) {
    %c0_i32 = arith.constant 0 : i32
    %c0_i32_0 = arith.constant 0 : i32
    %c0_i32_1 = arith.constant 0 : i32
    return %c0_i32, %c0_i32_0 : i32, i32
  }
  func.func @transform_6(%arg0: i32) -> (i32, i32) {
    %c0_i32 = arith.constant 0 : i32
    %c0_i32_0 = arith.constant 0 : i32
    %c0_i32_1 = arith.constant 0 : i32
    return %c0_i32, %c0_i32_0 : i32, i32
  }
  func.func @transform_7(%arg0: i32) -> (i32, i32) {
    %c0_i32 = arith.constant 0 : i32
    %c0_i32_0 = arith.constant 0 : i32
    %c0_i32_1 = arith.constant 0 : i32
    return %c0_i32, %c0_i32_0 : i32, i32
  }
  func.func @transform_8(%arg0: i32) -> (i32, i32) {
    %c0_i32 = arith.constant 0 : i32
    %c0_i32_0 = arith.constant 0 : i32
    %c0_i32_1 = arith.constant 0 : i32
    return %c0_i32, %c0_i32_0 : i32, i32
  }
  func.func @transform_9(%arg0: i32) -> (i32, i32) {
    %c0_i32 = arith.constant 0 : i32
    %c0_i32_0 = arith.constant 0 : i32
    %c0_i32_1 = arith.constant 0 : i32
    return %c0_i32, %c0_i32_0 : i32, i32
  }
  func.func @transform_10(%arg0: i32) -> (i32, i32) {
    %c0_i32 = arith.constant 0 : i32
    %c0_i32_0 = arith.constant 0 : i32
    %c0_i32_1 = arith.constant 0 : i32
    return %c0_i32, %c0_i32_0 : i32, i32
  }
  func.func @transform_11(%arg0: i32) -> (i32, i32) {
    %c0_i32 = arith.constant 0 : i32
    %c0_i32_0 = arith.constant 0 : i32
    %c0_i32_1 = arith.constant 0 : i32
    return %c0_i32, %c0_i32_0 : i32, i32
  }
  func.func @transform_12(%arg0: i32) -> (i32, i32, i32) {
    %c0_i32 = arith.constant 0 : i32
    %c0_i32_0 = arith.constant 0 : i32
    %c0_i32_1 = arith.constant 0 : i32
    return %arg0, %c0_i32, %c0_i32_0 : i32, i32, i32
  }
}

</mosaic_0001>

<bundles_post_ra>
// kernel: _forward_impl.1
= control target key start
LH: loop header
LB: loop body
LE: loop exit
PB: predicated region body
PF: predicated region fallthrough
CT: control target
= control target key end

     0   :  { %s7123_s21 = smov 0   ;;  %s9226_s0 = inlined_call_operand.vmem [shape: bf16[2,48,4], index: 0, kind: input, shape index: {}]   ;;  %s9227_s1 = inlined_call_operand.vmem [shape: bf16[2,32,16], index: 1, kind: input, shape index: {}]   ;;  %s9228_s2 = inlined_call_operand.vmem [shape: bf16[2,24,64], index: 2, kind: input, shape index: {}]   ;;  %s9229_s3 = inlined_call_operand.vmem [shape: bf16[2,16,256], index: 3, kind: input, shape index: {}]   ;;  %s9230_s4 = inlined_call_operand.vmem [shape: bf16[32,48], index: 4, kind: input, shape index: {}]   ;;  %s9231_s5 = inlined_call_operand.vmem [shape: bf16[32,32], index: 5, kind: input, shape index: {}]   ;;  %s9232_s6 = inlined_call_operand.vmem [shape: bf16[32,24], index: 6, kind: input, shape index: {}]   ;;  %s9233_s7 = inlined_call_operand.vmem [shape: bf16[32,16], index: 7, kind: input, shape index: {}]   ;;  %s9234_s8 = inlined_call_operand.vmem [shape: bf16[2,16], index: 8, kind: input, shape index: {}]   ;;  %s9235_s9 = inlined_call_operand.vmem [shape: bf16[4,16], index: 9, kind: input, shape index: {}]   ;;  %s9236_s10 = inlined_call_operand.vmem [shape: bf16[8,16], index: 10, kind: input, shape index: {}]   ;;  %s9237_s11 = inlined_call_operand.vmem [shape: f32[32,1], index: 11, kind: input, shape index: {}]   ;;  %s9238_s12 = inlined_call_operand.vmem [shape: f32[2,32,256], index: 12, kind: output, shape index: {}]  }
   0x1 LB: > { %s6329_s22 = sadd.s32 4294967295, %s7041_s21   ;;  %p6333_p0 = scmp.ge.s32.totalorder %s7041_s21, 1  ;;  %s7041_s21 = sphi %s7123_s21, %s22_s21  }
   0x2   : > { %p392_p1 = scmp.lt.s32.totalorder %s7041_s21, 3 }
   0x4   : > { %p393_p2 = pnand %p6333_p0, %p392_p1 }
   0x6   : > { %396 = sbr.rel (%p393_p2) target bundleno = 1279 (0x4ff), region = 68 }
   0xb   : > { %p449_p3 = scmp.lt.s32.totalorder %s6329_s22, 1  ;;  %v7043_v0 = vmov 0   ;;  %v7023_v1 = vld [vmem:[%s9230_s4] sm:$0xff]   ;;  %vm611_vm0 = vcmask 392192   ;;  %vm505_vm1 = vcmask 130048   ;;  %v7022_v10 = vld [vmem:[%s9233_s7 + $0x8] sm:$0xff]  }
   0xc   : > { %544 = vmatprep.mubr.bf16.mxu0 %v7043_v0  ;;  %7013 = vset.pattern.permute.xlu0 %v7043_v0  ;;  %v7019_v3 = vld [vmem:[%s9233_s7] sm:$0xff]   ;;  %vm795_vm2 = vcmask 1043456   ;;  %vm702_vm3 = vcmask 261120   ;;  %v7025_v14 = vld [vmem:[%s9230_s4 + $0x8] sm:$0xff]   ;;  %vm788_vm4 = vcmask 195584   ;;  %v477_v21 = vld [vmem:[%s9237_s11 + $0x10] sm:$0xff] }
   0xd   : > { %s9510_s22 = smov (!%p449_p3, %s6329_s22), 1  ;;  %7014 = vset.pattern.permute.xlu1 %v7043_v0  ;;  %6631 = vmatprep.mubr.msk.bf16.mxu1 %vm611_vm0, %v7023_v1  ;;  %v475_v11 = vld [vmem:[%s9237_s11] sm:$0xff]  ;;  %v7030_v18 = vld [vmem:[%s9231_s5 + $0x8] sm:$0xff]   ;;  %v478_v22 = vld [vmem:[%s9237_s11 + $0x18] sm:$0xff]  ;;  %vm871_vm5 = vcmask 1040384   ;;  %vm941_vm6 = vcmask 1041408  }
   0xe   : > { %s6465_s25 = sshll.u32 %s9510_s22, 4  ;;  %s6988_s14 = smul.u32 24, %s9510_s22  ;;  %v7029_v13 = vld [vmem:[%s9231_s5] sm:$0xff]   ;;  %1070 = vperm.xlu0 %7013, %v475_v11   ;;  %v7032_v19 = vld [vmem:[%s9232_s6 + $0x8] sm:$0xff]   ;;  %1080 = vperm.xlu1 %7014, %v477_v21   ;;  %vm667_vm7 = vcmask 31744   ;;  %vm848_vm8 = vcmask 523264  }
   0xf   : > { %s458_s28 = scalar_lea.vmem %s9227_s1, %s6465_s25  ;;  %s468_s13 = scalar_lea.vmem %s9229_s3, %s6465_s25  ;;  %v7031_v15 = vld [vmem:[%s9232_s6] sm:$0xff]   ;;  %v476_v20 = vld [vmem:[%s9237_s11 + $0x8] sm:$0xff]  ;;  %vm864_vm9 = vcmask 15360   ;;  %vm1005_vm10 = vcmask 64512   ;;  %vm1395_vm11 = vcmask 261248   ;;  %vm1723_vm12 = vcmask 392448  }
  0x10   : > { %v7015_v2 = vld [vmem:[%s468_s13 + $0x4] ss:$8 sps:$4 sm:$0xff]   ;;  %v7017_v4 = vld [vmem:[%s468_s13] ss:$8 sps:$4 sm:$0xff]   ;;  %s453_s19 = scalar_lea.vmem %s9226_s0, %s6988_s14  ;;  %s6989_s20 = smul.u32 12, %s9510_s22  ;;  %vm2057_vm13 = vcmask 523648  }
  0x11   : > { %526 = vmatprep.subr.bf16.mxu0 %v7015_v2  ;;  %v7024_v5 = vld [vmem:[%s458_s28 + $0x8] sm:$0xff]   ;;  %v7018_v6 = vld [vmem:[%s453_s19 + $0x10] sm:$0xff]   ;;  %v7027_v8 = vld [vmem:[%s458_s28] sm:$0xff]   ;;  %s7045_s27 = smov 124   ;;  %s7046_s29 = smov 120   ;;  %vm2419_vm14 = vcmask 654848  }
  0x12   : > { %527 = vmatpush1.bf16.msra.mxu0 %v7017_v4  ;;  %v7020_v7 = vld [vmem:[%s453_s19 + $0x8] sm:$0xff]   ;;  %6625 = vmatprep.subr.bf16.mxu1 %v7018_v6  ;;  %s463_s25 = scalar_lea.vmem %s9228_s2, %s6989_s20  ;;  %v7021_v9 = vld [vmem:[%s453_s19] sm:$0xff]   ;;  %s7044_s20 = smov 126   ;;  %vm2781_vm15 = vcmask 786048  }
  0x13   : > { %6635 = vmatprep.subr.bf16.mxu0 %v7024_v5  ;;  %6626 = vmatpush3.bf16.msra.mxu1 %v7018_v6  ;;  %v7026_v12 = vld [vmem:[%s463_s25 + $0x8] ss:$0 sps:$4 sm:$0xff]   ;;  %v7028_v17 = vld [vmem:[%s463_s25] sm:$0xff]   ;;  %s6467_s19 = sshll.u32 %s9510_s22, 6  ;;  %s7047_s13 = smov 112  }
  0x14   : > { %6627 = vmatprep.subr.bf16.mxu1 %v7020_v7  ;;  %v797_v16 = vsel %vm795_vm2, %v7026_v12, 0  ;;  %1075 = vperm.xlu0 %7013, %v476_v20   ;;  %v863_v23 = vld [vmem:[%s9234_s8] sm:$0x1]  ;;  %s7790_s24 = scalar_lea.vmem %s9238_s12, %s6467_s19  ;;  %s7048_s14 = smov 104  }
  0x15   : > { %6346 = vmatmul.mubr.msk.bf16.vlgmr.msra.gmra.mxu0 %vm505_vm1, %v7019_v3  ;;  %1085 = vperm.xlu1 %7014, %v478_v22   ;;  %v873_v24 = vsel %vm871_vm5, %v863_v23, 0  ;;  %v934_v25 = vld [vmem:[%s9235_s9] sm:$0x3]  ;;  %s7049_s18 = smov 96   ;;  %s7050_s23 = smov 88  }
  0x16   : > { %554 = vmatprep.mubr.bf16.mxu0 %v7043_v0  ;;  %6636 = vmatpush3.bf16.msra.mxu0 %v7024_v5  ;;  %v1004_v26 = vld [vmem:[%s9236_s10] sm:$0xf]  ;;  %v943_v27 = vsel %vm941_vm6, %v934_v25, 0  ;;  %s7053_s30 = smov 72   ;;  %s7055_s28 = smov 32  }
  0x17   : > { %6637 = vmatprep.subr.bf16.mxu0 %v7027_v8  ;;  %6628 = vmatpush3.bf16.msra.mxu1 %v7020_v7  ;;  %v7209_v28 = vld [vmem:[%s9234_s8] sm:$0x1]  ;;  %v1013_v60 = vsel %vm795_vm2, %v1004_v26, 0  ;;  %s7056_s26 = smov 48  }
  0x18   : > { %6629 = vmatprep.subr.bf16.mxu1 %v7021_v9  ;;  %v1195_v0 = vld [vmem:[%s9235_s9] sm:$0x3] }
  0x1a   : > { %6638 = vmatpush3.bf16.msra.mxu0 %v7027_v8 }
  0x1b   : > { %6630 = vmatpush3.bf16.msra.mxu1 %v7021_v9  ;;  %6940 = vmatprep.subr.msk.bf16.mxu0 %vm871_vm5, %v863_v23 }
  0x1c   : > { %6939 = vmatprep.subr.msk.bf16.mxu1 %vm795_vm2, %v7026_v12  ;;  %v1118_v12 = vsel %vm871_vm5, %v7209_v28, 0 }
  0x1d   : > { %6347 = vmatmul.mubr.msk.bf16.gmra.mxu0 %vm505_vm1, %v7022_v10 }
  0x1e   : > { %6639 = vmatprep.mubr.msk.bf16.mxu0 %vm702_vm3, %v7029_v13  ;;  %6632 = vmatmul.mubr.msk.bf16.vlgmr.msra.gmra.mxu1 %vm611_vm0, %v7025_v14  ;;  %vm3149_vm0 = vcmask 917248  }
  0x1f   : > { %6644 = vmatpush3.bf16.msra.mxu1 %v797_v16  ;;  %6647 = vmatprep.mubr.msk.bf16.mxu1 %vm788_vm4, %v7031_v15  ;;  %v1203_v15 = vsel %vm941_vm6, %v1195_v0, 0  ;;  %v1410_v16 = vld [vmem:[%s9234_s8] sm:$0x1] }
  0x20   : > { %6645 = vmatprep.subr.bf16.mxu1 %v7028_v17  ;;  %v1418_v21 = vsel %vm871_vm5, %v1410_v16, 0 }
  0x23   : > { %6646 = vmatpush3.bf16.msra.mxu1 %v7028_v17 }
  0x24   : > { %6941 = vmatprep.subr.msk.bf16.mxu1 %vm941_vm6, %v934_v25 }
  0x25   : > { %6640 = vmatmul.mubr.msk.bf16.vlgmr.msra.gmra.mxu0 %vm702_vm3, %v7030_v18 }
  0x26   : > { %6648 = vmatmul.mubr.msk.bf16.vlgmr.msra.gmra.mxu1 %vm788_vm4, %v7032_v19  ;;  %6652 = vmatpush3.bf16.msra.mxu0 %v873_v24 }
  0x27   : > { %6942 = vmatprep.subr.msk.bf16.mxu0 %vm795_vm2, %v1004_v26  ;;  %6658 = vmatpush3.bf16.msra.mxu1 %v943_v27 }
  0x28   : > { %6943 = vmatprep.subr.msk.bf16.mxu1 %vm871_vm5, %v7209_v28 }
  0xd5   : > { %v7213_v29 = vpop.f32.mrf.mxu0 }
  0xd6   : > { %9315 = vst [vmem:[#allocation6_spill] sm:$0xff] %v7213_v29 }
  0xd7   : > { %v7215_v30 = vpop.f32.mrf.mxu0 }
  0xd8   : > { %9316 = vst [vmem:[#allocation7_spill] sm:$0xff] %v7215_v30 }
  0xd9   : > { %v7217_v31 = vpop.f32.mrf.mxu0 }
  0xda   : > { %9317 = vst [vmem:[#allocation8_spill] sm:$0xff] %v7217_v31 }
  0xdb   : > { %v7219_v32 = vpop.f32.mrf.mxu0 }
  0xdc   : > { %9318 = vst [vmem:[#allocation9_spill] sm:$0xff] %v7219_v32 }
  0xdd   : > { %v7221_v33 = vpop.f32.mrf.mxu0 }
  0xde   : > { %9319 = vst [vmem:[#allocation10_spill] sm:$0xff] %v7221_v33  ;;  %v6633_v35 = vpop.f32.mrf.mxu1 }
  0xdf   : > { %v7223_v34 = vpop.f32.mrf.mxu0  ;;  %670 = vst.msk [vmem:[#allocation2 + $0x10] sm:$0xff] %vm667_vm7, %v6633_v35 }
  0xe0   : > { %9320 = vst [vmem:[#allocation11_spill] sm:$0xff] %v7223_v34  ;;  %v652_v37 = vpop.f32.mrf.mxu1 }
  0xe1   : > { %v7226_v36 = vpop.f32.mrf.mxu0  ;;  %668 = vst.msk [vmem:[#allocation2] sm:$0xff] %vm667_vm7, %v652_v37 }
  0xe2   : > { %9321 = vst [vmem:[#allocation12_spill] sm:$0xff] %v7226_v36  ;;  %v6634_v39 = vpop.f32.mrf.mxu1 }
  0xe3   : > { %v7229_v38 = vpop.f32.mrf.mxu0  ;;  %671 = vst.msk [vmem:[#allocation2 + $0x18] sm:$0xff] %vm667_vm7, %v6634_v39 }
  0xe4   : > { %9322 = vst [vmem:[#allocation13_spill] sm:$0xff] %v7229_v38  ;;  %v655_v41 = vpop.f32.mrf.mxu1 }
  0xe5   : > { %v6641_v40 = vpop.f32.mrf.mxu0  ;;  %669 = vst.msk [vmem:[#allocation2 + $0x8] sm:$0xff] %vm667_vm7, %v655_v41 }
  0xe6   : > { %760 = vst.msk [vmem:[#allocation3 + $0x10] sm:$0xff] %vm505_vm1, %v6641_v40  ;;  %v6649_v43 = vpop.f32.mrf.mxu1  ;;  %v7235_v44 = vld [vmem:[#allocation2 + $0x10] sm:$0xff] }
  0xe7   : > { %v743_v42 = vpop.f32.mrf.mxu0  ;;  %851 = vst.msk [vmem:[#allocation4 + $0x10] sm:$0xff] %vm848_vm8, %v6649_v43  ;;  %v2076_v46 = vmul.f32 0.0625, %v7235_v44  ;;  %v2438_v51 = vmul.f32 0.1875, %v7235_v44  ;;  %v2800_v58 = vmul.f32 0.3125, %v7235_v44  ;;  %v7291_v7 = vmul.f32 0.4375, %v7235_v44 }
  0xe8   : > { %758 = vst.msk [vmem:[#allocation3] sm:$0xff] %vm505_vm1, %v743_v42  ;;  %v833_v47 = vpop.f32.mrf.mxu1  ;;  %v7248_v54 = vld [vmem:[#allocation2] sm:$0xff]  ;;  %v7311_v13 = vmul.f32 0.5625, %v7235_v44 }
  0xe9   : > { %v6642_v45 = vpop.f32.mrf.mxu0  ;;  %849 = vst.msk [vmem:[#allocation4] sm:$0xff] %vm848_vm8, %v833_v47  ;;  %2086 = vrot.lane.b32.xlu0 %v2076_v46, %s7044_s20  ;;  %9323 = vst [vmem:[#allocation14_spill] sm:$0xff] %v7291_v7  ;;  %v2074_v17 = vmul.f32 0.0625, %v7248_v54  ;;  %v2436_v19 = vmul.f32 0.1875, %v7248_v54  ;;  %v2798_v25 = vmul.f32 0.3125, %v7248_v54  ;;  %v7354_v27 = vmul.f32 0.4375, %v7248_v54 }
  0xea   : > { %761 = vst.msk [vmem:[#allocation3 + $0x18] sm:$0xff] %vm505_vm1, %v6642_v45  ;;  %v6650_v49 = vpop.f32.mrf.mxu1  ;;  %v7243_v50 = vld [vmem:[#allocation2 + $0x18] sm:$0xff]  ;;  %9324 = vst [vmem:[#allocation15_spill] sm:$0xff] %v7311_v13  ;;  %v7363_v35 = vmul.f32 0.5625, %v7248_v54 }
  0xeb   : > { %v746_v48 = vpop.f32.mrf.mxu0  ;;  %852 = vst.msk [vmem:[#allocation4 + $0x18] sm:$0xff] %vm848_vm8, %v6650_v49  ;;  %v2077_v52 = vmul.f32 0.0625, %v7243_v50  ;;  %v7259_v57 = vpack.c.bf16 %v7243_v50, %v7235_v44  ;;  %v2439_v59 = vmul.f32 0.1875, %v7243_v50  ;;  %v2801_v8 = vmul.f32 0.3125, %v7243_v50  ;;  %9329 = vst [vmem:[#allocation20_spill] sm:$0xff] %v7354_v27 }
  0xec   : > { %759 = vst.msk [vmem:[#allocation3 + $0x8] sm:$0xff] %vm505_vm1, %v746_v48  ;;  %v836_v53 = vpop.f32.mrf.mxu1  ;;  %v7250_v55 = vld [vmem:[#allocation2 + $0x8] sm:$0xff]  ;;  %v7314_v14 = vmul.f32 0.4375, %v7243_v50  ;;  %v7328_v18 = vmul.f32 0.5625, %v7243_v50  ;;  %9330 = vst [vmem:[#allocation21_spill] sm:$0xff] %v7363_v35 }
  0xed   : > { %850 = vst.msk [vmem:[#allocation4 + $0x8] sm:$0xff] %vm848_vm8, %v836_v53  ;;  %2448 = vrot.lane.b32.xlu0 %v2438_v51, %s7044_s20  ;;  %2088 = vrot.lane.b32.xlu1 %v2077_v52, %s7044_s20  ;;  %v861_v56 = vpack.c.bf16 %v7250_v55, %v7248_v54  ;;  %v7267_v62 = vld [vmem:[#allocation3 + $0x10] sm:$0xff]  ;;  %v2075_v20 = vmul.f32 0.0625, %v7250_v55  ;;  %v2437_v26 = vmul.f32 0.1875, %v7250_v55  ;;  %v2799_v28 = vmul.f32 0.3125, %v7250_v55 }
  0xee   : > { %v7280_v2 = vld [vmem:[#allocation4 + $0x10] sm:$0xff]  ;;  %9325 = vst [vmem:[#allocation16_spill] sm:$0xff] %v7314_v14  ;;  %9326 = vst [vmem:[#allocation17_spill] sm:$0xff] %v7328_v18  ;;  %v7366_v37 = vmul.f32 0.4375, %v7250_v55  ;;  %v7373_v39 = vmul.f32 0.125, %v7267_v62  ;;  %v7376_v40 = vmul.f32 0.5625, %v7250_v55 }
  0xef   : > { %6653 = vmatprep.mubr.msk.bf16.mxu0 %vm864_vm9, %v861_v56  ;;  %v7265_v61 = vld [vmem:[#allocation3] sm:$0xff]  ;;  %v7339_v22 = vld [vmem:[#allocation4 + $0x10] sm:$0xff]  ;;  %v7383_v41 = vmul.f32 0.375, %v7267_v62  ;;  %v7393_v43 = vmul.f32 0.625, %v7267_v62  ;;  %v7406_v47 = vmul.f32 0.875, %v7267_v62  ;;  %v7457_v53 = vmul.f32 0.25, %v7280_v2 }
  0xf0   : > { %6654 = vmatmul.mubr.msk.bf16.vlgmr.msra.gmra.mxu0 %vm864_vm9, %v7259_v57  ;;  %v7286_v5 = vld [vmem:[#allocation4] sm:$0xff]  ;;  %9327 = vst [vmem:[#allocation18_spill] sm:$0xff] %v7339_v22  ;;  %9331 = vst [vmem:[#allocation22_spill] sm:$0xff] %v7366_v37  ;;  %v7386_v42 = vmul.f32 0.375, %v7265_v61  ;;  %v7396_v45 = vmul.f32 0.875, %v7265_v61  ;;  %v2795_v30 = vmul.f32 0.6875, %v7250_v55 }
  0xf1   : > { %v7269_v63 = vld [vmem:[#allocation3 + $0x18] sm:$0xff]  ;;  %2810 = vrot.lane.b32.xlu0 %v2800_v58, %s7044_s20  ;;  %2450 = vrot.lane.b32.xlu1 %v2439_v59, %s7044_s20  ;;  %9332 = vst [vmem:[#allocation23_spill] sm:$0xff] %v7376_v40  ;;  %v7403_v46 = vmul.f32 0.75, %v7286_v5  ;;  %v7481_v58 = vpop.permute.xlu0 %1070 }
  0xf2   : > { %6664 = vmatpush3.bf16.msra.mxu0 %v1013_v60  ;;  %v933_v4 = vpack.c.bf16 %v7269_v63, %v7267_v62  ;;  %v7288_v6 = vld [vmem:[#allocation4 + $0x18] sm:$0xff]  ;;  %v7413_v48 = vmul.f32 0.125, %v7269_v63  ;;  %v7420_v49 = vmul.f32 0.375, %v7269_v63  ;;  %v7427_v51 = vmul.f32 0.625, %v7269_v63  ;;  %9333 = vst [vmem:[#allocation24_spill] sm:$0xff] %v7481_v58  ;;  %v7490_v60 = vpop.permute.xlu1 %1080 }
  0xf3   : > { %v7278_v1 = vld [vmem:[#allocation3 + $0x8] sm:$0xff]  ;;  %6944 = vmatprep.subr.msk.bf16.mxu0 %vm941_vm6, %v1195_v0  ;;  %v1003_v10 = vpack.c.bf16 %v7288_v6, %v7280_v2  ;;  %v7341_v23 = vld [vmem:[#allocation4 + $0x18] sm:$0xff]  ;;  %v7434_v52 = vmul.f32 0.875, %v7269_v63  ;;  %v7488_v59 = vmul.f32 0.75, %v7288_v6  ;;  %9334 = vst [vmem:[#allocation25_spill] sm:$0xff] %v7490_v60 }
  0xf4   : > { %v932_v3 = vpack.c.bf16 %v7278_v1, %v7265_v61  ;;  %v7296_v9 = vld [vmem:[#allocation4 + $0x8] sm:$0xff]  ;;  %9328 = vst [vmem:[#allocation19_spill] sm:$0xff] %v7341_v23  ;;  %v7631_v24 = vmul.f32 0.625, %v7278_v1 }
  0xf5   : > { %3178 = vrot.lane.b32.xlu0 %v7291_v7, %s7044_s20  ;;  %2812 = vrot.lane.b32.xlu1 %v2801_v8, %s7044_s20  ;;  %v1002_v11 = vpack.c.bf16 %v7296_v9, %v7286_v5  ;;  %v7496_v62 = vpop.permute.xlu0 %1075 }
  0xf6   : > { %6659 = vmatprep.mubr.msk.bf16.mxu1 %vm667_vm7, %v932_v3  ;;  %9335 = vst [vmem:[#allocation26_spill] sm:$0xff] %v7496_v62  ;;  %v7502_v63 = vpop.permute.xlu1 %1085 }
  0xf7   : > { %6660 = vmatmul.mubr.msk.bf16.vlgmr.msra.gmra.mxu1 %vm667_vm7, %v933_v4  ;;  %6665 = vmatprep.mubr.msk.bf16.mxu0 %vm1005_vm10, %v1002_v11  ;;  %9336 = vst [vmem:[#allocation27_spill] sm:$0xff] %v7502_v63  ;;  %v2434_v11 = vmul.f32 0.8125, %v7235_v44 }
  0xf8   : > { %6671 = vmatprep.mubr.msk.bf16.mxu1 %vm864_vm9, %v861_v56  ;;  %6666 = vmatmul.mubr.msk.bf16.vlgmr.msra.gmra.mxu0 %vm1005_vm10, %v1003_v10 }
  0xf9   : > { %6670 = vmatpush3.bf16.msra.mxu1 %v1118_v12  ;;  %3546 = vrot.lane.b32.xlu0 %v7311_v13, %s7044_s20  ;;  %v2433_v12 = vmul.f32 0.8125, %v7250_v55  ;;  %v7665_v13 = vmul.f32 0.25, %v7286_v5  ;;  %v1308_v5 = vld [vmem:[%s9236_s10] sm:$0xf] }
  0xfa   : > { %3180 = vrot.lane.b32.xlu1 %v7314_v14, %s7044_s20  ;;  %6676 = vmatpush3.bf16.msra.mxu0 %v1203_v15  ;;  %v2435_v15 = vmul.f32 0.8125, %v7243_v50 }
  0xfb   : > { %6677 = vmatprep.mubr.msk.bf16.mxu0 %vm667_vm7, %v932_v3  ;;  %6946 = vmatprep.subr.msk.bf16.mxu0 %vm871_vm5, %v1410_v16  ;;  %v2073_v3 = vmul.f32 0.9375, %v7243_v50  ;;  %9365 = vst [vmem:[#allocation56_spill] sm:$0xff] %v7665_v13 }
  0xfc   : > { %6945 = vmatprep.subr.msk.bf16.mxu1 %vm795_vm2, %v1308_v5 }
  0xfd   : > { %2082 = vrot.lane.b32.xlu0 %v2074_v17, %s7044_s20 }
  0xfe   : > { %3548 = vrot.lane.b32.xlu1 %v7328_v18, %s7044_s20 }
  0xff   : > { %6672 = vmatmul.mubr.msk.bf16.vlgmr.msra.gmra.mxu1 %vm864_vm9, %v7259_v57 }
 0x100   : > { %6678 = vmatmul.mubr.msk.bf16.vlgmr.msra.gmra.mxu0 %vm667_vm7, %v933_v4 }
 0x101   : > { %2444 = vrot.lane.b32.xlu0 %v2436_v19, %s7044_s20  ;;  %6689 = vmatprep.mubr.msk.bf16.mxu0 %vm864_vm9, %v861_v56  ;;  %v7464_v56 = vmul.f32 0.75, %v7280_v2  ;;  %v2072_v2 = vmul.f32 0.9375, %v7235_v44 }
 0x102   : > { %2084 = vrot.lane.b32.xlu1 %v2075_v20, %s7044_s20  ;;  %6688 = vmatpush3.bf16.msra.mxu0 %v1418_v21  ;;  %v2796_v21 = vmul.f32 0.6875, %v7235_v44 }
 0x105   : > { %2806 = vrot.lane.b32.xlu0 %v2798_v25, %s7044_s20  ;;  %v2432_v25 = vmul.f32 0.8125, %v7248_v54 }
 0x106   : > { %2446 = vrot.lane.b32.xlu1 %v2437_v26, %s7044_s20  ;;  %v2797_v26 = vmul.f32 0.6875, %v7243_v50 }
 0x108   : > { %6690 = vmatmul.mubr.msk.bf16.vlgmr.msra.gmra.mxu0 %vm864_vm9, %v7259_v57  ;;  %v7479_v57 = vmul.f32 0.25, %v7288_v6 }
 0x109   : > { %3174 = vrot.lane.b32.xlu0 %v7354_v27, %s7044_s20 }
 0x10a   : > { %2808 = vrot.lane.b32.xlu1 %v2799_v28, %s7044_s20 }
 0x10d   : > { %3542 = vrot.lane.b32.xlu0 %v7363_v35, %s7044_s20 }
 0x10e   : > { %3176 = vrot.lane.b32.xlu1 %v7366_v37, %s7044_s20 }
 0x111   : > { %1509 = vrot.lane.b32.xlu0 %v7373_v39, %s7045_s27 }
 0x112   : > { %3544 = vrot.lane.b32.xlu1 %v7376_v40, %s7044_s20  ;;  %v1636_v40 = vld [vmem:[%s9236_s10] sm:$0xf] }
 0x113   : > { %6948 = vmatprep.subr.msk.bf16.mxu0 %vm795_vm2, %v1636_v40 }
 0x115   : > { %1837 = vrot.lane.b32.xlu0 %v7383_v41, %s7045_s27 }
 0x116   : > { %4708 = vrot.lane.b32.xlu1 %v7386_v42, %s7045_s27 }
 0x119   : > { %2199 = vrot.lane.b32.xlu0 %v7393_v43, %s7045_s27 }
 0x11a   : > { %5398 = vrot.lane.b32.xlu1 %v7396_v45, %s7045_s27 }
 0x11d   : > { %2561 = vrot.lane.b32.xlu0 %v7406_v47, %s7045_s27 }
 0x11e   : > { %5172 = vrot.lane.b32.xlu1 %v7403_v46, %s7046_s29 }
 0x121   : > { %2923 = vrot.lane.b32.xlu0 %v7373_v39, %s7045_s27 }
 0x122   : > { %1511 = vrot.lane.b32.xlu1 %v7413_v48, %s7045_s27 }
 0x125   : > { %3291 = vrot.lane.b32.xlu0 %v7383_v41, %s7045_s27 }
 0x126   : > { %1839 = vrot.lane.b32.xlu1 %v7420_v49, %s7045_s27 }
 0x129   : > { %3643 = vrot.lane.b32.xlu0 %v7393_v43, %s7045_s27 }
 0x12a   : > { %2201 = vrot.lane.b32.xlu1 %v7427_v51, %s7045_s27 }
 0x12d   : > { %3978 = vrot.lane.b32.xlu0 %v7406_v47, %s7045_s27 }
 0x12e   : > { %2563 = vrot.lane.b32.xlu1 %v7434_v52, %s7045_s27 }
 0x131   : > { %4345 = vrot.lane.b32.xlu0 %v7373_v39, %s7045_s27 }
 0x132   : > { %2925 = vrot.lane.b32.xlu1 %v7413_v48, %s7045_s27 }
 0x135   : > { %4712 = vrot.lane.b32.xlu0 %v7383_v41, %s7045_s27 }
 0x136   : > { %3293 = vrot.lane.b32.xlu1 %v7420_v49, %s7045_s27 }
 0x139   : > { %5057 = vrot.lane.b32.xlu0 %v7393_v43, %s7045_s27 }
 0x13a   : > { %3645 = vrot.lane.b32.xlu1 %v7427_v51, %s7045_s27 }
 0x13d   : > { %5402 = vrot.lane.b32.xlu0 %v7406_v47, %s7045_s27 }
 0x13e   : > { %3980 = vrot.lane.b32.xlu1 %v7434_v52, %s7045_s27 }
 0x141   : > { %1294 = vrot.lane.b32.xlu0 %v7457_v53, %s7046_s29 }
 0x142   : > { %4347 = vrot.lane.b32.xlu1 %v7413_v48, %s7045_s27 }
 0x145   : > { %1622 = vrot.lane.b32.xlu0 %v7464_v56, %s7046_s29 }
 0x146   : > { %4714 = vrot.lane.b32.xlu1 %v7420_v49, %s7045_s27 }
 0x149   : > { %1950 = vrot.lane.b32.xlu0 %v7457_v53, %s7046_s29 }
 0x14a   : > { %5059 = vrot.lane.b32.xlu1 %v7427_v51, %s7045_s27 }
 0x14d   : > { %2312 = vrot.lane.b32.xlu0 %v7464_v56, %s7046_s29 }
 0x14e   : > { %5404 = vrot.lane.b32.xlu1 %v7434_v52, %s7045_s27 }
 0x151   : > { %2674 = vrot.lane.b32.xlu0 %v7457_v53, %s7046_s29 }
 0x152   : > { %1296 = vrot.lane.b32.xlu1 %v7479_v57, %s7046_s29 }
 0x155   : > { %3042 = vrot.lane.b32.xlu0 %v7464_v56, %s7046_s29 }
 0x156   : > { %1624 = vrot.lane.b32.xlu1 %v7488_v59, %s7046_s29 }
 0x159   : > { %3410 = vrot.lane.b32.xlu0 %v7457_v53, %s7046_s29 }
 0x15a   : > { %1952 = vrot.lane.b32.xlu1 %v7479_v57, %s7046_s29 }
 0x15b   : > { %v2087_v0 = vpop.permute.xlu0 %2086 }
 0x15c   : > { %v7510_v8 = vadd.f32 %v2087_v0, %v2072_v2 }
 0x15d   : > { %3746 = vrot.lane.b32.xlu0 %v7464_v56, %s7046_s29 }
 0x15e   : > { %2314 = vrot.lane.b32.xlu1 %v7488_v59, %s7046_s29  ;;  %9337 = vst [vmem:[#allocation28_spill] sm:$0xff] %v7510_v8 }
 0x15f   : > { %v2449_v4 = vpop.permute.xlu0 %2448  ;;  %v2089_v6 = vpop.permute.xlu1 %2088 }
 0x160   : > { %v7512_v10 = vadd.f32 %v2089_v6, %v2073_v3  ;;  %v7522_v19 = vadd.f32 %v2449_v4, %v2434_v11 }
 0x161   : > { %4097 = vrot.lane.b32.xlu0 %v7457_v53, %s7046_s29 }
 0x162   : > { %9338 = vst [vmem:[#allocation29_spill] sm:$0xff] %v7512_v10  ;;  %2676 = vrot.lane.b32.xlu1 %v7479_v57, %s7046_s29  ;;  %9339 = vst [vmem:[#allocation30_spill] sm:$0xff] %v7522_v19 }
 0x163   : > { %v2811_v16 = vpop.permute.xlu0 %2810  ;;  %v2451_v17 = vpop.permute.xlu1 %2450 }
 0x164   : > { %v7524_v20 = vadd.f32 %v2451_v17, %v2435_v15  ;;  %v7536_v2 = vadd.f32 %v2811_v16, %v2796_v21  ;;  %v7557_v15 = vmul.f32 0.125, %v7265_v61  ;;  %v2070_v16 = vmul.f32 0.9375, %v7248_v54 }
 0x165   : > { %4464 = vrot.lane.b32.xlu0 %v7464_v56, %s7046_s29  ;;  %v2071_v17 = vmul.f32 0.9375, %v7250_v55  ;;  %v7609_v55 = vmul.f32 0.125, %v7278_v1 }
 0x166   : > { %9340 = vst [vmem:[#allocation31_spill] sm:$0xff] %v7524_v20  ;;  %3044 = vrot.lane.b32.xlu1 %v7488_v59, %s7046_s29  ;;  %9342 = vst [vmem:[#allocation33_spill] sm:$0xff] %v7536_v2  ;;  %v7737_v20 = vmul.f32 0.75, %v7296_v9 }
 0x167   : > { %v7534_v28 = vpop.permute.xlu0 %3178  ;;  %v2813_v0 = vpop.permute.xlu1 %2812 }
 0x168   : > { %9341 = vst [vmem:[#allocation32_spill] sm:$0xff] %v7534_v28  ;;  %v7538_v3 = vadd.f32 %v2813_v0, %v2797_v26 }
 0x169   : > { %4831 = vrot.lane.b32.xlu0 %v7457_v53, %s7046_s29 }
 0x16a   : > { %9343 = vst [vmem:[#allocation34_spill] sm:$0xff] %v7538_v3  ;;  %3412 = vrot.lane.b32.xlu1 %v7479_v57, %s7046_s29  ;;  %v1644_v3 = vsel %vm795_vm2, %v1636_v40, 0  ;;  %v7730_v40 = vld [vmem:[%s9235_s9] sm:$0x3] }
 0x16b   : > { %v7546_v4 = vpop.permute.xlu0 %3546  ;;  %6700 = vmatpush3.bf16.msra.mxu0 %v1644_v3  ;;  %9371 = vst [vmem:[#allocation62_spill] sm:$0xff] %v7730_v40 }
 0x16c   : > { %9344 = vst [vmem:[#allocation35_spill] sm:$0xff] %v7546_v4  ;;  %v7548_v6 = vpop.permute.xlu1 %3180  ;;  %6950 = vmatprep.subr.msk.bf16.mxu0 %vm941_vm6, %v7730_v40 }
 0x16d   : > { %9345 = vst [vmem:[#allocation36_spill] sm:$0xff] %v7548_v6  ;;  %5176 = vrot.lane.b32.xlu0 %v7464_v56, %s7046_s29 }
 0x16e   : > { %3748 = vrot.lane.b32.xlu1 %v7488_v59, %s7046_s29 }
 0x16f   : > { %v2083_v50 = vpop.permute.xlu0 %2082 }
 0x170   : > { %v7554_v11 = vpop.permute.xlu1 %3548  ;;  %v7565_v0 = vadd.f32 %v2083_v50, %v2070_v16  ;;  %v7578_v50 = vmul.f32 0.625, %v7265_v61 }
 0x171   : > { %9346 = vst [vmem:[#allocation37_spill] sm:$0xff] %v7554_v11  ;;  %1505 = vrot.lane.b32.xlu0 %v7557_v15, %s7045_s27  ;;  %v7642_v11 = vmul.f32 0.875, %v7278_v1 }
 0x172   : > { %4099 = vrot.lane.b32.xlu1 %v7479_v57, %s7046_s29  ;;  %9347 = vst [vmem:[#allocation38_spill] sm:$0xff] %v7565_v0 }
 0x173   : > { %v2445_v21 = vpop.permute.xlu0 %2444 }
 0x174   : > { %v2085_v26 = vpop.permute.xlu1 %2084  ;;  %v7580_v16 = vadd.f32 %v2445_v21, %v2432_v25 }
 0x175   : > { %v7567_v44 = vadd.f32 %v2085_v26, %v2071_v17  ;;  %1833 = vrot.lane.b32.xlu0 %v7386_v42, %s7045_s27  ;;  %v2794_v26 = vmul.f32 0.6875, %v7248_v54 }
 0x176   : > { %4466 = vrot.lane.b32.xlu1 %v7488_v59, %s7046_s29  ;;  %9349 = vst [vmem:[#allocation40_spill] sm:$0xff] %v7580_v16 }
 0x177   : > { %9348 = vst [vmem:[#allocation39_spill] sm:$0xff] %v7567_v44  ;;  %v2807_v32 = vpop.permute.xlu0 %2806 }
 0x178   : > { %v2447_v38 = vpop.permute.xlu1 %2446  ;;  %v7594_v25 = vadd.f32 %v2807_v32, %v2794_v26  ;;  %v7620_v26 = vmul.f32 0.375, %v7278_v1 }
 0x179   : > { %v7582_v17 = vadd.f32 %v2447_v38, %v2433_v12  ;;  %2195 = vrot.lane.b32.xlu0 %v7578_v50, %s7045_s27 }
 0x17a   : > { %4833 = vrot.lane.b32.xlu1 %v7479_v57, %s7046_s29  ;;  %9352 = vst [vmem:[#allocation43_spill] sm:$0xff] %v7594_v25 }
 0x17b   : > { %9350 = vst [vmem:[#allocation41_spill] sm:$0xff] %v7582_v17  ;;  %v7592_v34 = vpop.permute.xlu0 %3174 }
 0x17c   : > { %9351 = vst [vmem:[#allocation42_spill] sm:$0xff] %v7592_v34  ;;  %v2809_v61 = vpop.permute.xlu1 %2808  ;;  %v1316_v34 = vsel %vm795_vm2, %v1308_v5, 0 }
 0x17d   : > { %v7596_v38 = vadd.f32 %v2809_v61, %v2795_v30  ;;  %2557 = vrot.lane.b32.xlu0 %v7396_v45, %s7045_s27  ;;  %6682 = vmatpush3.bf16.msra.mxu1 %v1316_v34  ;;  %v7712_v34 = vld [vmem:[%s9235_s9] sm:$0x3] }
 0x17e   : > { %5178 = vrot.lane.b32.xlu1 %v7488_v59, %s7046_s29  ;;  %9369 = vst [vmem:[#allocation60_spill] sm:$0xff] %v7712_v34  ;;  %6947 = vmatprep.subr.msk.bf16.mxu1 %vm941_vm6, %v7712_v34 }
 0x17f   : > { %9353 = vst [vmem:[#allocation44_spill] sm:$0xff] %v7596_v38  ;;  %v7604_v12 = vpop.permute.xlu0 %3542  ;;  %v7719_v38 = vmul.f32 0.25, %v7296_v9 }
 0x180   : > { %9354 = vst [vmem:[#allocation45_spill] sm:$0xff] %v7604_v12  ;;  %v7606_v21 = vpop.permute.xlu1 %3176 }
 0x181   : > { %9355 = vst [vmem:[#allocation46_spill] sm:$0xff] %v7606_v21  ;;  %2919 = vrot.lane.b32.xlu0 %v7557_v15, %s7045_s27  ;;  %9370 = vst [vmem:[#allocation61_spill] sm:$0xff] %v7719_v38 }
 0x182   : > { %1507 = vrot.lane.b32.xlu1 %v7609_v55, %s7045_s27 }
 0x183   : > { %v7615_v30 = vpop.permute.xlu0 %1509 }
 0x184   : > { %9356 = vst [vmem:[#allocation47_spill] sm:$0xff] %v7615_v30  ;;  %v7617_v32 = vpop.permute.xlu1 %3544 }
 0x185   : > { %9357 = vst [vmem:[#allocation48_spill] sm:$0xff] %v7617_v32  ;;  %3287 = vrot.lane.b32.xlu0 %v7386_v42, %s7045_s27 }
 0x186   : > { %1835 = vrot.lane.b32.xlu1 %v7620_v26, %s7045_s27 }
 0x187   : > { %v7626_v61 = vpop.permute.xlu0 %1837 }
 0x188   : > { %9358 = vst [vmem:[#allocation49_spill] sm:$0xff] %v7626_v61  ;;  %v7628_v54 = vpop.permute.xlu1 %4708 }
 0x189   : > { %9359 = vst [vmem:[#allocation50_spill] sm:$0xff] %v7628_v54  ;;  %3639 = vrot.lane.b32.xlu0 %v7578_v50, %s7045_s27 }
 0x18a   : > { %2197 = vrot.lane.b32.xlu1 %v7631_v24, %s7045_s27 }
 0x18b   : > { %v7637_v4 = vpop.permute.xlu0 %2199 }
 0x18c   : > { %9360 = vst [vmem:[#allocation51_spill] sm:$0xff] %v7637_v4  ;;  %v7639_v7 = vpop.permute.xlu1 %5398 }
 0x18d   : > { %9361 = vst [vmem:[#allocation52_spill] sm:$0xff] %v7639_v7  ;;  %3974 = vrot.lane.b32.xlu0 %v7396_v45, %s7045_s27  ;;  %v2655_v7 = vld [vmem:[#allocation4 + $0x8] sm:$0xff] }
 0x18e   : > { %2559 = vrot.lane.b32.xlu1 %v7642_v11, %s7045_s27  ;;  %v7769_v30 = vmul.f32 0.25, %v2655_v7 }
 0x18f   : > { %v7648_v14 = vpop.permute.xlu0 %2561 }
 0x190   : > { %9362 = vst [vmem:[#allocation53_spill] sm:$0xff] %v7648_v14  ;;  %v7650_v12 = vpop.permute.xlu1 %5172  ;;  %9375 = vst [vmem:[#allocation66_spill] sm:$0xff] %v7769_v30 }
 0x191   : > { %9363 = vst [vmem:[#allocation54_spill] sm:$0xff] %v7650_v12  ;;  %4341 = vrot.lane.b32.xlu0 %v7557_v15, %s7045_s27  ;;  %v4077_v12 = vld [vmem:[#allocation4] sm:$0xff] }
 0x192   : > { %2921 = vrot.lane.b32.xlu1 %v7609_v55, %s7045_s27 }
 0x193   : > { %v7656_v27 = vpop.permute.xlu0 %2923 }
 0x194   : > { %v7658_v1 = vpop.permute.xlu1 %1511 }
 0x195   : > { %9364 = vst [vmem:[#allocation55_spill] sm:$0xff] %v7658_v1  ;;  %5053 = vrot.lane.b32.xlu0 %v7578_v50, %s7045_s27 }
 0x196   : > { %3289 = vrot.lane.b32.xlu1 %v7620_v26, %s7045_s27 }
 0x197   : > { %v7667_v28 = vpop.permute.xlu0 %3291 }
 0x198   : > { %v7669_v32 = vpop.permute.xlu1 %1839 }
 0x199   : > { %9366 = vst [vmem:[#allocation57_spill] sm:$0xff] %v7669_v32  ;;  %1290 = vrot.lane.b32.xlu0 %v7665_v13, %s7046_s29  ;;  %v7767_v32 = vmul.f32 0.25, %v4077_v12 }
 0x19a   : > { %3641 = vrot.lane.b32.xlu1 %v7631_v24, %s7045_s27 }
 0x19b   : > { %v7675_v37 = vpop.permute.xlu0 %3643  ;;  %9374 = vst [vmem:[#allocation65_spill] sm:$0xff] %v7767_v32 }
 0x19c   : > { %v7677_v18 = vpop.permute.xlu1 %2201 }
 0x19d   : > { %9367 = vst [vmem:[#allocation58_spill] sm:$0xff] %v7677_v18  ;;  %1618 = vrot.lane.b32.xlu0 %v7403_v46, %s7046_s29 }
 0x19e   : > { %3976 = vrot.lane.b32.xlu1 %v7642_v11, %s7045_s27 }
 0x19f   : > { %v7686_v6 = vpop.permute.xlu0 %3978 }
 0x1a0   : > { %v7688_v35 = vpop.permute.xlu1 %2563 }
 0x1a1   : > { %9368 = vst [vmem:[#allocation59_spill] sm:$0xff] %v7688_v35  ;;  %1946 = vrot.lane.b32.xlu0 %v7665_v13, %s7046_s29 }
 0x1a2   : > { %4343 = vrot.lane.b32.xlu1 %v7609_v55, %s7045_s27 }
 0x1a3   : > { %v7699_v21 = vpop.permute.xlu0 %4345 }
 0x1a4   : > { %v7701_v2 = vpop.permute.xlu1 %2925 }
 0x1a5   : > { %2308 = vrot.lane.b32.xlu0 %v7403_v46, %s7046_s29 }
 0x1a6   : > { %5055 = vrot.lane.b32.xlu1 %v7631_v24, %s7045_s27 }
 0x1a7   : > { %v7714_v5 = vpop.permute.xlu0 %4712 }
 0x1a8   : > { %v7716_v25 = vpop.permute.xlu1 %3293 }
 0x1a9   : > { %2670 = vrot.lane.b32.xlu0 %v7665_v13, %s7046_s29 }
 0x1aa   : > { %1292 = vrot.lane.b32.xlu1 %v7719_v38, %s7046_s29 }
 0x1ab   : > { %v7732_v3 = vpop.permute.xlu0 %5057 }
 0x1ac   : > { %v7734_v19 = vpop.permute.xlu1 %3645 }
 0x1ad   : > { %3038 = vrot.lane.b32.xlu0 %v7403_v46, %s7046_s29 }
 0x1ae   : > { %1620 = vrot.lane.b32.xlu1 %v7737_v20, %s7046_s29 }
 0x1af   : > { %v7745_v14 = vpop.permute.xlu0 %5402 }
 0x1b0   : > { %9372 = vst [vmem:[#allocation63_spill] sm:$0xff] %v7745_v14  ;;  %v7747_v35 = vpop.permute.xlu1 %3980  ;;  %v6655_v16 = vpop.f32.mrf.mxu0 }
 0x1b1   : > { %3406 = vrot.lane.b32.xlu0 %v7665_v13, %s7046_s29  ;;  %v926_v14 = vadd.f32 %v6655_v16, %v7221_v33 }
 0x1b2   : > { %1948 = vrot.lane.b32.xlu1 %v7719_v38, %s7046_s29  ;;  %v909_v9 = vpop.f32.mrf.mxu0 }
 0x1b3   : > { %v7753_v17 = vpop.permute.xlu0 %1294  ;;  %v924_v10 = vadd.f32 %v909_v9, %v7213_v29  ;;  %v7777_v9 = vmul.f32 0.75, %v4077_v12  ;;  %v7779_v29 = vmul.f32 0.75, %v2655_v7 }
 0x1b4   : > { %v7755_v4 = vpop.permute.xlu1 %4347  ;;  %v6656_v18 = vpop.f32.mrf.mxu0 }
 0x1b5   : > { %3742 = vrot.lane.b32.xlu0 %v7403_v46, %s7046_s29  ;;  %v927_v40 = vadd.f32 %v6656_v18, %v7226_v36  ;;  %9376 = vst [vmem:[#allocation67_spill] sm:$0xff] %v7777_v9  ;;  %9377 = vst [vmem:[#allocation68_spill] sm:$0xff] %v7779_v29  ;;  %v7870_v36 = vld [vmem:[#allocation2 + $0x10] sm:$0xff] }
 0x1b6   : > { %2310 = vrot.lane.b32.xlu1 %v7737_v20, %s7046_s29  ;;  %v912_v54 = vpop.f32.mrf.mxu0  ;;  %9389 = vst [vmem:[#allocation80_spill] sm:$0xff] %v7870_v36 }
 0x1b7   : > { %v6661_v8 = vpop.f32.mrf.mxu1  ;;  %v7763_v0 = vpop.permute.xlu0 %1622 }
 0x1b8   : > { %9373 = vst [vmem:[#allocation64_spill] sm:$0xff] %v7763_v0  ;;  %v996_v44 = vadd.f32 %v6661_v8, %v926_v14  ;;  %v7765_v61 = vpop.permute.xlu1 %4714  ;;  %v6667_v16 = vpop.f32.mrf.mxu0  ;;  %v925_v0 = vadd.f32 %v912_v54, %v7217_v31 }
 0x1b9   : > { %v979_v33 = vpop.f32.mrf.mxu1  ;;  %4093 = vrot.lane.b32.xlu0 %v7767_v32, %s7046_s29 }
 0x1ba   : > { %v1066_v1 = vadd.f32 %v6667_v16, %v996_v44  ;;  %v994_v38 = vadd.f32 %v979_v33, %v924_v10  ;;  %2672 = vrot.lane.b32.xlu1 %v7769_v30, %s7046_s29  ;;  %v1049_v14 = vpop.f32.mrf.mxu0 }
 0x1bb   : > { %v6662_v8 = vpop.f32.mrf.mxu1  ;;  %v7783_v18 = vpop.permute.xlu0 %1950 }
 0x1bc   : > { %v1090_v13 = vadd.f32 %v7490_v60, %v1066_v1  ;;  %v1064_v34 = vadd.f32 %v1049_v14, %v994_v38  ;;  %v997_v44 = vadd.f32 %v6662_v8, %v927_v40  ;;  %v7785_v16 = vpop.permute.xlu1 %5059  ;;  %v6668_v33 = vpop.f32.mrf.mxu0  ;;  %v7868_v60 = vmul.f32 0.25, %v7341_v23 }
 0x1bd   : > { %v982_v7 = vpop.f32.mrf.mxu1  ;;  %4460 = vrot.lane.b32.xlu0 %v7777_v9, %s7046_s29 }
 0x1be   : > { %v1094_v10 = vmax.f32 %v1090_v13, 0.0  ;;  %v1088_v54 = vadd.f32 %v7481_v58, %v1064_v34  ;;  %v1067_v12 = vadd.f32 %v6668_v33, %v997_v44  ;;  %v995_v38 = vadd.f32 %v982_v7, %v925_v0  ;;  %3040 = vrot.lane.b32.xlu1 %v7779_v29, %s7046_s29  ;;  %v1052_v1 = vpop.f32.mrf.mxu0  ;;  %v7804_v44 = vld [vmem:[#allocation3 + $0x8] sm:$0xff]  ;;  %9388 = vst [vmem:[#allocation79_spill] sm:$0xff] %v7868_v60 }
 0x1bf   : > { %v7800_v13 = vpop.permute.xlu0 %2312  ;;  %9379 = vst [vmem:[#allocation70_spill] sm:$0xff] %v7804_v44 }
 0x1c0   : > { %1098 = vst.msk [vmem:[%s7790_s24 + $0x20] sm:$0xff] %vm505_vm1, %v1094_v10  ;;  %v1092_v40 = vmax.f32 %v1088_v54, 0.0  ;;  %v1091_v14 = vadd.f32 %v7502_v63, %v1067_v12  ;;  %v1065_v8 = vadd.f32 %v1052_v1, %v995_v38  ;;  %v7802_v34 = vpop.permute.xlu1 %5404  ;;  %v4701_v12 = vmul.f32 0.375, %v7804_v44 }
 0x1c1   : > { %9378 = vst [vmem:[#allocation69_spill] sm:$0xff] %v7802_v34  ;;  %4827 = vrot.lane.b32.xlu0 %v7767_v32, %s7046_s29  ;;  %v3855_v34 = vmul.f32 0.6875, %v7870_v36 }
 0x1c2   : > { %1096 = vst.msk [vmem:[%s7790_s24] sm:$0xff] %vm505_vm1, %v1092_v40  ;;  %v1095_v0 = vmax.f32 %v1091_v14, 0.0  ;;  %v1089_v33 = vadd.f32 %v7496_v62, %v1065_v8  ;;  %3408 = vrot.lane.b32.xlu1 %v7769_v30, %s7046_s29  ;;  %v5391_v40 = vmul.f32 0.875, %v7804_v44  ;;  %v7856_v62 = vld [vmem:[#allocation2] sm:$0xff]  ;;  %v7883_v44 = vld [vmem:[#allocation2 + $0x18] sm:$0xff] }
 0x1c3   : > { %v7815_v10 = vpop.permute.xlu0 %2674  ;;  %9385 = vst [vmem:[#allocation76_spill] sm:$0xff] %v7856_v62  ;;  %v3853_v63 = vmul.f32 0.6875, %v7856_v62  ;;  %9393 = vst [vmem:[#allocation84_spill] sm:$0xff] %v7883_v44 }
 0x1c4   : > { %1099 = vst.msk [vmem:[%s7790_s24 + $0x30] sm:$0xff] %vm505_vm1, %v1095_v0  ;;  %v1093_v7 = vmax.f32 %v1089_v33, 0.0  ;;  %v7817_v54 = vpop.permute.xlu1 %1296 }
 0x1c5   : > { %4710 = vrot.lane.b32.xlu0 %v4701_v12, %s7045_s27 }
 0x1c6   : > { %1097 = vst.msk [vmem:[%s7790_s24 + $0x10] sm:$0xff] %vm505_vm1, %v1093_v7  ;;  %3744 = vrot.lane.b32.xlu1 %v7779_v29, %s7046_s29 }
 0x1c7   : > { %v7825_v38 = vpop.permute.xlu0 %3042 }
 0x1c8   : > { %9380 = vst [vmem:[#allocation71_spill] sm:$0xff] %v7825_v38  ;;  %v7827_v1 = vpop.permute.xlu1 %1624 }
 0x1c9   : > { %5400 = vrot.lane.b32.xlu0 %v5391_v40, %s7045_s27  ;;  %v7854_v40 = vmul.f32 0.25, %v7339_v22 }
 0x1ca   : > { %4095 = vrot.lane.b32.xlu1 %v7769_v30, %s7046_s29 }
 0x1cb   : > { %v7833_v14 = vpop.permute.xlu0 %3410  ;;  %9384 = vst [vmem:[#allocation75_spill] sm:$0xff] %v7854_v40 }
 0x1cc   : > { %9381 = vst [vmem:[#allocation72_spill] sm:$0xff] %v7833_v14  ;;  %v7835_v8 = vpop.permute.xlu1 %1952  ;;  %v7898_v14 = vmul.f32 0.75, %v7339_v22 }
 0x1cd   : > { %5174 = vrot.lane.b32.xlu0 %v7779_v29, %s7046_s29 }
 0x1ce   : > { %4462 = vrot.lane.b32.xlu1 %v7779_v29, %s7046_s29  ;;  %9396 = vst [vmem:[#allocation87_spill] sm:$0xff] %v7898_v14 }
 0x1cf   : > { %v7841_v0 = vpop.permute.xlu0 %3746 }
 0x1d0   : > { %9382 = vst [vmem:[#allocation73_spill] sm:$0xff] %v7841_v0  ;;  %v7843_v33 = vpop.permute.xlu1 %2314 }
 0x1d1   : > { %5517 = vrot.lane.b32.xlu0 %v7767_v32, %s7046_s29  ;;  %v7872_v32 = vld [vmem:[#allocation2 + $0x8] sm:$0xff] }
 0x1d2   : > { %4829 = vrot.lane.b32.xlu1 %v7769_v30, %s7046_s29  ;;  %9390 = vst [vmem:[#allocation81_spill] sm:$0xff] %v7872_v32 }
 0x1d3   : > { %v7849_v7 = vpop.permute.xlu0 %4097 }
 0x1d4   : > { %9383 = vst [vmem:[#allocation74_spill] sm:$0xff] %v7849_v7  ;;  %v7851_v12 = vpop.permute.xlu1 %2676 }
 0x1d5   : > { %5521 = vrot.lane.b32.xlu0 %v7854_v40, %s7046_s29 }
 0x1d6   : > { %5519 = vrot.lane.b32.xlu1 %v7769_v30, %s7046_s29 }
 0x1d7   : > { %v7862_v58 = vpop.permute.xlu0 %4464 }
 0x1d8   : > { %9386 = vst [vmem:[#allocation77_spill] sm:$0xff] %v7862_v58  ;;  %v7864_v31 = vpop.permute.xlu1 %3044  ;;  %v3854_v58 = vmul.f32 0.6875, %v7872_v32 }
 0x1d9   : > { %9387 = vst [vmem:[#allocation78_spill] sm:$0xff] %v7864_v31  ;;  %3861 = vrot.lane.b32.xlu0 %v3853_v63, %s7044_s20  ;;  %v3856_v63 = vmul.f32 0.6875, %v7883_v44 }
 0x1da   : > { %5523 = vrot.lane.b32.xlu1 %v7868_v60, %s7046_s29 }
 0x1db   : > { %v7877_v40 = vpop.permute.xlu0 %4831 }
 0x1dc   : > { %9391 = vst [vmem:[#allocation82_spill] sm:$0xff] %v7877_v40  ;;  %v7879_v30 = vpop.permute.xlu1 %3412 }
 0x1dd   : > { %9392 = vst [vmem:[#allocation83_spill] sm:$0xff] %v7879_v30  ;;  %3865 = vrot.lane.b32.xlu0 %v3855_v34, %s7044_s20  ;;  %v4588_v30 = vmul.f32 0.9375, %v7872_v32 }
 0x1de   : > { %3863 = vrot.lane.b32.xlu1 %v3854_v58, %s7044_s20 }
 0x1df   : > { %v5177_v7 = vpop.permute.xlu0 %5176 }
 0x1e0   : > { %v7887_v0 = vpop.permute.xlu1 %3748 }
 0x1e1   : > { %9394 = vst [vmem:[#allocation85_spill] sm:$0xff] %v7887_v0  ;;  %5836 = vrot.lane.b32.xlu0 %v7779_v29, %s7046_s29  ;;  %v4220_v29 = vmul.f32 0.8125, %v7856_v62  ;;  %v4223_v0 = vmul.f32 0.8125, %v7883_v44 }
 0x1e2   : > { %3867 = vrot.lane.b32.xlu1 %v3856_v63, %s7044_s20  ;;  %v7910_v63 = vmul.f32 0.75, %v7341_v23 }
 0x1e3   : > { %v7893_v60 = vpop.permute.xlu0 %1505 }
 0x1e4   : > { %v7895_v40 = vpop.permute.xlu1 %4099  ;;  %9398 = vst [vmem:[#allocation89_spill] sm:$0xff] %v7910_v63 }
 0x1e5   : > { %9395 = vst [vmem:[#allocation86_spill] sm:$0xff] %v7895_v40  ;;  %5838 = vrot.lane.b32.xlu0 %v7898_v14, %s7046_s29  ;;  %v4221_v40 = vmul.f32 0.8125, %v7872_v32 }
 0x1e6   : > { %5834 = vrot.lane.b32.xlu1 %v7777_v9, %s7046_s29  ;;  %v4222_v9 = vmul.f32 0.8125, %v7870_v36 }
 0x1e7   : > { %v7904_v58 = vpop.permute.xlu0 %1833 }
 0x1e8   : > { %v7906_v34 = vpop.permute.xlu1 %4466 }
 0x1e9   : > { %9397 = vst [vmem:[#allocation88_spill] sm:$0xff] %v7906_v34  ;;  %4228 = vrot.lane.b32.xlu0 %v4220_v29, %s7044_s20  ;;  %v4587_v29 = vmul.f32 0.9375, %v7856_v62 }
 0x1ea   : > { %5840 = vrot.lane.b32.xlu1 %v7910_v63, %s7046_s29  ;;  %v7928_v63 = vadd.f32 %v5177_v7, %v7457_v53 }
 0x1eb   : > { %v7915_v22 = vpop.permute.xlu0 %2195 }
 0x1ec   : > { %9399 = vst [vmem:[#allocation90_spill] sm:$0xff] %v7915_v22  ;;  %v7917_v14 = vpop.permute.xlu1 %4833  ;;  %9402 = vst [vmem:[#allocation93_spill] sm:$0xff] %v7928_v63 }
 0x1ed   : > { %9400 = vst [vmem:[#allocation91_spill] sm:$0xff] %v7917_v14  ;;  %4232 = vrot.lane.b32.xlu0 %v4222_v9, %s7044_s20  ;;  %v4589_v14 = vmul.f32 0.9375, %v7870_v36 }
 0x1ee   : > { %4230 = vrot.lane.b32.xlu1 %v4221_v40, %s7044_s20 }
 0x1ef   : > { %v7923_v34 = vpop.permute.xlu0 %2557 }
 0x1f0   : > { %9401 = vst [vmem:[#allocation92_spill] sm:$0xff] %v7923_v34  ;;  %v5179_v23 = vpop.permute.xlu1 %5178 }
 0x1f1   : > { %v7931_v22 = vadd.f32 %v5179_v23, %v7479_v57  ;;  %4595 = vrot.lane.b32.xlu0 %v4587_v29, %s7044_s20  ;;  %v4590_v29 = vmul.f32 0.9375, %v7883_v44 }
 0x1f2   : > { %4234 = vrot.lane.b32.xlu1 %v4223_v0, %s7044_s20  ;;  %v7947_v0 = vpack.c.bf16 %v7872_v32, %v7856_v62 }
 0x1f3   : > { %9403 = vst [vmem:[#allocation94_spill] sm:$0xff] %v7931_v22  ;;  %v2920_v40 = vpop.permute.xlu0 %2919 }
 0x1f4   : > { %v7937_v34 = vpop.permute.xlu1 %1507  ;;  %9404 = vst [vmem:[#allocation95_spill] sm:$0xff] %v7947_v0 }
 0x1f5   : > { %4599 = vrot.lane.b32.xlu0 %v4589_v14, %s7044_s20  ;;  %v2934_v14 = vadd.f32 %v7701_v2, %v7434_v52  ;;  %v3301_v2 = vadd.f32 %v7667_v28, %v7393_v43 }
 0x1f6   : > { %4597 = vrot.lane.b32.xlu1 %v4588_v30, %s7044_s20  ;;  %v7957_v30 = vpack.c.bf16 %v7883_v44, %v7870_v36  ;;  %v3302_v44 = vadd.f32 %v7716_v25, %v7427_v51 }
 0x1f7   : > { %v3288_v23 = vpop.permute.xlu0 %3287 }
 0x1f8   : > { %v7943_v7 = vpop.permute.xlu1 %1835  ;;  %9406 = vst [vmem:[#allocation97_spill] sm:$0xff] %v7957_v30  ;;  %v3299_v25 = vadd.f32 %v3288_v23, %v7578_v50 }
 0x1f9   : > { %4955 = vrot.lane.b32.xlu0 %v7947_v0, %s7044_s20 }
 0x1fa   : > { %4601 = vrot.lane.b32.xlu1 %v4590_v29, %s7044_s20  ;;  %v2933_v29 = vadd.f32 %v7656_v27, %v7406_v47  ;;  %v3304_v27 = vpack.c.bf16 %v3302_v44, %v3301_v2  ;;  %v3989_v44 = vadd.f32 %v7747_v35, %v7413_v48 }
 0x1fb   : > { %v3640_v9 = vpop.permute.xlu0 %3639 }
 0x1fc   : > { %v7953_v63 = vpop.permute.xlu1 %2197 }
 0x1fd   : > { %9405 = vst [vmem:[#allocation96_spill] sm:$0xff] %v7953_v63  ;;  %5300 = vrot.lane.b32.xlu0 %v7947_v0, %s7044_s20  ;;  %v2936_v63 = vpack.c.bf16 %v2934_v14, %v2933_v29  ;;  %v2931_v0 = vadd.f32 %v7396_v45, %v2920_v40  ;;  %v3651_v40 = vadd.f32 %v7386_v42, %v3640_v9 }
 0x1fe   : > { %4957 = vrot.lane.b32.xlu1 %v7957_v30, %s7044_s20 }
 0x1ff   : > { %v3975_v32 = vpop.permute.xlu0 %3974 }
 0x200   : > { %v7965_v62 = vpop.permute.xlu1 %2559  ;;  %v3986_v2 = vadd.f32 %v3975_v32, %v7557_v15 }
 0x201   : > { %9407 = vst [vmem:[#allocation98_spill] sm:$0xff] %v7965_v62 }
 0x202   : > { %5302 = vrot.lane.b32.xlu1 %v7957_v30, %s7044_s20  ;;  %v3654_v30 = vadd.f32 %v7734_v19, %v7420_v49 }
 0x203   : > { %v4342_v36 = vpop.permute.xlu0 %4341 }
 0x204   : > { %v2922_v22 = vpop.permute.xlu1 %2921 }
 0x205   : > { %v2932_v38 = vadd.f32 %v2922_v22, %v7642_v11  ;;  %v3653_v22 = vadd.f32 %v7675_v37, %v7383_v41 }
 0x206   : > { %2942 = vrot.lane.b32.xlu1 %v2936_v63, %s7045_s27 }
 0x207   : > { %v2935_v62 = vpack.c.bf16 %v2932_v38, %v2931_v0  ;;  %v7980_v14 = vpop.permute.xlu0 %5053  ;;  %v3656_v38 = vpack.c.bf16 %v3654_v30, %v3653_v22 }
 0x208   : > { %v3290_v29 = vpop.permute.xlu1 %3289 }
 0x209   : > { %v3300_v31 = vadd.f32 %v3290_v29, %v7631_v24  ;;  %2940 = vrot.lane.b32.xlu0 %v2935_v62, %s7045_s27  ;;  %v3988_v62 = vadd.f32 %v7686_v6, %v7373_v39 }
 0x20a   : > { %3310 = vrot.lane.b32.xlu1 %v3304_v27, %s7045_s27  ;;  %v4355_v27 = vadd.f32 %v7699_v21, %v7406_v47 }
 0x20b   : > { %v3303_v28 = vpack.c.bf16 %v3300_v31, %v3299_v25  ;;  %v1291_v19 = vpop.permute.xlu0 %1290  ;;  %v3991_v0 = vpack.c.bf16 %v3989_v44, %v3988_v62  ;;  %v4356_v31 = vadd.f32 %v7755_v4, %v7434_v52  ;;  %v4723_v25 = vadd.f32 %v7765_v61, %v7427_v51 }
 0x20c   : > { %v3642_v63 = vpop.permute.xlu1 %3641  ;;  %v1961_v62 = vadd.f32 %v7835_v8, %v7488_v59 }
 0x20d   : > { %v3652_v23 = vadd.f32 %v3642_v63, %v7620_v26  ;;  %3308 = vrot.lane.b32.xlu0 %v3303_v28, %s7045_s27  ;;  %v4358_v29 = vpack.c.bf16 %v4356_v31, %v4355_v27  ;;  %v4353_v28 = vadd.f32 %v7396_v45, %v4342_v36  ;;  %v5068_v63 = vadd.f32 %v7785_v16, %v7420_v49 }
 0x20e   : > { %3662 = vrot.lane.b32.xlu1 %v3656_v38, %s7045_s27  ;;  %v4722_v38 = vadd.f32 %v7714_v5, %v7393_v43  ;;  %v5067_v36 = vadd.f32 %v7732_v3, %v7383_v41  ;;  %v1305_v5 = vadd.f32 %v7488_v59, %v7817_v54  ;;  %v1302_v31 = vadd.f32 %v7403_v46, %v1291_v19 }
 0x20f   : > { %v3655_v37 = vpack.c.bf16 %v3652_v23, %v3651_v40  ;;  %v1619_v30 = vpop.permute.xlu0 %1618  ;;  %v1304_v3 = vadd.f32 %v7464_v56, %v7753_v17  ;;  %v1517_v54 = vadd.f32 %v7396_v45, %v7893_v60  ;;  %v2323_v17 = vadd.f32 %v7843_v33, %v7479_v57  ;;  %v9409_v45 = vld [vmem:[#allocation56_spill] sm:$0xff] }
 0x210   : > { %v3977_v35 = vpop.permute.xlu1 %3976  ;;  %v4725_v44 = vpack.c.bf16 %v4723_v25, %v4722_v38  ;;  %v5070_v23 = vpack.c.bf16 %v5068_v63, %v5067_v36  ;;  %v1846_v25 = vadd.f32 %v7631_v24, %v7943_v7  ;;  %v1630_v60 = vadd.f32 %v9409_v45, %v1619_v30  ;;  %v9412_v24 = vld [vmem:[#allocation55_spill] sm:$0xff] }
 0x211   : > { %v3987_v9 = vadd.f32 %v3977_v35, %v7609_v55  ;;  %3660 = vrot.lane.b32.xlu0 %v3655_v37, %s7045_s27  ;;  %v2322_v38 = vadd.f32 %v7800_v13, %v7457_v53  ;;  %v1520_v7 = vadd.f32 %v7434_v52, %v9412_v24  ;;  %v1845_v30 = vadd.f32 %v7578_v50, %v7904_v58  ;;  %v9414_v52 = vld [vmem:[#allocation47_spill] sm:$0xff] }
 0x212   : > { %3997 = vrot.lane.b32.xlu1 %v3991_v0, %s7045_s27  ;;  %v1518_v0 = vadd.f32 %v7642_v11, %v7937_v34  ;;  %v1633_v34 = vadd.f32 %v7827_v1, %v7479_v57  ;;  %v1738_v1 = vld [vmem:[%s9234_s8] sm:$0x1]  ;;  %v2685_v36 = vadd.f32 %v7851_v12, %v7488_v59  ;;  %v1519_v58 = vadd.f32 %v7406_v47, %v9414_v52 }
 0x213   : > { %v3990_v6 = vpack.c.bf16 %v3987_v9, %v3986_v2  ;;  %v8006_v22 = vpop.permute.xlu0 %1946  ;;  %v1960_v2 = vadd.f32 %v7783_v18, %v7464_v56  ;;  %v9408_v9 = vld [vmem:[#allocation60_spill] sm:$0xff]  ;;  %v2325_v63 = vpack.c.bf16 %v2323_v17, %v2322_v38  ;;  %v2684_v12 = vadd.f32 %v7815_v10, %v7464_v56  ;;  %v9423_v38 = vld [vmem:[#allocation38_spill] sm:$0xff] }
 0x214   : > { %v4344_v4 = vpop.permute.xlu1 %4343  ;;  %v1531_v27 = vsel %vm941_vm6, %v9408_v9, 0  ;;  %v1746_v10 = vsel %vm871_vm5, %v1738_v1, 0 }
 0x215   : > { %v4354_v32 = vadd.f32 %v4344_v4, %v7642_v11  ;;  %3995 = vrot.lane.b32.xlu0 %v3990_v6, %s7045_s27  ;;  %v1307_v11 = vpack.c.bf16 %v1305_v5, %v1304_v3  ;;  %v1963_v19 = vpack.c.bf16 %v1961_v62, %v1960_v2  ;;  %v9410_v4 = vld [vmem:[#allocation61_spill] sm:$0xff]  ;;  %v9413_v5 = vld [vmem:[#allocation62_spill] sm:$0xff]  ;;  %v2687_v3 = vpack.c.bf16 %v2685_v36, %v2684_v12  ;;  %s7052_s27 = smov 116  }
 0x216   : > { %4364 = vrot.lane.b32.xlu1 %v4358_v29, %s7046_s29  ;;  %v1521_v29 = vpack.c.bf16 %v1518_v0, %v1517_v54  ;;  %v1859_v62 = vsel %vm941_vm6, %v9413_v5, 0  ;;  %v2100_v0 = vld [vmem:[%s9234_s8] sm:$0x1]  ;;  %v9426_v36 = vld [vmem:[#allocation73_spill] sm:$0xff] }
 0x217   : > { %v4357_v21 = vpack.c.bf16 %v4354_v32, %v4353_v28  ;;  %v8016_v61 = vpop.permute.xlu0 %2308  ;;  %v9411_v32 = vld [vmem:[#allocation64_spill] sm:$0xff]  ;;  %v9416_v2 = vld [vmem:[#allocation78_spill] sm:$0xff]  ;;  %v3756_v5 = vadd.f32 %v9426_v36, %v7457_v53 }
 0x218   : > { %v8018_v40 = vpop.permute.xlu1 %5055  ;;  %v1632_v33 = vadd.f32 %v9411_v32, %v7457_v53  ;;  %v3053_v54 = vadd.f32 %v9416_v2, %v7479_v57  ;;  %v9430_v2 = vld [vmem:[#allocation29_spill] sm:$0xff] }
 0x219   : > { %4362 = vrot.lane.b32.xlu0 %v4357_v21, %s7046_s29 }
 0x21a   : > { %4731 = vrot.lane.b32.xlu1 %v4725_v44, %s7046_s29  ;;  %v1635_v44 = vpack.c.bf16 %v1633_v34, %v1632_v33  ;;  %v9418_v34 = vld [vmem:[#allocation71_spill] sm:$0xff] }
 0x21b   : > { %v8028_v37 = vpop.permute.xlu0 %2670  ;;  %v9422_v33 = vld [vmem:[#allocation39_spill] sm:$0xff] }
 0x21c   : > { %v1293_v16 = vpop.permute.xlu1 %1292  ;;  %v9424_v24 = vpack.c.bf16 %v9422_v33, %v9423_v38  ;;  %v9436_v33 = vld [vmem:[#allocation77_spill] sm:$0xff] }
 0x21d   : > { %v1303_v35 = vadd.f32 %v7737_v20, %v1293_v16  ;;  %v1849_v16 = vpack.c.bf16 %v1846_v25, %v1845_v30  ;;  %v9425_v30 = vld [vmem:[#allocation85_spill] sm:$0xff]  ;;  %v4474_v38 = vadd.f32 %v9436_v33, %v7457_v53 }
 0x21e   : > { %5076 = vrot.lane.b32.xlu1 %v5070_v23, %s7046_s29 }
 0x21f   : > { %v1306_v8 = vpack.c.bf16 %v1303_v35, %v1302_v31  ;;  %v8047_v6 = vpop.permute.xlu0 %3038  ;;  %v1522_v31 = vpack.c.bf16 %v1520_v7, %v1519_v58  ;;  %v9415_v35 = vld [vmem:[#allocation57_spill] sm:$0xff]  ;;  %v9428_v58 = vld [vmem:[#allocation86_spill] sm:$0xff] }
 0x220   : > { %v1621_v18 = vpop.permute.xlu1 %1620  ;;  %v1848_v47 = vadd.f32 %v7427_v51, %v9415_v35  ;;  %v9419_v51 = vld [vmem:[#allocation95_spill] sm:$0xff] }
 0x221   : > { %v1631_v28 = vadd.f32 %v1621_v18, %v9410_v4  ;;  %6683 = vmatprep.mubr.msk.bf16.mxu1 %vm1005_vm10, %v1306_v8 }
 0x222   : > { %1969 = vrot.lane.b32.xlu1 %v1963_v19, %s7046_s29  ;;  %6684 = vmatmul.mubr.msk.bf16.vlgmr.msra.gmra.mxu1 %vm1005_vm10, %v1307_v11  ;;  %v3052_v19 = vadd.f32 %v9418_v34, %v7457_v53  ;;  %v9434_v34 = vld [vmem:[#allocation88_spill] sm:$0xff]  ;;  %v8173_v53 = vld [vmem:[%s9235_s9] sm:$0x3] }
 0x223   : > { %v1634_v21 = vpack.c.bf16 %v1631_v28, %v1630_v60  ;;  %6695 = vmatprep.mubr.msk.bf16.mxu1 %vm667_vm7, %v1521_v29  ;;  %6694 = vmatpush3.bf16.msra.mxu1 %v1531_v27  ;;  %v8070_v13 = vpop.permute.xlu0 %3406  ;;  %v9417_v27 = vld [vmem:[#allocation49_spill] sm:$0xff]  ;;  %v9420_v29 = vld [vmem:[#allocation83_spill] sm:$0xff]  ;;  %v2108_v28 = vsel %vm871_vm5, %v2100_v0, 0 }
 0x224   : > { %v8072_v23 = vpop.permute.xlu1 %1948  ;;  %6949 = vmatprep.subr.msk.bf16.mxu1 %vm871_vm5, %v1738_v1  ;;  %v1847_v11 = vadd.f32 %v7393_v43, %v9417_v27  ;;  %v3055_v18 = vpack.c.bf16 %v3053_v54, %v3052_v19  ;;  %v3421_v25 = vadd.f32 %v9420_v29, %v7488_v59  ;;  %v9421_v1 = vld [vmem:[#allocation72_spill] sm:$0xff]  ;;  %v4475_v19 = vadd.f32 %v9434_v34, %v7479_v57  ;;  %v2326_v29 = vld [vmem:[%s9236_s10] sm:$0xf] }
 0x225   : > { %6701 = vmatprep.mubr.msk.bf16.mxu0 %vm1005_vm10, %v1634_v21  ;;  %v3420_v32 = vadd.f32 %v9421_v1, %v7464_v56  ;;  %v3757_v21 = vadd.f32 %v9425_v30, %v7479_v57  ;;  %v9431_v54 = vld [vmem:[#allocation28_spill] sm:$0xff] }
 0x226   : > { %2331 = vrot.lane.b32.xlu1 %v2325_v63, %s7046_s29  ;;  %6702 = vmatmul.mubr.msk.bf16.vlgmr.msra.gmra.mxu0 %vm1005_vm10, %v1635_v44  ;;  %v1850_v17 = vpack.c.bf16 %v1848_v47, %v1847_v11  ;;  %v9429_v47 = vld [vmem:[#allocation74_spill] sm:$0xff] }
 0x227   : > { %6713 = vmatprep.mubr.msk.bf16.mxu0 %vm667_vm7, %v1849_v16  ;;  %6712 = vmatpush3.bf16.msra.mxu0 %v1859_v62  ;;  %v8092_v8 = vpop.permute.xlu0 %3742  ;;  %v3423_v7 = vpack.c.bf16 %v3421_v25, %v3420_v32  ;;  %v9427_v62 = vld [vmem:[#allocation97_spill] sm:$0xff]  ;;  %v3759_v52 = vpack.c.bf16 %v3757_v21, %v3756_v5  ;;  %v4108_v16 = vadd.f32 %v9428_v58, %v7488_v59  ;;  %v9435_v25 = vld [vmem:[#allocation50_spill] sm:$0xff]  ;;  %v2340_v32 = vsel %vm795_vm2, %v2326_v29, 0 }
 0x228   : > { %v8094_v9 = vpop.permute.xlu1 %2310  ;;  %6952 = vmatprep.subr.msk.bf16.mxu0 %vm871_vm5, %v2100_v0  ;;  %v9432_v59 = vpack.c.bf16 %v9430_v2, %v9431_v54  ;;  %v4477_v21 = vpack.c.bf16 %v4475_v19, %v4474_v38  ;;  %v5065_v58 = vadd.f32 %v7980_v14, %v7386_v42  ;;  %v1958_v14 = vadd.f32 %v7403_v46, %v8006_v22  ;;  %v9441_v19 = vld [vmem:[#allocation63_spill] sm:$0xff] }
 0x22a   : > { %2693 = vrot.lane.b32.xlu1 %v2687_v3, %s7047_s13  ;;  %6696 = vmatmul.mubr.msk.bf16.vlgmr.msra.gmra.mxu1 %vm667_vm7, %v1522_v31  ;;  %v1964_v31 = vld [vmem:[%s9236_s10] sm:$0xf]  ;;  %v4107_v3 = vadd.f32 %v9429_v47, %v7464_v56 }
 0x22b   : > { %6707 = vmatprep.mubr.msk.bf16.mxu1 %vm864_vm9, %v9419_v51  ;;  %6706 = vmatpush3.bf16.msra.mxu1 %v1746_v10  ;;  %v8108_v60 = vpop.permute.xlu0 %4093  ;;  %v1978_v35 = vsel %vm795_vm2, %v1964_v31, 0  ;;  %v9433_v10 = vld [vmem:[#allocation70_spill] sm:$0xff] }
 0x22c   : > { %v8110_v43 = vpop.permute.xlu1 %2672  ;;  %6951 = vmatprep.subr.msk.bf16.mxu1 %vm795_vm2, %v1964_v31  ;;  %v4697_v27 = vmul.f32 0.625, %v9433_v10  ;;  %v4110_v11 = vpack.c.bf16 %v4108_v16, %v4107_v3  ;;  %v5387_v54 = vmul.f32 0.125, %v9433_v10  ;;  %v9440_v10 = vld [vmem:[#allocation52_spill] sm:$0xff] }
 0x22d   : > { %v5410_v34 = vadd.f32 %v9440_v10, %v7557_v15  ;;  %v9451_v10 = vld [vmem:[#allocation80_spill] sm:$0xff] }
 0x22e   : > { %3061 = vrot.lane.b32.xlu1 %v3055_v18, %s7047_s13  ;;  %6714 = vmatmul.mubr.msk.bf16.vlgmr.msra.gmra.mxu0 %vm667_vm7, %v1850_v17 }
 0x22f   : > { %6725 = vmatprep.mubr.msk.bf16.mxu0 %vm864_vm9, %v9424_v24  ;;  %6724 = vmatpush3.bf16.msra.mxu0 %v2108_v28  ;;  %v8123_v44 = vpop.permute.xlu0 %4460  ;;  %v4720_v28 = vadd.f32 %v9435_v25, %v7578_v50  ;;  %v7033_v24 = vld [vmem:[#allocation4 + $0x18] sm:$0xff]  ;;  %v9437_v50 = vld [vmem:[#allocation91_spill] sm:$0xff] }
 0x230   : > { %v8125_v63 = vpop.permute.xlu1 %3040  ;;  %6954 = vmatprep.subr.msk.bf16.mxu0 %vm795_vm2, %v2326_v29  ;;  %v4818_v57 = vmul.f32 0.75, %v7033_v24  ;;  %v9442_v29 = vld [vmem:[#allocation94_spill] sm:$0xff]  ;;  %v9443_v25 = vld [vmem:[#allocation93_spill] sm:$0xff] }
 0x232   : > { %3429 = vrot.lane.b32.xlu1 %v3423_v7, %s7048_s14  ;;  %6708 = vmatmul.mubr.msk.bf16.vlgmr.msra.gmra.mxu1 %vm864_vm9, %v9427_v62  ;;  %v5066_v7 = vadd.f32 %v8018_v40, %v7620_v26  ;;  %v4842_v36 = vadd.f32 %v9437_v50, %v4818_v57  ;;  %v9438_v40 = vld [vmem:[#allocation82_spill] sm:$0xff]  ;;  %v2320_v57 = vadd.f32 %v9409_v45, %v8016_v61  ;;  %v9448_v61 = vld [vmem:[#allocation76_spill] sm:$0xff] }
 0x233   : > { %v8134_v0 = vpop.permute.xlu0 %4827  ;;  %6718 = vmatpush3.bf16.msra.mxu1 %v1978_v35  ;;  %v4841_v16 = vadd.f32 %v9438_v40, %v7464_v56  ;;  %v1959_v35 = vadd.f32 %v8072_v23, %v7737_v20  ;;  %v8197_v20 = vld [vmem:[%s9235_s9] sm:$0x3]  ;;  %v9439_v23 = vld [vmem:[#allocation69_spill] sm:$0xff] }
 0x234   : > { %v8136_v12 = vpop.permute.xlu1 %3408  ;;  %6953 = vmatprep.subr.msk.bf16.mxu1 %vm941_vm6, %v8173_v53  ;;  %v5069_v31 = vpack.c.bf16 %v5066_v7, %v5065_v58  ;;  %v9447_v58 = vld [vmem:[#allocation89_spill] sm:$0xff] }
 0x235   : > { %v4844_v47 = vpack.c.bf16 %v4842_v36, %v4841_v16  ;;  %v1962_v56 = vpack.c.bf16 %v1959_v35, %v1958_v14  ;;  %v3849_v16 = vmul.f32 0.3125, %v9448_v61  ;;  %v9449_v35 = vld [vmem:[#allocation66_spill] sm:$0xff] }
 0x236   : > { %3765 = vrot.lane.b32.xlu1 %v3759_v52, %s7048_s14  ;;  %6726 = vmatmul.mubr.msk.bf16.vlgmr.msra.gmra.mxu0 %vm864_vm9, %v9432_v59 }
 0x237   : > { %v4711_v17 = vpop.permute.xlu0 %4710  ;;  %6736 = vmatpush3.bf16.msra.mxu0 %v2340_v32 }
 0x238   : > { %v8153_v18 = vpop.permute.xlu1 %3744  ;;  %v4721_v1 = vadd.f32 %v4711_v17, %v4697_v27  ;;  %v5413_v27 = vadd.f32 %v9439_v23, %v7413_v48  ;;  %6956 = vmatprep.subr.msk.bf16.mxu0 %vm941_vm6, %v8197_v20  ;;  %v5412_v17 = vadd.f32 %v9441_v19, %v7373_v39 }
 0x23a   : > { %4116 = vrot.lane.b32.xlu1 %v4110_v11, %s7049_s18  ;;  %v4724_v30 = vpack.c.bf16 %v4721_v1, %v4720_v28  ;;  %v9444_v28 = vpack.c.bf16 %v9442_v29, %v9443_v25  ;;  %v2321_v1 = vadd.f32 %v8094_v9, %v9410_v4  ;;  %v5415_v33 = vpack.c.bf16 %v5413_v27, %v5412_v17  ;;  %v9446_v9 = vld [vmem:[#allocation87_spill] sm:$0xff]  ;;  %v9452_v29 = vld [vmem:[#allocation84_spill] sm:$0xff] }
 0x23b   : > { %v5401_v5 = vpop.permute.xlu0 %5400  ;;  %v2682_v4 = vadd.f32 %v7403_v46, %v8028_v37  ;;  %v3050_v37 = vadd.f32 %v9409_v45, %v8047_v6  ;;  %v3852_v6 = vmul.f32 0.3125, %v9452_v29 }
 0x23c   : > { %v8168_v52 = vpop.permute.xlu1 %4095  ;;  %4729 = vrot.lane.b32.xlu0 %v4724_v30, %s7046_s29  ;;  %v5411_v59 = vadd.f32 %v5401_v5, %v5387_v54  ;;  %v2324_v7 = vpack.c.bf16 %v2321_v1, %v2320_v57  ;;  %v9445_v30 = vld [vmem:[#allocation68_spill] sm:$0xff]  ;;  %v9450_v54 = vld [vmem:[#allocation81_spill] sm:$0xff] }
 0x23d   : > { %v3419_v19 = vadd.f32 %v8136_v12, %v9445_v30  ;;  %v5729_v1 = vld [vmem:[#allocation3 + $0x10] sm:$0xff]  ;;  %v7034_v12 = vld [vmem:[#allocation4] sm:$0xff] }
 0x23e   : > { %4483 = vrot.lane.b32.xlu1 %v4477_v21, %s7049_s18  ;;  %v5414_v32 = vpack.c.bf16 %v5411_v59, %v5410_v34  ;;  %v2683_v21 = vadd.f32 %v9445_v30, %v8110_v43  ;;  %v3850_v43 = vmul.f32 0.3125, %v9450_v54  ;;  %v3851_v34 = vmul.f32 0.3125, %v9451_v10 }
 0x23f   : > { %v8185_v3 = vpop.permute.xlu0 %5174 }
 0x240   : > { %v8187_v2 = vpop.permute.xlu1 %4462  ;;  %5074 = vrot.lane.b32.xlu0 %v5069_v31, %s7046_s29  ;;  %v2686_v31 = vpack.c.bf16 %v2683_v21, %v2682_v4 }
 0x242   : > { %4850 = vrot.lane.b32.xlu1 %v4844_v47, %s7050_s23  ;;  %v3051_v47 = vadd.f32 %v8125_v63, %v9449_v35 }
 0x243   : > { %v8201_v11 = vpop.permute.xlu0 %5517 }
 0x244   : > { %v8203_v22 = vpop.permute.xlu1 %4829  ;;  %1967 = vrot.lane.b32.xlu0 %v1962_v56, %s7046_s29  ;;  %v3054_v63 = vpack.c.bf16 %v3051_v47, %v3050_v37  ;;  %v9454_v47 = vld [vmem:[#allocation75_spill] sm:$0xff]  ;;  %v4473_v37 = vadd.f32 %v8187_v2, %v9449_v35 }
 0x245   : > { %v4840_v2 = vadd.f32 %v8203_v22, %v9445_v30  ;;  %v4583_v22 = vmul.f32 0.0625, %v9448_v61 }
 0x246   : > { %5195 = vrot.lane.b32.xlu1 %v9444_v28, %s7050_s23 }
 0x247   : > { %v5522_v38 = vpop.permute.xlu0 %5521 }
 0x248   : > { %v8218_v24 = vpop.permute.xlu1 %5519  ;;  %5419 = vrot.lane.b32.xlu0 %v5414_v32, %s7046_s29  ;;  %v5531_v5 = vadd.f32 %v9446_v9, %v5522_v38  ;;  %v5730_v32 = vld [vmem:[#allocation3 + $0x18] sm:$0xff] }
 0x249   : > { %v5732_v4 = vpack.c.bf16 %v5730_v32, %v5729_v1  ;;  %v4218_v32 = vmul.f32 0.1875, %v9451_v10 }
 0x24a   : > { %5421 = vrot.lane.b32.xlu1 %v5415_v33, %s7046_s29  ;;  %v3418_v33 = vadd.f32 %v7403_v46, %v8070_v13 }
 0x24b   : > { %v3862_v50 = vpop.permute.xlu0 %3861 }
 0x24c   : > { %v5524_v36 = vpop.permute.xlu1 %5523  ;;  %2329 = vrot.lane.b32.xlu0 %v2324_v7, %s7046_s29  ;;  %v8237_v23 = vadd.f32 %v3862_v50, %v3849_v16  ;;  %s7051_s29 = smov 80   ;;  %v3730_v7 = vmul.f32 0.25, %v7034_v12  ;;  %v3422_v21 = vpack.c.bf16 %v3419_v19, %v3418_v33  ;;  %v3755_v50 = vadd.f32 %v8153_v18, %v9449_v35  ;;  %v9453_v16 = vld [vmem:[#allocation67_spill] sm:$0xff] }
 0x24d   : > { %v5532_v40 = vadd.f32 %v9447_v58, %v5524_v36  ;;  %v4106_v58 = vadd.f32 %v8168_v52, %v9445_v30  ;;  %v4217_v52 = vmul.f32 0.1875, %v9450_v54 }
 0x24e   : > { %v3754_v9 = vadd.f32 %v8092_v8, %v3730_v7  ;;  %v4216_v8 = vmul.f32 0.1875, %v9448_v61  ;;  %v4219_v7 = vmul.f32 0.1875, %v9452_v29 }
 0x24f   : > { %v5534_v14 = vpack.c.bf16 %v5532_v40, %v5531_v5  ;;  %v3866_v56 = vpop.permute.xlu0 %3865 }
 0x250   : > { %v3864_v59 = vpop.permute.xlu1 %3863  ;;  %2691 = vrot.lane.b32.xlu0 %v2686_v31, %s7047_s13  ;;  %v8253_v38 = vadd.f32 %v3866_v56, %v3851_v34  ;;  %v3758_v5 = vpack.c.bf16 %v3755_v50, %v3754_v9  ;;  %v4105_v31 = vadd.f32 %v9453_v16, %v8108_v60  ;;  %v4839_v50 = vadd.f32 %v8134_v0, %v9453_v16 }
 0x251   : > { %v8239_v27 = vadd.f32 %v3864_v59, %v3850_v43  ;;  %5540 = vrot.lane.b32.xlu1 %v5534_v14, %s7051_s29  ;;  %v9455_v43 = vld [vmem:[#allocation79_spill] sm:$0xff] }
 0x252   : > { %v4109_v59 = vpack.c.bf16 %v4106_v58, %v4105_v31  ;;  %v5185_v58 = vadd.f32 %v8185_v3, %v9449_v35  ;;  %v6679_v31 = vpop.f32.mrf.mxu0  ;;  %v4585_v3 = vmul.f32 0.0625, %v9451_v10  ;;  %v9458_v10 = vld [vmem:[#allocation19_spill] sm:$0xff] }
 0x253   : > { %v3877_v17 = vpack.c.bf16 %v8239_v27, %v8237_v23  ;;  %v8249_v25 = vpop.permute.xlu0 %5836 }
 0x254   : > { %v3868_v28 = vpop.permute.xlu1 %3867  ;;  %3059 = vrot.lane.b32.xlu0 %v3054_v63, %s7047_s13 }
 0x255   : > { %v8255_v57 = vadd.f32 %v3868_v28, %v3852_v6  ;;  %5647 = vrot.lane.b32.xlu1 %v9427_v62, %s7044_s20  ;;  %v9456_v6 = vld [vmem:[#allocation65_spill] sm:$0xff] }
 0x256   : > { %v4472_v60 = vadd.f32 %v8123_v44, %v9456_v6 }
 0x257   : > { %v3878_v36 = vpack.c.bf16 %v8255_v57, %v8253_v38  ;;  %v5839_v46 = vpop.permute.xlu0 %5838  ;;  %v4359_v38 = vld [vmem:[%s9235_s9] sm:$0x3] }
 0x258   : > { %v8264_v13 = vpop.permute.xlu1 %5834  ;;  %3427 = vrot.lane.b32.xlu0 %v3422_v21, %s7048_s14  ;;  %v5848_v14 = vadd.f32 %v5839_v46, %v9454_v47  ;;  %v4476_v33 = vpack.c.bf16 %v4473_v37, %v4472_v60  ;;  %v4478_v57 = vld [vmem:[%s9236_s10] sm:$0xf] }
 0x259   : > { %5738 = vrot.lane.b32.xlu1 %v5732_v4, %s7052_s27 }
 0x25b   : > { %v4229_v40 = vpop.permute.xlu0 %4228 }
 0x25c   : > { %v5841_v18 = vpop.permute.xlu1 %5840  ;;  %3763 = vrot.lane.b32.xlu0 %v3758_v5, %s7048_s14  ;;  %v8282_v28 = vadd.f32 %v4229_v40, %v4216_v8  ;;  %v8304_v5 = vpop.f32.mrf.mxu1  ;;  %v4843_v40 = vpack.c.bf16 %v4840_v2, %v4839_v50  ;;  %s7054_s14 = smov 16   ;;  %v5728_v2 = vld [vmem:[#allocation3 + $0x8] sm:$0xff] }
 0x25d   : > { %v5849_v56 = vadd.f32 %v5841_v18, %v9455_v43  ;;  %v4584_v18 = vmul.f32 0.0625, %v9450_v54  ;;  %v5530_v54 = vadd.f32 %v8218_v24, %v9445_v30  ;;  %v9459_v24 = vld [vmem:[#allocation18_spill] sm:$0xff] }
 0x25e   : > { %v1154_v8 = vpop.f32.mrf.mxu1  ;;  %v9460_v30 = vpack.c.bf16 %v9458_v10, %v9459_v24 }
 0x25f   : > { %v5851_v34 = vpack.c.bf16 %v5849_v56, %v5848_v14  ;;  %v4233_v63 = vpop.permute.xlu0 %4232  ;;  %v9457_v14 = vld [vmem:[#allocation54_spill] sm:$0xff] }
 0x260   : > { %v4231_v19 = vpop.permute.xlu1 %4230  ;;  %4114 = vrot.lane.b32.xlu0 %v4109_v59, %s7049_s18  ;;  %v8296_v46 = vadd.f32 %v4233_v63, %v4218_v32  ;;  %v5184_v43 = vadd.f32 %v9457_v14, %v9409_v45  ;;  %v4586_v45 = vmul.f32 0.0625, %v9452_v29  ;;  %v5529_v63 = vadd.f32 %v8201_v11, %v9453_v16  ;;  %v6674_v32 = vpop.f32.mrf.mxu1  ;;  %v5727_v16 = vld [vmem:[#allocation3] sm:$0xff] }
 0x261   : > { %v8284_v1 = vadd.f32 %v4231_v19, %v4217_v52  ;;  %5857 = vrot.lane.b32.xlu1 %v5851_v34, %s7051_s29  ;;  %v1239_v34 = vpop.f32.mrf.mxu0 }
 0x262   : > { %v5188_v59 = vpack.c.bf16 %v5185_v58, %v5184_v43  ;;  %v5533_v60 = vpack.c.bf16 %v5530_v54, %v5529_v63 }
 0x263   : > { %v4244_v12 = vpack.c.bf16 %v8284_v1, %v8282_v28  ;;  %v4596_v44 = vpop.permute.xlu0 %4595 }
 0x264   : > { %v4235_v21 = vpop.permute.xlu1 %4234  ;;  %4481 = vrot.lane.b32.xlu0 %v4476_v33, %s7049_s18  ;;  %v8313_v56 = vadd.f32 %v4596_v44, %v4583_v22  ;;  %v6680_v33 = vpop.f32.mrf.mxu0  ;;  %v5731_v44 = vpack.c.bf16 %v5728_v2, %v5727_v16  ;;  %v5847_v22 = vadd.f32 %v8249_v25, %v9449_v35  ;;  %v6135_v25 = vld [vmem:[#allocation4] sm:$0xff]  ;;  %v2221_v2 = vsel %vm941_vm6, %v8173_v53, 0 }
 0x265   : > { %v8298_v9 = vadd.f32 %v4235_v21, %v4219_v7  ;;  %5964 = vrot.lane.b32.xlu1 %v9427_v62, %s7044_s20  ;;  %v5846_v7 = vadd.f32 %v8264_v13, %v9456_v6  ;;  %v1157_v21 = vpop.f32.mrf.mxu1  ;;  %v6136_v6 = vld [vmem:[#allocation4 + $0x8] sm:$0xff]  ;;  %v9464_v53 = vld [vmem:[#allocation98_spill] sm:$0xff] }
 0x266   : > { %v1242_v11 = vpop.f32.mrf.mxu0 }
 0x267   : > { %v4245_v0 = vpack.c.bf16 %v8298_v9, %v8296_v46  ;;  %v4600_v61 = vpop.permute.xlu0 %4599  ;;  %v5850_v58 = vpack.c.bf16 %v5847_v22, %v5846_v7  ;;  %v2570_v22 = vadd.f32 %v9464_v53, %v7609_v55  ;;  %v9467_v55 = vld [vmem:[#allocation41_spill] sm:$0xff]  ;;  %v9472_v53 = vld [vmem:[#allocation31_spill] sm:$0xff]  ;;  %v4726_v46 = vld [vmem:[%s9235_s9] sm:$0x3] }
 0x268   : > { %v4598_v47 = vpop.permute.xlu1 %4597  ;;  %4848 = vrot.lane.b32.xlu0 %v4843_v40, %s7050_s23  ;;  %v8327_v19 = vadd.f32 %v4600_v61, %v4585_v3  ;;  %v6691_v50 = vpop.f32.mrf.mxu0 }
 0x269   : > { %v8315_v62 = vadd.f32 %v4598_v47, %v4584_v18  ;;  %6055 = vrot.lane.b32.xlu1 %v5732_v4, %s7052_s27  ;;  %v6139_v47 = vpack.c.bf16 %v6136_v6, %v6135_v25 }
 0x26a   : > { %v1454_v40 = vpop.f32.mrf.mxu0 }
 0x26b   : > { %v4611_v37 = vpack.c.bf16 %v8315_v62, %v8313_v56  ;;  %v8360_v43 = vpop.permute.xlu0 %4955 }
 0x26c   : > { %v4602_v52 = vpop.permute.xlu1 %4601  ;;  %5193 = vrot.lane.b32.xlu0 %v5188_v59, %s7050_s23  ;;  %v6692_v18 = vpop.f32.mrf.mxu0  ;;  %s7057_s23 = smov 64  }
 0x26d   : > { %v8329_v4 = vadd.f32 %v4602_v52, %v4586_v45  ;;  %6146 = vrot.lane.b32.xlu1 %v9460_v30, %s7053_s30 }
 0x26e   : > { %v1457_v35 = vpop.f32.mrf.mxu0 }
 0x26f   : > { %v4612_v29 = vpack.c.bf16 %v8329_v4, %v8327_v19  ;;  %v8367_v3 = vpop.permute.xlu0 %5300  ;;  %v5190_v19 = vld [vmem:[%s9236_s10] sm:$0xf] }
 0x270   : > { %5538 = vrot.lane.b32.xlu0 %v5533_v60, %s7051_s29  ;;  %v8354_v13 = vpop.permute.xlu1 %4957  ;;  %v9461_v60 = vld [vmem:[#allocation96_spill] sm:$0xff] }
 0x271   : > { %1179 = vrot.lane.b32.xlu1 %v6674_v32, %s7054_s14  ;;  %v2208_v32 = vadd.f32 %v9461_v60, %v7620_v26  ;;  %v9463_v26 = vld [vmem:[#allocation58_spill] sm:$0xff] }
 0x274   : > { %5645 = vrot.lane.b32.xlu0 %v9419_v51, %s7044_s20  ;;  %v8358_v14 = vpop.permute.xlu1 %5302 }
 0x275   : > { %1264 = vrot.lane.b32.xlu1 %v6680_v33, %s7054_s14  ;;  %v9462_v33 = vld [vmem:[#allocation90_spill] sm:$0xff] }
 0x278   : > { %5736 = vrot.lane.b32.xlu0 %v5731_v44, %s7052_s27 }
 0x279   : > { %1175 = vrot.lane.b32.xlu1 %v1157_v21, %s7054_s14  ;;  %v2462_v21 = vld [vmem:[%s9234_s8] sm:$0x1] }
 0x27b   : > { %v8370_v61 = vpop.permute.xlu0 %2940 }
 0x27c   : > { %5855 = vrot.lane.b32.xlu0 %v5850_v58, %s7051_s29  ;;  %v9465_v58 = vld [vmem:[#allocation51_spill] sm:$0xff] }
 0x27d   : > { %1260 = vrot.lane.b32.xlu1 %v1242_v11, %s7054_s14  ;;  %v2207_v11 = vadd.f32 %v7386_v42, %v9462_v33  ;;  %v2210_v42 = vadd.f32 %v9463_v26, %v7420_v49  ;;  %v2470_v49 = vsel %vm871_vm5, %v2462_v21, 0  ;;  %v9468_v33 = vld [vmem:[#allocation40_spill] sm:$0xff] }
 0x27f   : > { %v8375_v54 = vpop.permute.xlu0 %3308  ;;  %v2211_v7 = vpack.c.bf16 %v2208_v32, %v2207_v11  ;;  %v2583_v32 = vsel %vm941_vm6, %v8197_v20, 0  ;;  %v9469_v11 = vpack.c.bf16 %v9467_v55, %v9468_v33  ;;  %v9470_v20 = vld [vmem:[#allocation59_spill] sm:$0xff]  ;;  %v3305_v55 = vld [vmem:[%s9235_s9] sm:$0x3] }
 0x280   : > { %5962 = vrot.lane.b32.xlu0 %v9419_v51, %s7044_s20  ;;  %v8365_v51 = vpop.permute.xlu1 %2942  ;;  %v9481_v33 = vld [vmem:[#allocation46_spill] sm:$0xff] }
 0x281   : > { %1479 = vrot.lane.b32.xlu1 %v6692_v18, %s7055_s28  ;;  %v9466_v18 = vld [vmem:[#allocation92_spill] sm:$0xff] }
 0x284   : > { %6053 = vrot.lane.b32.xlu0 %v5731_v44, %s7052_s27  ;;  %v8372_v59 = vpop.permute.xlu1 %3310 }
 0x285   : > { %1475 = vrot.lane.b32.xlu1 %v1457_v35, %s7055_s28  ;;  %v2569_v35 = vadd.f32 %v9466_v18, %v7557_v15  ;;  %v2824_v15 = vld [vmem:[%s9234_s8] sm:$0x1]  ;;  %v9476_v18 = vld [vmem:[#allocation43_spill] sm:$0xff] }
 0x286   : > { %v2832_v26 = vsel %vm871_vm5, %v2824_v15, 0 }
 0x288   : > { %6144 = vrot.lane.b32.xlu0 %v6139_v47, %s7053_s30  ;;  %v8378_v45 = vpop.permute.xlu1 %3662  ;;  %v2573_v47 = vpack.c.bf16 %v2570_v22, %v2569_v35  ;;  %v9473_v22 = vld [vmem:[#allocation30_spill] sm:$0xff] }
 0x28c   : > { %1177 = vrot.lane.b32.xlu0 %v8304_v5, %s7054_s14  ;;  %v8381_v5 = vpop.permute.xlu0 %3660  ;;  %v8383_v52 = vpop.permute.xlu1 %3997 }
 0x290   : > { %1262 = vrot.lane.b32.xlu0 %v6679_v31, %s7054_s14  ;;  %v8386_v31 = vpop.permute.xlu0 %3995  ;;  %v8388_v63 = vpop.permute.xlu1 %4364 }
 0x294   : > { %1173 = vrot.lane.b32.xlu0 %v1154_v8, %s7054_s14  ;;  %v8390_v10 = vpop.permute.xlu0 %4362  ;;  %v8392_v8 = vpop.permute.xlu1 %4731 }
 0x298   : > { %1258 = vrot.lane.b32.xlu0 %v1239_v34, %s7054_s14  ;;  %v8396_v34 = vpop.permute.xlu1 %5076 }
 0x29c   : > { %1477 = vrot.lane.b32.xlu0 %v6691_v50, %s7055_s28  ;;  %v1970_v44 = vpop.permute.xlu1 %1969 }
 0x2a0   : > { %1473 = vrot.lane.b32.xlu0 %v1454_v40, %s7055_s28  ;;  %v2209_v40 = vadd.f32 %v9465_v58, %v7383_v41  ;;  %v2332_v60 = vpop.permute.xlu1 %2331  ;;  %v2688_v41 = vld [vmem:[%s9236_s10] sm:$0xf]  ;;  %v9474_v58 = vpack.c.bf16 %v9472_v53, %v9473_v22  ;;  %v9485_v22 = vld [vmem:[#allocation36_spill] sm:$0xff] }
 0x2a1   : > { %v3560_v53 = vld [vmem:[%s9234_s8] sm:$0x1] }
 0x2a2   : > { %v2212_v25 = vpack.c.bf16 %v2210_v42, %v2209_v40  ;;  %v9475_v40 = vld [vmem:[#allocation44_spill] sm:$0xff] }
 0x2a3   : > { %v9477_v35 = vpack.c.bf16 %v9475_v40, %v9476_v18  ;;  %v9489_v18 = vld [vmem:[#allocation32_spill] sm:$0xff] }
 0x2ae   : > { %v8394_v24 = vpop.permute.xlu0 %4729 }
 0x2b2   : > { %v8398_v30 = vpop.permute.xlu0 %5074 }
 0x2b6   : > { %v1968_v16 = vpop.permute.xlu0 %1967 }
 0x2b7   : > { %6719 = vmatprep.mubr.msk.bf16.mxu1 %vm1005_vm10, %v1968_v16  ;;  %v2572_v16 = vadd.f32 %v9470_v20, %v7413_v48  ;;  %v2937_v48 = vld [vmem:[%s9235_s9] sm:$0x3] }
 0x2b8   : > { %6720 = vmatmul.mubr.msk.bf16.vlgmr.msra.gmra.mxu1 %vm1005_vm10, %v1970_v44 }
 0x2b9   : > { %6731 = vmatprep.mubr.msk.bf16.mxu1 %vm667_vm7, %v2211_v7  ;;  %6730 = vmatpush3.bf16.msra.mxu1 %v2221_v2  ;;  %v9471_v2 = vld [vmem:[#allocation53_spill] sm:$0xff] }
 0x2ba   : > { %v8414_v50 = vpop.permute.xlu0 %5419  ;;  %6955 = vmatprep.subr.msk.bf16.mxu1 %vm871_vm5, %v2462_v21  ;;  %v2571_v7 = vadd.f32 %v9471_v2, %v7373_v39  ;;  %v2702_v21 = vsel %vm795_vm2, %v2688_v41, 0  ;;  %v3056_v39 = vld [vmem:[%s9236_s10] sm:$0xf]  ;;  %v9484_v2 = vld [vmem:[#allocation21_spill] sm:$0xff] }
 0x2bc   : > { %v2574_v44 = vpack.c.bf16 %v2572_v16, %v2571_v7  ;;  %v9483_v16 = vld [vmem:[#allocation42_spill] sm:$0xff] }
 0x2bd   : > { %v3186_v7 = vadd.f32 %v9484_v2, %v9483_v16  ;;  %v9494_v16 = vld [vmem:[#allocation37_spill] sm:$0xff] }
 0x2be   : > { %v2330_v6 = vpop.permute.xlu0 %2329 }
 0x2bf   : > { %6737 = vmatprep.mubr.msk.bf16.mxu0 %vm1005_vm10, %v2330_v6  ;;  %v2951_v6 = vsel %vm941_vm6, %v2937_v48, 0 }
 0x2c0   : > { %6732 = vmatmul.mubr.msk.bf16.vlgmr.msra.gmra.mxu1 %vm667_vm7, %v2212_v25  ;;  %6738 = vmatmul.mubr.msk.bf16.vlgmr.msra.gmra.mxu0 %vm1005_vm10, %v2332_v60  ;;  %v2694_v25 = vpop.permute.xlu1 %2693 }
 0x2c1   : > { %6743 = vmatprep.mubr.msk.bf16.mxu1 %vm864_vm9, %v9469_v11  ;;  %6749 = vmatprep.mubr.msk.bf16.mxu0 %vm667_vm7, %v2573_v47  ;;  %v3070_v47 = vsel %vm795_vm2, %v3056_v39, 0  ;;  %v9482_v11 = vld [vmem:[#allocation23_spill] sm:$0xff] }
 0x2c2   : > { %6742 = vmatpush3.bf16.msra.mxu1 %v2470_v49  ;;  %6748 = vmatpush3.bf16.msra.mxu0 %v2583_v32  ;;  %v2692_v42 = vpop.permute.xlu0 %2691  ;;  %v9478_v49 = vld [vmem:[#allocation34_spill] sm:$0xff]  ;;  %v9479_v32 = vld [vmem:[#allocation33_spill] sm:$0xff]  ;;  %v3187_v20 = vadd.f32 %v9482_v11, %v9481_v33 }
 0x2c3   : > { %6957 = vmatprep.subr.msk.bf16.mxu1 %vm795_vm2, %v2688_v41  ;;  %6958 = vmatprep.subr.msk.bf16.mxu0 %vm871_vm5, %v2824_v15  ;;  %v9480_v41 = vpack.c.bf16 %v9478_v49, %v9479_v32  ;;  %v3192_v15 = vld [vmem:[%s9234_s8] sm:$0x1] }
 0x2c4   : > { %v3760_v11 = vld [vmem:[%s9236_s10] sm:$0xf] }
 0x2c6   : > { %v3060_v60 = vpop.permute.xlu0 %3059 }
 0x2c8   : > { %6744 = vmatmul.mubr.msk.bf16.vlgmr.msra.gmra.mxu1 %vm864_vm9, %v9474_v58  ;;  %6750 = vmatmul.mubr.msk.bf16.vlgmr.msra.gmra.mxu0 %vm667_vm7, %v2574_v44  ;;  %v3190_v44 = vpack.c.bf16 %v3187_v20, %v3186_v7  ;;  %v9486_v58 = vld [vmem:[#allocation17_spill] sm:$0xff]  ;;  %v9493_v20 = vld [vmem:[#allocation16_spill] sm:$0xff]  ;;  %v9495_v7 = vld [vmem:[#allocation14_spill] sm:$0xff] }
 0x2c9   : > { %6755 = vmatprep.mubr.msk.bf16.mxu1 %vm1005_vm10, %v2692_v42  ;;  %6761 = vmatprep.mubr.msk.bf16.mxu0 %vm864_vm9, %v9477_v35  ;;  %v3424_v42 = vld [vmem:[%s9236_s10] sm:$0xf]  ;;  %v9490_v35 = vld [vmem:[#allocation15_spill] sm:$0xff]  ;;  %v3557_v2 = vadd.f32 %v9494_v16, %v9493_v20  ;;  %v4492_v16 = vsel %vm795_vm2, %v4478_v57, 0 }
 0x2ca   : > { %6754 = vmatpush3.bf16.msra.mxu1 %v2702_v21  ;;  %6760 = vmatpush3.bf16.msra.mxu0 %v2832_v26  ;;  %v3062_v21 = vpop.permute.xlu1 %3061  ;;  %v3200_v26 = vsel %vm871_vm5, %v3192_v15, 0  ;;  %v3438_v32 = vsel %vm795_vm2, %v3424_v42, 0 }
 0x2cb   : > { %6959 = vmatprep.subr.msk.bf16.mxu1 %vm941_vm6, %v2937_v48  ;;  %6960 = vmatprep.subr.msk.bf16.mxu0 %vm795_vm2, %v3056_v39  ;;  %v3189_v48 = vadd.f32 %v9486_v58, %v9485_v22  ;;  %v9488_v39 = vld [vmem:[#allocation48_spill] sm:$0xff] }
 0x2d0   : > { %6756 = vmatmul.mubr.msk.bf16.vlgmr.msra.gmra.mxu1 %vm1005_vm10, %v2694_v25  ;;  %6762 = vmatmul.mubr.msk.bf16.vlgmr.msra.gmra.mxu0 %vm864_vm9, %v9480_v41  ;;  %v3188_v25 = vadd.f32 %v9490_v35, %v9489_v18  ;;  %v3428_v41 = vpop.permute.xlu0 %3427  ;;  %v3879_v18 = vld [vmem:[%s9234_s8] sm:$0x1] }
 0x2d1   : > { %6767 = vmatprep.mubr.msk.bf16.mxu1 %vm667_vm7, %v8370_v61  ;;  %6773 = vmatprep.mubr.msk.bf16.mxu0 %vm1005_vm10, %v3060_v60  ;;  %v3319_v61 = vsel %vm941_vm6, %v3305_v55, 0  ;;  %v3992_v35 = vld [vmem:[%s9235_s9] sm:$0x3] }
 0x2d2   : > { %6766 = vmatpush3.bf16.msra.mxu1 %v2951_v6  ;;  %6772 = vmatpush3.bf16.msra.mxu0 %v3070_v47  ;;  %v9491_v6 = vld [vmem:[#allocation20_spill] sm:$0xff]  ;;  %v9492_v47 = vld [vmem:[#allocation45_spill] sm:$0xff]  ;;  %v3191_v49 = vpack.c.bf16 %v3189_v48, %v3188_v25 }
 0x2d3   : > { %6961 = vmatprep.subr.msk.bf16.mxu1 %vm871_vm5, %v3192_v15  ;;  %6962 = vmatprep.subr.msk.bf16.mxu0 %vm941_vm6, %v3305_v55  ;;  %v3554_v60 = vadd.f32 %v9492_v47, %v9491_v6  ;;  %v3568_v15 = vsel %vm871_vm5, %v3560_v53, 0  ;;  %v3657_v55 = vld [vmem:[%s9235_s9] sm:$0x3] }
 0x2d4   : > { %v3764_v58 = vpop.permute.xlu0 %3763  ;;  %v3671_v48 = vsel %vm941_vm6, %v3657_v55, 0 }
 0x2d8   : > { %6768 = vmatmul.mubr.msk.bf16.vlgmr.msra.gmra.mxu1 %vm667_vm7, %v8365_v51  ;;  %6774 = vmatmul.mubr.msk.bf16.vlgmr.msra.gmra.mxu0 %vm1005_vm10, %v3062_v21  ;;  %v9487_v51 = vld [vmem:[#allocation22_spill] sm:$0xff]  ;;  %v4115_v47 = vpop.permute.xlu0 %4114 }
 0x2d9   : > { %6779 = vmatprep.mubr.msk.bf16.mxu1 %vm864_vm9, %v3190_v44  ;;  %6785 = vmatprep.mubr.msk.bf16.mxu0 %vm667_vm7, %v8375_v54  ;;  %v3555_v40 = vadd.f32 %v9488_v39, %v9487_v51  ;;  %v9496_v44 = vld [vmem:[#allocation35_spill] sm:$0xff]  ;;  %v3774_v51 = vsel %vm795_vm2, %v3760_v11, 0 }
 0x2da   : > { %6778 = vmatpush3.bf16.msra.mxu1 %v3200_v26  ;;  %6784 = vmatpush3.bf16.msra.mxu0 %v3319_v61  ;;  %v3556_v21 = vadd.f32 %v9496_v44, %v9495_v7  ;;  %v4613_v7 = vld [vmem:[%s9234_s8] sm:$0x1] }
 0x2db   : > { %6963 = vmatprep.subr.msk.bf16.mxu1 %vm795_vm2, %v3424_v42  ;;  %6964 = vmatprep.subr.msk.bf16.mxu0 %vm871_vm5, %v3560_v53  ;;  %v3558_v54 = vpack.c.bf16 %v3555_v40, %v3554_v60  ;;  %v3430_v53 = vpop.permute.xlu1 %3429  ;;  %v3887_v60 = vsel %vm871_vm5, %v3879_v18, 0 }
 0x2dc   : > { %v3559_v42 = vpack.c.bf16 %v3557_v2, %v3556_v21 }
 0x2df   : > { %v3766_v25 = vpop.permute.xlu1 %3765 }
 0x2e0   : > { %6780 = vmatmul.mubr.msk.bf16.vlgmr.msra.gmra.mxu1 %vm864_vm9, %v3191_v49  ;;  %6786 = vmatmul.mubr.msk.bf16.vlgmr.msra.gmra.mxu0 %vm667_vm7, %v8372_v59  ;;  %v4006_v49 = vsel %vm941_vm6, %v3992_v35, 0 }
 0x2e1   : > { %6791 = vmatprep.mubr.msk.bf16.mxu1 %vm1005_vm10, %v3428_v41  ;;  %6797 = vmatprep.mubr.msk.bf16.mxu0 %vm864_vm9, %v3558_v54  ;;  %v4246_v41 = vld [vmem:[%s9234_s8] sm:$0x1] }
 0x2e2   : > { %v6685_v33 = vpop.f32.mrf.mxu1  ;;  %6790 = vmatpush3.bf16.msra.mxu1 %v3438_v32  ;;  %6796 = vmatpush3.bf16.msra.mxu0 %v3568_v15 }
 0x2e3   : > { %1375 = vrot.lane.b32.xlu0 %v6685_v33, %s7054_s14  ;;  %6965 = vmatprep.subr.msk.bf16.mxu1 %vm941_vm6, %v3657_v55  ;;  %v4117_v15 = vpop.permute.xlu1 %4116  ;;  %v4254_v33 = vsel %vm871_vm5, %v4246_v41, 0 }
 0x2e4   : > { %v1352_v59 = vpop.f32.mrf.mxu1  ;;  %6966 = vmatprep.subr.msk.bf16.mxu0 %vm795_vm2, %v3760_v11 }
 0x2e6   : > { %v6686_v26 = vpop.f32.mrf.mxu1  ;;  %v6703_v61 = vpop.f32.mrf.mxu0 }
 0x2e7   : > { %1377 = vrot.lane.b32.xlu1 %v6686_v26, %s7054_s14  ;;  %1703 = vrot.lane.b32.xlu0 %v6703_v61, %s7055_s28  ;;  %v4621_v26 = vsel %vm871_vm5, %v4613_v7, 0  ;;  %v4740_v61 = vsel %vm941_vm6, %v4726_v46, 0 }
 0x2e8   : > { %v1680_v22 = vpop.f32.mrf.mxu0  ;;  %6792 = vmatmul.mubr.msk.bf16.vlgmr.msra.gmra.mxu1 %vm1005_vm10, %v3430_v53  ;;  %6798 = vmatmul.mubr.msk.bf16.vlgmr.msra.gmra.mxu0 %vm864_vm9, %v3559_v42  ;;  %v1355_v39 = vpop.f32.mrf.mxu1  ;;  %v4845_v53 = vld [vmem:[%s9236_s10] sm:$0xf] }
 0x2e9   : > { %6803 = vmatprep.mubr.msk.bf16.mxu1 %vm667_vm7, %v8381_v5  ;;  %6809 = vmatprep.mubr.msk.bf16.mxu0 %vm1005_vm10, %v3764_v58 }
 0x2ea   : > { %v6704_v40 = vpop.f32.mrf.mxu0  ;;  %6802 = vmatpush3.bf16.msra.mxu1 %v3671_v48  ;;  %6808 = vmatpush3.bf16.msra.mxu0 %v3774_v51  ;;  %v6697_v5 = vpop.f32.mrf.mxu1  ;;  %v5071_v48 = vld [vmem:[%s9235_s9] sm:$0x3] }
 0x2eb   : > { %1371 = vrot.lane.b32.xlu0 %v1352_v59, %s7054_s14  ;;  %1705 = vrot.lane.b32.xlu1 %v6704_v40, %s7055_s28  ;;  %v5416_v40 = vld [vmem:[%s9235_s9] sm:$0x3] }
 0x2ec   : > { %6967 = vmatprep.subr.msk.bf16.mxu1 %vm871_vm5, %v3879_v18  ;;  %6968 = vmatprep.subr.msk.bf16.mxu0 %vm941_vm6, %v3992_v35  ;;  %v1683_v6 = vpop.f32.mrf.mxu0  ;;  %v1567_v54 = vpop.f32.mrf.mxu1 }
 0x2ee   : > { %v6715_v32 = vpop.f32.mrf.mxu0  ;;  %v6698_v23 = vpop.f32.mrf.mxu1 }
 0x2ef   : > { %1699 = vrot.lane.b32.xlu0 %v1680_v22, %s7055_s28  ;;  %1373 = vrot.lane.b32.xlu1 %v1355_v39, %s7054_s14  ;;  %v5204_v39 = vsel %vm795_vm2, %v5190_v19, 0 }
 0x2f0   : > { %6804 = vmatmul.mubr.msk.bf16.vlgmr.msra.gmra.mxu1 %vm667_vm7, %v8378_v45  ;;  %6810 = vmatmul.mubr.msk.bf16.vlgmr.msra.gmra.mxu0 %vm1005_vm10, %v3766_v25  ;;  %v4111_v45 = vld [vmem:[%s9236_s10] sm:$0xf]  ;;  %v1895_v27 = vpop.f32.mrf.mxu0  ;;  %v1570_v11 = vpop.f32.mrf.mxu1 }
 0x2f1   : > { %6815 = vmatprep.mubr.msk.bf16.mxu1 %vm864_vm9, %v3877_v17  ;;  %6821 = vmatprep.mubr.msk.bf16.mxu0 %vm667_vm7, %v8386_v31  ;;  %v4482_v17 = vpop.permute.xlu0 %4481  ;;  %v4484_v31 = vpop.permute.xlu1 %4483  ;;  %v4125_v55 = vsel %vm795_vm2, %v4111_v45, 0 }
 0x2f2   : > { %6814 = vmatpush3.bf16.msra.mxu1 %v3887_v60  ;;  %6820 = vmatpush3.bf16.msra.mxu0 %v4006_v49  ;;  %v6716_v20 = vpop.f32.mrf.mxu0  ;;  %v6709_v28 = vpop.f32.mrf.mxu1 }
 0x2f3   : > { %1590 = vrot.lane.b32.xlu0 %v6697_v5, %s7055_s28  ;;  %1701 = vrot.lane.b32.xlu1 %v1683_v6, %s7055_s28  ;;  %v5430_v5 = vsel %vm941_vm6, %v5416_v40, 0 }
 0x2f4   : > { %6969 = vmatprep.subr.msk.bf16.mxu1 %vm795_vm2, %v4111_v45  ;;  %6970 = vmatprep.subr.msk.bf16.mxu0 %vm871_vm5, %v4246_v41  ;;  %v1898_v1 = vpop.f32.mrf.mxu0  ;;  %v1782_v2 = vpop.f32.mrf.mxu1 }
 0x2f6   : > { %v6727_v59 = vpop.f32.mrf.mxu0 }
 0x2f7   : > { %1592 = vrot.lane.b32.xlu1 %v6698_v23, %s7055_s28  ;;  %1918 = vrot.lane.b32.xlu0 %v6715_v32, %s7056_s26  ;;  %v5959_v23 = vld [vmem:[%s9234_s8] sm:$0x1] }
 0x2f8   : > { %6816 = vmatmul.mubr.msk.bf16.vlgmr.msra.gmra.mxu1 %vm864_vm9, %v3878_v36  ;;  %6822 = vmatmul.mubr.msk.bf16.vlgmr.msra.gmra.mxu0 %vm667_vm7, %v8383_v52  ;;  %v4849_v36 = vpop.permute.xlu0 %4848  ;;  %v4373_v52 = vsel %vm941_vm6, %v4359_v38, 0  ;;  %v2144_v44 = vpop.f32.mrf.mxu0 }
 0x2f9   : > { %6827 = vmatprep.mubr.msk.bf16.mxu1 %vm1005_vm10, %v4115_v47  ;;  %6833 = vmatprep.mubr.msk.bf16.mxu0 %vm864_vm9, %v4244_v12  ;;  %v8599_v12 = vpop.permute.xlu1 %4850  ;;  %v5642_v47 = vld [vmem:[%s9234_s8] sm:$0x1] }
 0x2fa   : > { %6826 = vmatpush3.bf16.msra.mxu1 %v4125_v55  ;;  %6832 = vmatpush3.bf16.msra.mxu0 %v4254_v33  ;;  %v6728_v42 = vpop.f32.mrf.mxu0  ;;  %v5973_v55 = vsel %vm871_vm5, %v5959_v23, 0 }
 0x2fb   : > { %1586 = vrot.lane.b32.xlu0 %v1567_v54, %s7055_s28  ;;  %1920 = vrot.lane.b32.xlu1 %v6716_v20, %s7056_s26  ;;  %v5656_v54 = vsel %vm871_vm5, %v5642_v47, 0  ;;  %v6141_v20 = vld [vmem:[%s9236_s10] sm:$0xf] }
 0x2fc   : > { %6971 = vmatprep.subr.msk.bf16.mxu1 %vm941_vm6, %v4359_v38  ;;  %6972 = vmatprep.subr.msk.bf16.mxu0 %vm795_vm2, %v4478_v57  ;;  %v5194_v9 = vpop.permute.xlu0 %5193  ;;  %v2147_v51 = vpop.f32.mrf.mxu0 }
 0x2ff   : > { %1914 = vrot.lane.b32.xlu0 %v1895_v27, %s7056_s26  ;;  %1588 = vrot.lane.b32.xlu1 %v1570_v11, %s7055_s28  ;;  %v6050_v27 = vld [vmem:[%s9235_s9] sm:$0x3] }
 0x300   : > { %6828 = vmatmul.mubr.msk.bf16.vlgmr.msra.gmra.mxu1 %vm1005_vm10, %v4117_v15  ;;  %6834 = vmatmul.mubr.msk.bf16.vlgmr.msra.gmra.mxu0 %vm864_vm9, %v4245_v0  ;;  %v8621_v0 = vpop.permute.xlu1 %5195  ;;  %v8627_v21 = vpop.permute.xlu0 %5538  ;;  %v6064_v33 = vsel %vm941_vm6, %v6050_v27, 0 }
 0x301   : > { %6839 = vmatprep.mubr.msk.bf16.mxu1 %vm667_vm7, %v8390_v10  ;;  %6845 = vmatprep.mubr.msk.bf16.mxu0 %vm1005_vm10, %v4482_v17  ;;  %v6710_v10 = vpop.f32.mrf.mxu1 }
 0x302   : > { %6838 = vmatpush3.bf16.msra.mxu1 %v4373_v52  ;;  %6844 = vmatpush3.bf16.msra.mxu0 %v4492_v16 }
 0x303   : > { %1805 = vrot.lane.b32.xlu0 %v6709_v28, %s7056_s26  ;;  %1916 = vrot.lane.b32.xlu1 %v1898_v1, %s7056_s26  ;;  %v1785_v56 = vpop.f32.mrf.mxu1 }
 0x304   : > { %6973 = vmatprep.subr.msk.bf16.mxu1 %vm871_vm5, %v4613_v7  ;;  %6974 = vmatprep.subr.msk.bf16.mxu0 %vm941_vm6, %v4726_v46  ;;  %v5422_v22 = vpop.permute.xlu1 %5421 }
 0x307   : > { %1807 = vrot.lane.b32.xlu1 %v6710_v10, %s7056_s26  ;;  %2167 = vrot.lane.b32.xlu0 %v6727_v59, %s7057_s23  ;;  %v9497_v59 = vld [vmem:[#allocation10_spill] sm:$0xff]  ;;  %v9498_v10 = vld [vmem:[#allocation12_spill] sm:$0xff] }
 0x308   : > { %6840 = vmatmul.mubr.msk.bf16.vlgmr.msra.gmra.mxu1 %vm667_vm7, %v8388_v63  ;;  %6846 = vmatmul.mubr.msk.bf16.vlgmr.msra.gmra.mxu0 %vm1005_vm10, %v4484_v31  ;;  %v4952_v63 = vld [vmem:[%s9234_s8] sm:$0x1]  ;;  %v8650_v62 = vpop.permute.xlu1 %5540 }
 0x309   : > { %6851 = vmatprep.mubr.msk.bf16.mxu1 %vm864_vm9, %v4611_v37  ;;  %6857 = vmatprep.mubr.msk.bf16.mxu0 %vm667_vm7, %v8394_v24  ;;  %v5646_v37 = vpop.permute.xlu0 %5645  ;;  %v4859_v24 = vsel %vm795_vm2, %v4845_v53, 0  ;;  %v4966_v58 = vsel %vm871_vm5, %v4952_v63, 0 }
 0x30a   : > { %6850 = vmatpush3.bf16.msra.mxu1 %v4621_v26  ;;  %6856 = vmatpush3.bf16.msra.mxu0 %v4740_v61  ;;  %v9499_v61 = vld [vmem:[#allocation25_spill] sm:$0xff] }
 0x30b   : > { %1801 = vrot.lane.b32.xlu0 %v1782_v2, %s7056_s26  ;;  %2169 = vrot.lane.b32.xlu1 %v6728_v42, %s7057_s23 }
 0x30c   : > { %6975 = vmatprep.subr.msk.bf16.mxu1 %vm795_vm2, %v4845_v53  ;;  %6976 = vmatprep.subr.msk.bf16.mxu0 %vm871_vm5, %v4952_v63  ;;  %v5648_v4 = vpop.permute.xlu1 %5647 }
 0x30f   : > { %2163 = vrot.lane.b32.xlu0 %v2144_v44, %s7057_s23  ;;  %1803 = vrot.lane.b32.xlu1 %v1785_v56, %s7056_s26 }
 0x310   : > { %6852 = vmatmul.mubr.msk.bf16.vlgmr.msra.gmra.mxu1 %vm864_vm9, %v4612_v29  ;;  %6858 = vmatmul.mubr.msk.bf16.vlgmr.msra.gmra.mxu0 %vm667_vm7, %v8392_v8  ;;  %v5737_v29 = vpop.permute.xlu0 %5736  ;;  %v5085_v8 = vsel %vm941_vm6, %v5071_v48, 0  ;;  %v5739_v18 = vpop.permute.xlu1 %5738 }
 0x311   : > { %6863 = vmatprep.mubr.msk.bf16.mxu1 %vm1005_vm10, %v4849_v36  ;;  %6869 = vmatprep.mubr.msk.bf16.mxu0 %vm864_vm9, %v8360_v43  ;;  %v5297_v43 = vld [vmem:[%s9234_s8] sm:$0x1]  ;;  %v6155_v36 = vsel %vm795_vm2, %v6141_v20, 0 }
 0x312   : > { %6862 = vmatpush3.bf16.msra.mxu1 %v4859_v24  ;;  %6868 = vmatpush3.bf16.msra.mxu0 %v4966_v58  ;;  %v5311_v25 = vsel %vm871_vm5, %v5297_v43, 0  ;;  %v9501_v58 = vld [vmem:[#allocation27_spill] sm:$0xff] }
 0x313   : > { %2165 = vrot.lane.b32.xlu1 %v2147_v51, %s7057_s23  ;;  %6977 = vmatprep.subr.msk.bf16.mxu1 %vm941_vm6, %v5071_v48 }
 0x314   : > { %6978 = vmatprep.subr.msk.bf16.mxu0 %vm795_vm2, %v5190_v19  ;;  %v5856_v35 = vpop.permute.xlu0 %5855 }
 0x318   : > { %6864 = vmatmul.mubr.msk.bf16.vlgmr.msra.gmra.mxu1 %vm1005_vm10, %v8599_v12  ;;  %6870 = vmatmul.mubr.msk.bf16.vlgmr.msra.gmra.mxu0 %vm864_vm9, %v8354_v13  ;;  %v5858_v13 = vpop.permute.xlu1 %5857  ;;  %v5963_v6 = vpop.permute.xlu0 %5962 }
 0x319   : > { %6875 = vmatprep.mubr.msk.bf16.mxu1 %vm667_vm7, %v8398_v30  ;;  %6881 = vmatprep.mubr.msk.bf16.mxu0 %vm1005_vm10, %v5194_v9  ;;  %v5535_v30 = vld [vmem:[%s9236_s10] sm:$0xf] }
 0x31a   : > { %6874 = vmatpush3.bf16.msra.mxu1 %v5085_v8  ;;  %6880 = vmatpush3.bf16.msra.mxu0 %v5204_v39  ;;  %v5549_v49 = vsel %vm795_vm2, %v5535_v30, 0 }
 0x31b   : > { %6979 = vmatprep.subr.msk.bf16.mxu1 %vm871_vm5, %v5297_v43  ;;  %6980 = vmatprep.subr.msk.bf16.mxu0 %vm941_vm6, %v5416_v40  ;;  %v9503_v40 = vld [vmem:[#allocation24_spill] sm:$0xff] }
 0x31c   : > { %v6054_v60 = vpop.permute.xlu0 %6053 }
 0x320   : > { %6876 = vmatmul.mubr.msk.bf16.vlgmr.msra.gmra.mxu1 %vm667_vm7, %v8396_v34  ;;  %6882 = vmatmul.mubr.msk.bf16.vlgmr.msra.gmra.mxu0 %vm1005_vm10, %v8621_v0  ;;  %v5965_v34 = vpop.permute.xlu1 %5964 }
 0x321   : > { %6887 = vmatprep.mubr.msk.bf16.mxu1 %vm864_vm9, %v8367_v3  ;;  %6893 = vmatprep.mubr.msk.bf16.mxu0 %vm667_vm7, %v8414_v50  ;;  %v5733_v3 = vld [vmem:[%s9235_s9] sm:$0x3] }
 0x322   : > { %6886 = vmatpush3.bf16.msra.mxu1 %v5311_v25  ;;  %6892 = vmatpush3.bf16.msra.mxu0 %v5430_v5  ;;  %v5852_v50 = vld [vmem:[%s9236_s10] sm:$0xf]  ;;  %v5747_v45 = vsel %vm941_vm6, %v5733_v3, 0 }
 0x323   : > { %6981 = vmatprep.subr.msk.bf16.mxu1 %vm795_vm2, %v5535_v30  ;;  %6982 = vmatprep.subr.msk.bf16.mxu0 %vm871_vm5, %v5642_v47  ;;  %v5866_v41 = vsel %vm795_vm2, %v5852_v50, 0  ;;  %v9504_v30 = vld [vmem:[#allocation26_spill] sm:$0xff] }
 0x324   : > { %v6056_v32 = vpop.permute.xlu1 %6055 }
 0x328   : > { %6888 = vmatmul.mubr.msk.bf16.vlgmr.msra.gmra.mxu1 %vm864_vm9, %v8358_v14  ;;  %6894 = vmatmul.mubr.msk.bf16.vlgmr.msra.gmra.mxu0 %vm667_vm7, %v5422_v22  ;;  %v6145_v14 = vpop.permute.xlu0 %6144  ;;  %v6147_v15 = vpop.permute.xlu1 %6146  ;;  %v9500_v22 = vld [vmem:[#allocation6_spill] sm:$0xff] }
 0x329   : > { %6899 = vmatprep.mubr.msk.bf16.mxu1 %vm1005_vm10, %v8627_v21  ;;  %6905 = vmatprep.mubr.msk.bf16.mxu0 %vm864_vm9, %v5646_v37 }
 0x32a   : > { %6898 = vmatpush3.bf16.msra.mxu1 %v5549_v49  ;;  %6904 = vmatpush3.bf16.msra.mxu0 %v5656_v54 }
 0x32b   : > { %6983 = vmatprep.subr.msk.bf16.mxu1 %vm941_vm6, %v5733_v3  ;;  %6984 = vmatprep.subr.msk.bf16.mxu0 %vm795_vm2, %v5852_v50 }
 0x32c   : > { %v1178_v17 = vpop.permute.xlu0 %1177  ;;  %v1180_v31 = vpop.permute.xlu1 %1179 }
 0x32d   : > { %v1187_v7 = vadd.f32 %v1178_v17, %v9497_v59  ;;  %v1188_v44 = vadd.f32 %v1180_v31, %v9498_v10 }
 0x330   : > { %6900 = vmatmul.mubr.msk.bf16.vlgmr.msra.gmra.mxu1 %vm1005_vm10, %v8650_v62  ;;  %6906 = vmatmul.mubr.msk.bf16.vlgmr.msra.gmra.mxu0 %vm864_vm9, %v5648_v4  ;;  %v1263_v11 = vpop.permute.xlu0 %1262  ;;  %v1265_v38 = vpop.permute.xlu1 %1264  ;;  %v9502_v4 = vld [vmem:[#allocation8_spill] sm:$0xff] }
 0x331   : > { %6911 = vmatprep.mubr.msk.bf16.mxu1 %vm667_vm7, %v5737_v29  ;;  %6917 = vmatprep.mubr.msk.bf16.mxu0 %vm1005_vm10, %v5856_v35  ;;  %v1272_v46 = vadd.f32 %v1263_v11, %v1187_v7  ;;  %v1273_v26 = vadd.f32 %v1265_v38, %v1188_v44 }
 0x332   : > { %6910 = vmatpush3.bf16.msra.mxu1 %v5747_v45  ;;  %6916 = vmatpush3.bf16.msra.mxu0 %v5866_v41 }
 0x333   : > { %6985 = vmatprep.subr.msk.bf16.mxu1 %vm871_vm5, %v5959_v23  ;;  %6986 = vmatprep.subr.msk.bf16.mxu0 %vm941_vm6, %v6050_v27 }
 0x334   : > { %v1174_v57 = vpop.permute.xlu0 %1173  ;;  %v1176_v28 = vpop.permute.xlu1 %1175 }
 0x335   : > { %v1185_v56 = vadd.f32 %v1174_v57, %v9500_v22  ;;  %v1186_v29 = vadd.f32 %v1176_v28, %v9502_v4 }
 0x338   : > { %6912 = vmatmul.mubr.msk.bf16.vlgmr.msra.gmra.mxu1 %vm667_vm7, %v5739_v18  ;;  %6918 = vmatmul.mubr.msk.bf16.vlgmr.msra.gmra.mxu0 %vm1005_vm10, %v5858_v13  ;;  %v1259_v1 = vpop.permute.xlu0 %1258  ;;  %v1261_v12 = vpop.permute.xlu1 %1260 }
 0x339   : > { %6923 = vmatprep.mubr.msk.bf16.mxu1 %vm864_vm9, %v5963_v6  ;;  %6929 = vmatprep.mubr.msk.bf16.mxu0 %vm667_vm7, %v6054_v60  ;;  %v1270_v24 = vadd.f32 %v1259_v1, %v1185_v56  ;;  %v1271_v43 = vadd.f32 %v1261_v12, %v1186_v29 }
 0x33a   : > { %6922 = vmatpush3.bf16.msra.mxu1 %v5973_v55  ;;  %6928 = vmatpush3.bf16.msra.mxu0 %v6064_v33 }
 0x33b   : > { %6987 = vmatprep.subr.msk.bf16.mxu1 %vm795_vm2, %v6141_v20 }
 0x33c   : > { %v1478_v52 = vpop.permute.xlu0 %1477  ;;  %v1480_v16 = vpop.permute.xlu1 %1479 }
 0x33d   : > { %v1487_v6 = vadd.f32 %v1478_v52, %v9497_v59  ;;  %v1488_v3 = vadd.f32 %v1480_v16, %v9498_v10 }
 0x340   : > { %6924 = vmatmul.mubr.msk.bf16.vlgmr.msra.gmra.mxu1 %vm864_vm9, %v5965_v34  ;;  %6930 = vmatmul.mubr.msk.bf16.vlgmr.msra.gmra.mxu0 %vm667_vm7, %v6056_v32  ;;  %v1474_v2 = vpop.permute.xlu0 %1473  ;;  %v1476_v9 = vpop.permute.xlu1 %1475 }
 0x341   : > { %6935 = vmatprep.mubr.msk.bf16.mxu1 %vm1005_vm10, %v6145_v14  ;;  %6934 = vmatpush3.bf16.msra.mxu1 %v6155_v36  ;;  %v1486_v11 = vadd.f32 %v1476_v9, %v9502_v4 }
 0x348   : > { %6936 = vmatmul.mubr.msk.bf16.vlgmr.msra.gmra.mxu1 %vm1005_vm10, %v6147_v15  ;;  %v1485_v15 = vadd.f32 %v1474_v2, %v9500_v22 }
 0x355   : > { %v1376_v0 = vpop.permute.xlu0 %1375 }
 0x356   : > { %v1385_v21 = vadd.f32 %v1376_v0, %v1272_v46 }
 0x358   : > { %v1389_v42 = vadd.f32 %v1385_v21, %v9499_v61 }
 0x359   : > { %v1378_v53 = vpop.permute.xlu1 %1377  ;;  %v1704_v63 = vpop.permute.xlu0 %1703 }
 0x35a   : > { %v1393_v62 = vmax.f32 %v1389_v42, 0.0  ;;  %v1386_v37 = vadd.f32 %v1378_v53, %v1273_v26 }
 0x35c   : > { %1398 = vst.msk [vmem:[%s7790_s24 + $0x20] sm:$0xff] %vm1395_vm11, %v1393_v62  ;;  %v1390_v48 = vadd.f32 %v1386_v37, %v9501_v58 }
 0x35d   : > { %v1372_v51 = vpop.permute.xlu0 %1371  ;;  %v1706_v19 = vpop.permute.xlu1 %1705 }
 0x35e   : > { %v1394_v8 = vmax.f32 %v1390_v48, 0.0  ;;  %v1383_v39 = vadd.f32 %v1372_v51, %v1270_v24 }
 0x360   : > { %1399 = vst.msk [vmem:[%s7790_s24 + $0x30] sm:$0xff] %vm1395_vm11, %v1394_v8  ;;  %v1387_v18 = vadd.f32 %v1383_v39, %v9503_v40 }
 0x361   : > { %v1700_v35 = vpop.permute.xlu0 %1699  ;;  %v1374_v13 = vpop.permute.xlu1 %1373 }
 0x362   : > { %v1391_v25 = vmax.f32 %v1387_v18, 0.0  ;;  %v1384_v5 = vadd.f32 %v1374_v13, %v1271_v43 }
 0x364   : > { %1396 = vst.msk [vmem:[%s7790_s24] sm:$0xff] %vm1395_vm11, %v1391_v25  ;;  %v1388_v47 = vadd.f32 %v1384_v5, %v9504_v30 }
 0x365   : > { %v1591_v34 = vpop.permute.xlu0 %1590  ;;  %v1702_v60 = vpop.permute.xlu1 %1701 }
 0x366   : > { %v1392_v49 = vmax.f32 %v1388_v47, 0.0  ;;  %v1600_v54 = vadd.f32 %v1591_v34, %v1487_v6 }
 0x368   : > { %1397 = vst.msk [vmem:[%s7790_s24 + $0x10] sm:$0xff] %vm1395_vm11, %v1392_v49  ;;  %v1713_v50 = vadd.f32 %v1704_v63, %v1600_v54 }
 0x369   : > { %v1593_v32 = vpop.permute.xlu1 %1592  ;;  %v8773_v14 = vpop.permute.xlu0 %1918 }
 0x36a   : > { %v1717_v45 = vadd.f32 %v1713_v50, %v9499_v61  ;;  %v1601_v41 = vadd.f32 %v1593_v32, %v1488_v3 }
 0x36c   : > { %v1721_v23 = vmax.f32 %v1717_v45, 0.0  ;;  %v1714_v27 = vadd.f32 %v1706_v19, %v1601_v41 }
 0x36d   : > { %v1587_v17 = vpop.permute.xlu0 %1586  ;;  %v8777_v31 = vpop.permute.xlu1 %1920 }
 0x36e   : > { %1726 = vst.msk [vmem:[%s7790_s24 + $0x20] sm:$0xff] %vm1723_vm12, %v1721_v23  ;;  %v1718_v55 = vadd.f32 %v1714_v27, %v9501_v58  ;;  %v1598_v33 = vadd.f32 %v1587_v17, %v1485_v15 }
 0x370   : > { %v1722_v20 = vmax.f32 %v1718_v55, 0.0  ;;  %v1711_v38 = vadd.f32 %v1700_v35, %v1598_v33 }
 0x371   : > { %v1589_v57 = vpop.permute.xlu1 %1588 }
 0x372   : > { %1727 = vst.msk [vmem:[%s7790_s24 + $0x30] sm:$0xff] %vm1723_vm12, %v1722_v20  ;;  %v1715_v36 = vadd.f32 %v1711_v38, %v9503_v40  ;;  %v1599_v28 = vadd.f32 %v1589_v57, %v1486_v11 }
 0x374   : > { %v1719_v1 = vmax.f32 %v1715_v36, 0.0  ;;  %v1712_v12 = vadd.f32 %v1702_v60, %v1599_v28 }
 0x376   : > { %1724 = vst.msk [vmem:[%s7790_s24] sm:$0xff] %vm1723_vm12, %v1719_v1  ;;  %v1716_v52 = vadd.f32 %v1712_v12, %v9504_v30  ;;  %v9505_v12 = vld [vmem:[#allocation11_spill] sm:$0xff] }
 0x378   : > { %v1720_v16 = vmax.f32 %v1716_v52, 0.0  ;;  %v6721_v2 = vpop.f32.mrf.mxu1 }
 0x379   : > { %2037 = vrot.lane.b32.xlu0 %v6721_v2, %s7056_s26 }
 0x37a   : > { %1725 = vst.msk [vmem:[%s7790_s24 + $0x10] sm:$0xff] %vm1723_vm12, %v1720_v16  ;;  %v2014_v7 = vpop.f32.mrf.mxu1 }
 0x37c   : > { %v6722_v46 = vpop.f32.mrf.mxu1 }
 0x37d   : > { %2039 = vrot.lane.b32.xlu1 %v6722_v46, %s7056_s26 }
 0x37e   : > { %v2017_v9 = vpop.f32.mrf.mxu1 }
 0x380   : > { %v6733_v0 = vpop.f32.mrf.mxu1  ;;  %v6739_v44 = vpop.f32.mrf.mxu0 }
 0x381   : > { %2399 = vrot.lane.b32.xlu0 %v6739_v44, %s7057_s23 }
 0x382   : > { %v2257_v21 = vpop.f32.mrf.mxu1  ;;  %v2376_v26 = vpop.f32.mrf.mxu0 }
 0x384   : > { %v6734_v42 = vpop.f32.mrf.mxu1  ;;  %v6740_v53 = vpop.f32.mrf.mxu0 }
 0x385   : > { %2033 = vrot.lane.b32.xlu0 %v2014_v7, %s7056_s26  ;;  %2401 = vrot.lane.b32.xlu1 %v6740_v53, %s7057_s23  ;;  %v9506_v7 = vld [vmem:[#allocation7_spill] sm:$0xff] }
 0x386   : > { %v2260_v63 = vpop.f32.mrf.mxu1  ;;  %v2379_v56 = vpop.f32.mrf.mxu0 }
 0x388   : > { %v6745_v62 = vpop.f32.mrf.mxu1  ;;  %v6751_v37 = vpop.f32.mrf.mxu0 }
 0x389   : > { %2395 = vrot.lane.b32.xlu0 %v2376_v26, %s7057_s23  ;;  %2035 = vrot.lane.b32.xlu1 %v2017_v9, %s7056_s26 }
 0x38a   : > { %v2506_v24 = vpop.f32.mrf.mxu1  ;;  %v2619_v48 = vpop.f32.mrf.mxu0 }
 0x38c   : > { %v6746_v51 = vpop.f32.mrf.mxu1  ;;  %v6752_v19 = vpop.f32.mrf.mxu0 }
 0x38d   : > { %2280 = vrot.lane.b32.xlu0 %v6733_v0, %s7057_s23  ;;  %2397 = vrot.lane.b32.xlu1 %v2379_v56, %s7057_s23 }
 0x38e   : > { %v2509_v29 = vpop.f32.mrf.mxu1  ;;  %v2622_v8 = vpop.f32.mrf.mxu0 }
 0x390   : > { %v6757_v39 = vpop.f32.mrf.mxu1  ;;  %v6763_v43 = vpop.f32.mrf.mxu0 }
 0x391   : > { %2282 = vrot.lane.b32.xlu1 %v6734_v42, %s7057_s23  ;;  %2642 = vrot.lane.b32.xlu0 %v6751_v37, %s7051_s29 }
 0x392   : > { %v2738_v18 = vpop.f32.mrf.mxu1  ;;  %v2868_v35 = vpop.f32.mrf.mxu0 }
 0x394   : > { %v6758_v13 = vpop.f32.mrf.mxu1  ;;  %v6764_v25 = vpop.f32.mrf.mxu0 }
 0x395   : > { %2276 = vrot.lane.b32.xlu0 %v2257_v21, %s7057_s23  ;;  %2644 = vrot.lane.b32.xlu1 %v6752_v19, %s7051_s29  ;;  %v9507_v21 = vld [vmem:[#allocation13_spill] sm:$0xff] }
 0x396   : > { %v8804_v5 = vpop.f32.mrf.mxu1  ;;  %v2871_v6 = vpop.f32.mrf.mxu0 }
 0x398   : > { %v8806_v47 = vpop.f32.mrf.mxu1  ;;  %v6775_v34 = vpop.f32.mrf.mxu0 }
 0x399   : > { %2638 = vrot.lane.b32.xlu0 %v2619_v48, %s7051_s29  ;;  %2278 = vrot.lane.b32.xlu1 %v2260_v63, %s7057_s23 }
 0x39a   : > { %v8810_v60 = vpop.f32.mrf.mxu1  ;;  %v3106_v49 = vpop.f32.mrf.mxu0 }
 0x39c   : > { %v8812_v54 = vpop.f32.mrf.mxu1  ;;  %v6776_v3 = vpop.f32.mrf.mxu0 }
 0x39d   : > { %2529 = vrot.lane.b32.xlu0 %v6745_v62, %s7051_s29  ;;  %2640 = vrot.lane.b32.xlu1 %v2622_v8, %s7051_s29  ;;  %v9508_v62 = vld [vmem:[#allocation9_spill] sm:$0xff] }
 0x39e   : > { %v8816_v50 = vpop.f32.mrf.mxu1  ;;  %v3109_v32 = vpop.f32.mrf.mxu0 }
 0x3a0   : > { %v8818_v45 = vpop.f32.mrf.mxu1  ;;  %v8820_v41 = vpop.f32.mrf.mxu0 }
 0x3a1   : > { %2531 = vrot.lane.b32.xlu1 %v6746_v51, %s7051_s29  ;;  %2891 = vrot.lane.b32.xlu0 %v6763_v43, %s7049_s18 }
 0x3a2   : > { %v8824_v15 = vpop.f32.mrf.mxu1  ;;  %v3355_v23 = vpop.f32.mrf.mxu0 }
 0x3a4   : > { %v8826_v27 = vpop.f32.mrf.mxu1  ;;  %v6788_v17 = vpop.f32.mrf.mxu0 }
 0x3a5   : > { %2525 = vrot.lane.b32.xlu0 %v2506_v24, %s7051_s29  ;;  %2893 = vrot.lane.b32.xlu1 %v6764_v25, %s7049_s18 }
 0x3a6   : > { %v8830_v55 = vpop.f32.mrf.mxu1  ;;  %v3358_v33 = vpop.f32.mrf.mxu0 }
 0x3a8   : > { %v8832_v11 = vpop.f32.mrf.mxu1  ;;  %v6799_v20 = vpop.f32.mrf.mxu0 }
 0x3a9   : > { %2887 = vrot.lane.b32.xlu0 %v2868_v35, %s7049_s18  ;;  %2527 = vrot.lane.b32.xlu1 %v2509_v29, %s7051_s29  ;;  %v3621_v52 = vadd.f32 %v6799_v20, %v9505_v12 }
 0x3aa   : > { %v8836_v38 = vpop.f32.mrf.mxu1  ;;  %v3604_v57 = vpop.f32.mrf.mxu0 }
 0x3ab   : > { %v3619_v46 = vadd.f32 %v3604_v57, %v9506_v7 }
 0x3ac   : > { %v8838_v36 = vpop.f32.mrf.mxu1  ;;  %v6800_v28 = vpop.f32.mrf.mxu0 }
 0x3ad   : > { %2761 = vrot.lane.b32.xlu0 %v6757_v39, %s7051_s29  ;;  %2889 = vrot.lane.b32.xlu1 %v2871_v6, %s7049_s18  ;;  %v3622_v26 = vadd.f32 %v6800_v28, %v9507_v21 }
 0x3ae   : > { %v8842_v1 = vpop.f32.mrf.mxu1  ;;  %v3607_v16 = vpop.f32.mrf.mxu0 }
 0x3af   : > { %v3620_v37 = vadd.f32 %v3607_v16, %v9508_v62 }
 0x3b0   : > { %v6805_v2 = vpop.f32.mrf.mxu1  ;;  %v6811_v0 = vpop.f32.mrf.mxu0 }
 0x3b1   : > { %v3724_v9 = vadd.f32 %v6805_v2, %v3621_v52  ;;  %2763 = vrot.lane.b32.xlu1 %v6758_v13, %s7051_s29  ;;  %3129 = vrot.lane.b32.xlu0 %v6775_v34, %s7049_s18 }
 0x3b2   : > { %v3707_v44 = vpop.f32.mrf.mxu1  ;;  %v3810_v63 = vpop.f32.mrf.mxu0 }
 0x3b3   : > { %v3827_v42 = vadd.f32 %v6811_v0, %v3724_v9  ;;  %v3722_v53 = vadd.f32 %v3707_v44, %v3619_v46 }
 0x3b4   : > { %v6806_v56 = vpop.f32.mrf.mxu1  ;;  %v6812_v19 = vpop.f32.mrf.mxu0 }
 0x3b5   : > { %v3831_v24 = vadd.f32 %v3827_v42, %v9499_v61  ;;  %v3825_v48 = vadd.f32 %v3810_v63, %v3722_v53  ;;  %v3725_v51 = vadd.f32 %v6806_v56, %v3622_v26  ;;  %2757 = vrot.lane.b32.xlu0 %v2738_v18, %s7051_s29  ;;  %3131 = vrot.lane.b32.xlu1 %v6776_v3, %s7049_s18 }
 0x3b6   : > { %v3710_v29 = vpop.f32.mrf.mxu1  ;;  %v3813_v13 = vpop.f32.mrf.mxu0 }
 0x3b7   : > { %v3835_v8 = vmax.f32 %v3831_v24, 0.0  ;;  %v3829_v39 = vadd.f32 %v3825_v48, %v9503_v40  ;;  %v3828_v43 = vadd.f32 %v6812_v19, %v3725_v51  ;;  %v3723_v35 = vadd.f32 %v3710_v29, %v3620_v37 }
 0x3b9   : > { %3839 = vst.msk [vmem:[%s7790_s24 + $0x28] sm:$0xff] %vm505_vm1, %v3835_v8  ;;  %v3833_v25 = vmax.f32 %v3829_v39, 0.0  ;;  %v3832_v6 = vadd.f32 %v3828_v43, %v9501_v58  ;;  %v3826_v34 = vadd.f32 %v3813_v13, %v3723_v35  ;;  %3125 = vrot.lane.b32.xlu0 %v3106_v49, %s7049_s18  ;;  %2759 = vrot.lane.b32.xlu1 %v8804_v5, %s7051_s29  ;;  %v8880_v5 = vpop.permute.xlu0 %1914  ;;  %v6817_v49 = vpop.f32.mrf.mxu1 }
 0x3bb   : > { %3837 = vst.msk [vmem:[%s7790_s24 + $0x8] sm:$0xff] %vm505_vm1, %v3833_v25  ;;  %v3836_v18 = vmax.f32 %v3832_v6, 0.0  ;;  %v3830_v3 = vadd.f32 %v3826_v34, %v9504_v30 }
 0x3bd   : > { %3840 = vst.msk [vmem:[%s7790_s24 + $0x38] sm:$0xff] %vm505_vm1, %v3836_v18  ;;  %v3834_v20 = vmax.f32 %v3830_v3, 0.0  ;;  %3010 = vrot.lane.b32.xlu0 %v8806_v47, %s7049_s18  ;;  %3127 = vrot.lane.b32.xlu1 %v3109_v32, %s7049_s18  ;;  %v8885_v47 = vpop.permute.xlu1 %1916  ;;  %v3923_v32 = vpop.f32.mrf.mxu1 }
 0x3bf   : > { %3838 = vst.msk [vmem:[%s7790_s24 + $0x18] sm:$0xff] %vm505_vm1, %v3834_v20  ;;  %vm3517_vm1 = vcmask 1048448  }
 0x3c1   : > { %3012 = vrot.lane.b32.xlu1 %v8812_v54, %s7049_s18  ;;  %3378 = vrot.lane.b32.xlu0 %v8820_v41, %s7047_s13  ;;  %v6823_v54 = vpop.f32.mrf.mxu0 }
 0x3c5   : > { %3006 = vrot.lane.b32.xlu0 %v8810_v60, %s7049_s18  ;;  %3380 = vrot.lane.b32.xlu1 %v6788_v17, %s7047_s13  ;;  %v1806_v60 = vpop.permute.xlu0 %1805 }
 0x3c9   : > { %3374 = vrot.lane.b32.xlu0 %v3355_v23, %s7047_s13  ;;  %3008 = vrot.lane.b32.xlu1 %v8816_v50, %s7049_s18  ;;  %v1808_v50 = vpop.permute.xlu1 %1807  ;;  %v8895_v41 = vpop.permute.xlu0 %2167 }
 0x3ca   : > { %v1816_v16 = vadd.f32 %v1808_v50, %v9498_v10 }
 0x3cc   : > { %v1929_v53 = vadd.f32 %v8777_v31, %v1816_v16 }
 0x3cd   : > { %3259 = vrot.lane.b32.xlu0 %v8818_v45, %s7047_s13  ;;  %3376 = vrot.lane.b32.xlu1 %v3358_v33, %s7047_s13  ;;  %v4042_v45 = vpop.f32.mrf.mxu0  ;;  %v1802_v17 = vpop.permute.xlu0 %1801 }
 0x3ce   : > { %v1813_v51 = vadd.f32 %v1802_v17, %v9500_v22 }
 0x3cf   : > { %v6824_v23 = vpop.f32.mrf.mxu0 }
 0x3d0   : > { %v1926_v43 = vadd.f32 %v8880_v5, %v1813_v51 }
 0x3d1   : > { %3255 = vrot.lane.b32.xlu0 %v8824_v15, %s7047_s13  ;;  %3261 = vrot.lane.b32.xlu1 %v8826_v27, %s7047_s13  ;;  %v6818_v15 = vpop.f32.mrf.mxu1  ;;  %v8901_v27 = vpop.permute.xlu1 %2169 }
 0x3d2   : > { %v4045_v33 = vpop.f32.mrf.mxu0  ;;  %v8911_v28 = vpop.permute.xlu0 %2163 }
 0x3d4   : > { %v6835_v57 = vpop.f32.mrf.mxu0 }
 0x3d5   : > { %3497 = vrot.lane.b32.xlu0 %v8832_v11, %s7047_s13  ;;  %3257 = vrot.lane.b32.xlu1 %v8830_v55, %s7047_s13  ;;  %v3926_v55 = vpop.f32.mrf.mxu1  ;;  %v1804_v11 = vpop.permute.xlu1 %1803 }
 0x3d6   : > { %v4290_v52 = vpop.f32.mrf.mxu0  ;;  %v1814_v39 = vadd.f32 %v1804_v11, %v9502_v4  ;;  %v2178_v11 = vadd.f32 %v8901_v27, %v9498_v10  ;;  %v2175_v27 = vadd.f32 %v8911_v28, %v9500_v22 }
 0x3d8   : > { %v6836_v26 = vpop.f32.mrf.mxu0  ;;  %v1927_v3 = vadd.f32 %v8885_v47, %v1814_v39 }
 0x3d9   : > { %3493 = vrot.lane.b32.xlu0 %v8836_v38, %s7047_s13  ;;  %3499 = vrot.lane.b32.xlu1 %v8838_v36, %s7047_s13  ;;  %v6829_v38 = vpop.f32.mrf.mxu1  ;;  %v1815_v36 = vadd.f32 %v1806_v60, %v9497_v59  ;;  %v8917_v46 = vpop.permute.xlu1 %2165 }
 0x3da   : > { %v4293_v24 = vpop.f32.mrf.mxu0 }
 0x3db   : > { %v1928_v2 = vadd.f32 %v8773_v14, %v1815_v36 }
 0x3dc   : > { %v6847_v8 = vpop.f32.mrf.mxu0 }
 0x3dd   : > { %3495 = vrot.lane.b32.xlu1 %v8842_v1, %s7047_s13  ;;  %4065 = vrot.lane.b32.xlu0 %v6823_v54, %s7054_s14  ;;  %v4161_v1 = vpop.f32.mrf.mxu1 }
 0x3de   : > { %v4528_v6 = vpop.f32.mrf.mxu0 }
 0x3df   : > { %v6830_v44 = vpop.f32.mrf.mxu1 }
 0x3e0   : > { %v6848_v54 = vpop.f32.mrf.mxu0 }
 0x3e1   : > { %4061 = vrot.lane.b32.xlu0 %v4042_v45, %s7054_s14  ;;  %4067 = vrot.lane.b32.xlu1 %v6824_v23, %s7054_s14  ;;  %v4164_v37 = vpop.f32.mrf.mxu1 }
 0x3e2   : > { %v4531_v17 = vpop.f32.mrf.mxu0 }
 0x3e3   : > { %v6841_v31 = vpop.f32.mrf.mxu1 }
 0x3e5   : > { %3946 = vrot.lane.b32.xlu0 %v6817_v49, %s7054_s14  ;;  %4063 = vrot.lane.b32.xlu1 %v4045_v33, %s7054_s14  ;;  %v4409_v25 = vpop.f32.mrf.mxu1 }
 0x3e7   : > { %v6842_v49 = vpop.f32.mrf.mxu1 }
 0x3e9   : > { %3948 = vrot.lane.b32.xlu1 %v6818_v15, %s7054_s14  ;;  %4313 = vrot.lane.b32.xlu0 %v6835_v57, %s7055_s28  ;;  %v4412_v23 = vpop.f32.mrf.mxu1 }
 0x3eb   : > { %v2038_v9 = vpop.permute.xlu0 %2037  ;;  %v6853_v36 = vpop.f32.mrf.mxu1 }
 0x3ec   : > { %v2047_v0 = vadd.f32 %v2038_v9, %v1928_v2 }
 0x3ed   : > { %3942 = vrot.lane.b32.xlu0 %v3923_v32, %s7054_s14  ;;  %4315 = vrot.lane.b32.xlu1 %v6836_v26, %s7055_s28  ;;  %v2177_v32 = vadd.f32 %v8895_v41, %v9497_v59  ;;  %v4657_v26 = vpop.f32.mrf.mxu1 }
 0x3ee   : > { %v2051_v42 = vadd.f32 %v2047_v0, %v9499_v61 }
 0x3ef   : > { %v2040_v63 = vpop.permute.xlu1 %2039 }
 0x3f0   : > { %v2055_v56 = vmax.f32 %v2051_v42, 0.0  ;;  %v2048_v14 = vadd.f32 %v2040_v63, %v1929_v53 }
 0x3f1   : > { %4309 = vrot.lane.b32.xlu0 %v4290_v52, %s7055_s28  ;;  %3944 = vrot.lane.b32.xlu1 %v3926_v55, %s7054_s14 }
 0x3f2   : > { %2060 = vst.msk [vmem:[%s7790_s24 + $0x20] sm:$0xff] %vm2057_vm13, %v2055_v56  ;;  %v2052_v48 = vadd.f32 %v2048_v14, %v9501_v58  ;;  %v2176_v56 = vadd.f32 %v8917_v46, %v9502_v4 }
 0x3f3   : > { %v2400_v29 = vpop.permute.xlu0 %2399 }
 0x3f4   : > { %v2056_v19 = vmax.f32 %v2052_v48, 0.0  ;;  %v6854_v48 = vpop.f32.mrf.mxu1 }
 0x3f5   : > { %4184 = vrot.lane.b32.xlu0 %v6829_v38, %s7054_s14  ;;  %4311 = vrot.lane.b32.xlu1 %v4293_v24, %s7055_s28 }
 0x3f6   : > { %2061 = vst.msk [vmem:[%s7790_s24 + $0x30] sm:$0xff] %vm2057_vm13, %v2056_v19 }
 0x3f7   : > { %v2034_v35 = vpop.permute.xlu0 %2033  ;;  %v2402_v13 = vpop.permute.xlu1 %2401 }
 0x3f8   : > { %v2045_v34 = vadd.f32 %v2034_v35, %v1926_v43  ;;  %v4660_v43 = vpop.f32.mrf.mxu1 }
 0x3f9   : > { %4186 = vrot.lane.b32.xlu1 %v6830_v44, %s7054_s14  ;;  %4551 = vrot.lane.b32.xlu0 %v6847_v8, %s7055_s28 }
 0x3fa   : > { %v2049_v18 = vadd.f32 %v2045_v34, %v9503_v40 }
 0x3fb   : > { %v2396_v20 = vpop.permute.xlu0 %2395  ;;  %v2036_v60 = vpop.permute.xlu1 %2035 }
 0x3fc   : > { %v2053_v50 = vmax.f32 %v2049_v18, 0.0  ;;  %v2046_v5 = vadd.f32 %v2036_v60, %v1927_v3  ;;  %v6865_v18 = vpop.f32.mrf.mxu1 }
 0x3fd   : > { %4180 = vrot.lane.b32.xlu0 %v4161_v1, %s7054_s14  ;;  %4553 = vrot.lane.b32.xlu1 %v6848_v54, %s7055_s28  ;;  %v6859_v1 = vpop.f32.mrf.mxu0 }
 0x3fe   : > { %2058 = vst.msk [vmem:[%s7790_s24] sm:$0xff] %vm2057_vm13, %v2053_v50  ;;  %v2050_v45 = vadd.f32 %v2046_v5, %v9504_v30 }
 0x3ff   : > { %v2281_v15 = vpop.permute.xlu0 %2280  ;;  %v2398_v47 = vpop.permute.xlu1 %2397 }
 0x400   : > { %v2054_v55 = vmax.f32 %v2050_v45, 0.0  ;;  %v2290_v33 = vadd.f32 %v2281_v15, %v2177_v32  ;;  %v4776_v42 = vpop.f32.mrf.mxu0 }
 0x401   : > { %4547 = vrot.lane.b32.xlu0 %v4528_v6, %s7055_s28  ;;  %4182 = vrot.lane.b32.xlu1 %v4164_v37, %s7054_s14 }
 0x402   : > { %2059 = vst.msk [vmem:[%s7790_s24 + $0x10] sm:$0xff] %vm2057_vm13, %v2054_v55  ;;  %v2409_v41 = vadd.f32 %v2400_v29, %v2290_v33  ;;  %v6860_v51 = vpop.f32.mrf.mxu0 }
 0x403   : > { %v2283_v38 = vpop.permute.xlu1 %2282  ;;  %v8952_v57 = vpop.permute.xlu0 %2642 }
 0x404   : > { %v2413_v52 = vadd.f32 %v2409_v41, %v9499_v61  ;;  %v2291_v16 = vadd.f32 %v2283_v38, %v2178_v11  ;;  %v4779_v35 = vpop.f32.mrf.mxu0 }
 0x405   : > { %4432 = vrot.lane.b32.xlu0 %v6841_v31, %s7055_s28  ;;  %4549 = vrot.lane.b32.xlu1 %v4531_v17, %s7055_s28 }
 0x406   : > { %v2417_v2 = vmax.f32 %v2413_v52, 0.0  ;;  %v2410_v9 = vadd.f32 %v2402_v13, %v2291_v16  ;;  %v6871_v3 = vpop.f32.mrf.mxu0 }
 0x407   : > { %v2277_v0 = vpop.permute.xlu0 %2276  ;;  %v2645_v44 = vpop.permute.xlu1 %2644 }
 0x408   : > { %2422 = vst.msk [vmem:[%s7790_s24 + $0x20] sm:$0xff] %vm2419_vm14, %v2417_v2  ;;  %v2414_v53 = vadd.f32 %v2410_v9, %v9501_v58  ;;  %v2288_v63 = vadd.f32 %v2277_v0, %v2175_v27  ;;  %v5002_v54 = vpop.f32.mrf.mxu0 }
 0x409   : > { %4434 = vrot.lane.b32.xlu1 %v6842_v49, %s7055_s28  ;;  %4799 = vrot.lane.b32.xlu0 %v6859_v1, %s7056_s26  ;;  %v4895_v49 = vpop.f32.mrf.mxu1 }
 0x40a   : > { %v2418_v28 = vmax.f32 %v2414_v53, 0.0  ;;  %v2407_v14 = vadd.f32 %v2396_v20, %v2288_v63  ;;  %v6872_v15 = vpop.f32.mrf.mxu0 }
 0x40b   : > { %v8966_v37 = vpop.permute.xlu0 %2638  ;;  %v2279_v24 = vpop.permute.xlu1 %2278 }
 0x40c   : > { %2423 = vst.msk [vmem:[%s7790_s24 + $0x30] sm:$0xff] %vm2419_vm14, %v2418_v28  ;;  %v2411_v19 = vadd.f32 %v2407_v14, %v9503_v40  ;;  %v2289_v29 = vadd.f32 %v2279_v24, %v2176_v56  ;;  %v6866_v45 = vpop.f32.mrf.mxu1  ;;  %v5005_v11 = vpop.f32.mrf.mxu0 }
 0x40d   : > { %4428 = vrot.lane.b32.xlu0 %v4409_v25, %s7055_s28  ;;  %4801 = vrot.lane.b32.xlu1 %v6860_v51, %s7056_s26 }
 0x40e   : > { %v2415_v31 = vmax.f32 %v2411_v19, 0.0  ;;  %v2408_v46 = vadd.f32 %v2398_v47, %v2289_v29  ;;  %v4898_v33 = vpop.f32.mrf.mxu1  ;;  %v6883_v27 = vpop.f32.mrf.mxu0 }
 0x40f   : > { %v2530_v8 = vpop.permute.xlu0 %2529  ;;  %v8973_v39 = vpop.permute.xlu1 %2640 }
 0x410   : > { %2420 = vst.msk [vmem:[%s7790_s24] sm:$0xff] %vm2419_vm14, %v2415_v31  ;;  %v2412_v13 = vadd.f32 %v2408_v46, %v9504_v30  ;;  %v2539_v50 = vadd.f32 %v2530_v8, %v9497_v59  ;;  %v5240_v56 = vpop.f32.mrf.mxu0 }
 0x411   : > { %4795 = vrot.lane.b32.xlu0 %v4776_v42, %s7056_s26  ;;  %4430 = vrot.lane.b32.xlu1 %v4412_v23, %s7055_s28 }
 0x412   : > { %v2416_v6 = vmax.f32 %v2412_v13, 0.0  ;;  %v2652_v23 = vadd.f32 %v8952_v57, %v2539_v50  ;;  %v6877_v57 = vpop.f32.mrf.mxu1  ;;  %v6884_v29 = vpop.f32.mrf.mxu0 }
 0x413   : > { %v2532_v25 = vpop.permute.xlu1 %2531  ;;  %v8980_v34 = vpop.permute.xlu0 %2891 }
 0x414   : > { %2421 = vst.msk [vmem:[%s7790_s24 + $0x10] sm:$0xff] %vm2419_vm14, %v2416_v6  ;;  %v2540_v47 = vadd.f32 %v2532_v25, %v9498_v10  ;;  %v5121_v63 = vpop.f32.mrf.mxu1  ;;  %v2901_v8 = vadd.f32 %v8980_v34, %v9497_v59  ;;  %v5243_v6 = vpop.f32.mrf.mxu0 }
 0x415   : > { %4680 = vrot.lane.b32.xlu0 %v6853_v36, %s7056_s26  ;;  %4797 = vrot.lane.b32.xlu1 %v4779_v35, %s7056_s26 }
 0x416   : > { %v2653_v1 = vadd.f32 %v2645_v44, %v2540_v47  ;;  %v6895_v50 = vpop.f32.mrf.mxu0 }
 0x417   : > { %v2526_v20 = vpop.permute.xlu0 %2525  ;;  %v8986_v60 = vpop.permute.xlu1 %2893 }
 0x418   : > { %v2537_v38 = vadd.f32 %v2526_v20, %v9500_v22 }
 0x419   : > { %4682 = vrot.lane.b32.xlu1 %v6854_v48, %s7056_s26  ;;  %5025 = vrot.lane.b32.xlu0 %v6871_v3, %s7057_s23  ;;  %v2902_v3 = vadd.f32 %v8986_v60, %v9498_v10 }
 0x41a   : > { %v2650_v44 = vadd.f32 %v8966_v37, %v2537_v38  ;;  %v6878_v37 = vpop.f32.mrf.mxu1 }
 0x41b   : > { %v8991_v5 = vpop.permute.xlu0 %2887  ;;  %v2528_v32 = vpop.permute.xlu1 %2527 }
 0x41c   : > { %v2538_v0 = vadd.f32 %v2528_v32, %v9502_v4  ;;  %v5124_v13 = vpop.f32.mrf.mxu1 }
 0x41d   : > { %4676 = vrot.lane.b32.xlu0 %v4657_v26, %s7056_s26  ;;  %5027 = vrot.lane.b32.xlu1 %v6872_v15, %s7057_s23  ;;  %v2899_v15 = vadd.f32 %v8991_v5, %v9500_v22 }
 0x41e   : > { %v2651_v48 = vadd.f32 %v8973_v39, %v2538_v0 }
 0x41f   : > { %v2762_v17 = vpop.permute.xlu0 %2761  ;;  %v8997_v55 = vpop.permute.xlu1 %2889 }
 0x420   : > { %v2771_v41 = vadd.f32 %v2762_v17, %v2652_v23 }
 0x421   : > { %5021 = vrot.lane.b32.xlu0 %v5002_v54, %s7057_s23  ;;  %4678 = vrot.lane.b32.xlu1 %v4660_v43, %s7056_s26  ;;  %v6889_v54 = vpop.f32.mrf.mxu1 }
 0x422   : > { %v2775_v36 = vadd.f32 %v2771_v41, %v9499_v61 }
 0x423   : > { %v2764_v52 = vpop.permute.xlu1 %2763  ;;  %v3130_v16 = vpop.permute.xlu0 %3129 }
 0x424   : > { %v2779_v2 = vmax.f32 %v2775_v36, 0.0  ;;  %v2772_v9 = vadd.f32 %v2764_v52, %v2653_v1  ;;  %v2900_v36 = vadd.f32 %v8997_v55, %v9502_v4 }
 0x425   : > { %4918 = vrot.lane.b32.xlu0 %v6865_v18, %s7056_s26  ;;  %5023 = vrot.lane.b32.xlu1 %v5005_v11, %s7057_s23  ;;  %v5466_v11 = vpop.f32.mrf.mxu0 }
 0x426   : > { %2784 = vst.msk [vmem:[%s7790_s24 + $0x20] sm:$0xff] %vm2781_vm15, %v2779_v2  ;;  %v2776_v26 = vadd.f32 %v2772_v9, %v9501_v58 }
 0x427   : > { %v2758_v42 = vpop.permute.xlu0 %2757  ;;  %v3132_v53 = vpop.permute.xlu1 %3131 }
 0x428   : > { %v2780_v28 = vmax.f32 %v2776_v26, 0.0  ;;  %v2769_v14 = vadd.f32 %v2758_v42, %v2650_v44 }
 0x429   : > { %4920 = vrot.lane.b32.xlu1 %v6866_v45, %s7056_s26  ;;  %5263 = vrot.lane.b32.xlu0 %v6883_v27, %s7057_s23  ;;  %v6896_v27 = vpop.f32.mrf.mxu0 }
 0x42a   : > { %2785 = vst.msk [vmem:[%s7790_s24 + $0x30] sm:$0xff] %vm2781_vm15, %v2780_v28  ;;  %v2773_v24 = vadd.f32 %v2769_v14, %v9503_v40 }
 0x42b   : > { %v3126_v51 = vpop.permute.xlu0 %3125  ;;  %v2760_v19 = vpop.permute.xlu1 %2759 }
 0x42c   : > { %v2777_v31 = vmax.f32 %v2773_v24, 0.0  ;;  %v2770_v46 = vadd.f32 %v2760_v19, %v2651_v48 }
 0x42d   : > { %4914 = vrot.lane.b32.xlu0 %v4895_v49, %s7056_s26  ;;  %5265 = vrot.lane.b32.xlu1 %v6884_v29, %s7057_s23 }
 0x42e   : > { %2782 = vst.msk [vmem:[%s7790_s24] sm:$0xff] %vm2781_vm15, %v2777_v31  ;;  %v2774_v43 = vadd.f32 %v2770_v46, %v9504_v30 }
 0x42f   : > { %v3011_v35 = vpop.permute.xlu0 %3010  ;;  %v3128_v39 = vpop.permute.xlu1 %3127 }
 0x430   : > { %v2778_v25 = vmax.f32 %v2774_v43, 0.0  ;;  %v3020_v18 = vadd.f32 %v3011_v35, %v2901_v8 }
 0x431   : > { %5259 = vrot.lane.b32.xlu0 %v5240_v56, %s7057_s23  ;;  %4916 = vrot.lane.b32.xlu1 %v4898_v33, %s7056_s26  ;;  %v5347_v33 = vpop.f32.mrf.mxu1 }
 0x432   : > { %2783 = vst.msk [vmem:[%s7790_s24 + $0x10] sm:$0xff] %vm2781_vm15, %v2778_v25  ;;  %v3139_v34 = vadd.f32 %v3130_v16, %v3020_v18 }
 0x433   : > { %v3013_v20 = vpop.permute.xlu1 %3012  ;;  %v3379_v49 = vpop.permute.xlu0 %3378 }
 0x434   : > { %v3143_v32 = vadd.f32 %v3139_v34, %v9499_v61  ;;  %v3021_v45 = vadd.f32 %v3013_v20, %v2902_v3 }
 0x435   : > { %5144 = vrot.lane.b32.xlu0 %v6877_v57, %s7057_s23  ;;  %5261 = vrot.lane.b32.xlu1 %v5243_v6, %s7057_s23  ;;  %v6890_v57 = vpop.f32.mrf.mxu1 }
 0x436   : > { %v3147_v60 = vmax.f32 %v3143_v32, 0.0  ;;  %v3140_v47 = vadd.f32 %v3132_v53, %v3021_v45  ;;  %v5469_v53 = vpop.f32.mrf.mxu0 }
 0x437   : > { %v3007_v23 = vpop.permute.xlu0 %3006  ;;  %v3381_v17 = vpop.permute.xlu1 %3380 }
 0x438   : > { %3152 = vst.msk [vmem:[%s7790_s24 + $0x20] sm:$0xff] %vm3149_vm0, %v3147_v60  ;;  %v3144_v41 = vadd.f32 %v3140_v47, %v9501_v58  ;;  %v3018_v38 = vadd.f32 %v3007_v23, %v2899_v15  ;;  %v5350_v42 = vpop.f32.mrf.mxu1 }
 0x439   : > { %5146 = vrot.lane.b32.xlu1 %v6878_v37, %s7057_s23  ;;  %5489 = vrot.lane.b32.xlu0 %v6895_v50, %s7051_s29 }
 0x43a   : > { %v3148_v5 = vmax.f32 %v3144_v41, 0.0  ;;  %v3137_v1 = vadd.f32 %v3126_v51, %v3018_v38  ;;  %v6901_v48 = vpop.f32.mrf.mxu1  ;;  %v6907_v51 = vpop.f32.mrf.mxu0 }
 0x43b   : > { %v3375_v52 = vpop.permute.xlu0 %3374  ;;  %v3009_v16 = vpop.permute.xlu1 %3008 }
 0x43c   : > { %3153 = vst.msk [vmem:[%s7790_s24 + $0x30] sm:$0xff] %vm3149_vm0, %v3148_v5  ;;  %v3141_v2 = vadd.f32 %v3137_v1, %v9503_v40  ;;  %v3019_v9 = vadd.f32 %v3009_v16, %v2900_v36  ;;  %v5585_v8 = vpop.f32.mrf.mxu1  ;;  %v5692_v43 = vpop.f32.mrf.mxu0 }
 0x43d   : > { %5140 = vrot.lane.b32.xlu0 %v5121_v63, %s7057_s23  ;;  %5491 = vrot.lane.b32.xlu1 %v6896_v27, %s7051_s29 }
 0x43e   : > { %v3145_v0 = vmax.f32 %v3141_v2, 0.0  ;;  %v3138_v26 = vadd.f32 %v3128_v39, %v3019_v9  ;;  %v6902_v25 = vpop.f32.mrf.mxu1  ;;  %v6908_v18 = vpop.f32.mrf.mxu0 }
 0x43f   : > { %v3260_v55 = vpop.permute.xlu0 %3259  ;;  %v3377_v44 = vpop.permute.xlu1 %3376 }
 0x440   : > { %3150 = vst.msk [vmem:[%s7790_s24] sm:$0xff] %vm3149_vm0, %v3145_v0  ;;  %v3142_v56 = vadd.f32 %v3138_v26, %v9504_v30  ;;  %v3269_v63 = vadd.f32 %v3260_v55, %v9497_v59  ;;  %v5588_v45 = vpop.f32.mrf.mxu1  ;;  %v5695_v15 = vpop.f32.mrf.mxu0 }
 0x441   : > { %5485 = vrot.lane.b32.xlu0 %v5466_v11, %s7051_s29  ;;  %5142 = vrot.lane.b32.xlu1 %v5124_v13, %s7057_s23 }
 0x442   : > { %v3146_v28 = vmax.f32 %v3142_v56, 0.0  ;;  %v3388_v29 = vadd.f32 %v3379_v49, %v3269_v63  ;;  %v6913_v41 = vpop.f32.mrf.mxu1  ;;  %v6919_v38 = vpop.f32.mrf.mxu0 }
 0x443   : > { %v3256_v14 = vpop.permute.xlu0 %3255  ;;  %v3262_v24 = vpop.permute.xlu1 %3261 }
 0x444   : > { %3151 = vst.msk [vmem:[%s7790_s24 + $0x10] sm:$0xff] %vm3149_vm0, %v3146_v28  ;;  %v3267_v19 = vadd.f32 %v3256_v14, %v9500_v22  ;;  %v3270_v37 = vadd.f32 %v3262_v24, %v9498_v10  ;;  %v5902_v16 = vpop.f32.mrf.mxu0 }
 0x445   : > { %5370 = vrot.lane.b32.xlu0 %v6889_v54, %s7051_s29  ;;  %5487 = vrot.lane.b32.xlu1 %v5469_v53, %s7051_s29 }
 0x446   : > { %v3386_v13 = vadd.f32 %v3375_v52, %v3267_v19  ;;  %v3389_v6 = vadd.f32 %v3381_v17, %v3270_v37  ;;  %v5783_v52 = vpop.f32.mrf.mxu1  ;;  %v6920_v9 = vpop.f32.mrf.mxu0 }
 0x447   : > { %v3498_v31 = vpop.permute.xlu0 %3497  ;;  %v3258_v46 = vpop.permute.xlu1 %3257 }
 0x448   : > { %v3507_v59 = vadd.f32 %v3498_v31, %v3388_v29  ;;  %v3268_v39 = vadd.f32 %v3258_v46, %v9502_v4  ;;  %v6914_v2 = vpop.f32.mrf.mxu1 }
 0x449   : > { %5372 = vrot.lane.b32.xlu1 %v6890_v57, %s7051_s29  ;;  %5715 = vrot.lane.b32.xlu0 %v6907_v51, %s7049_s18 }
 0x44a   : > { %v3511_v35 = vadd.f32 %v3507_v59, %v9499_v61  ;;  %v3387_v54 = vadd.f32 %v3377_v44, %v3268_v39  ;;  %v5786_v55 = vpop.f32.mrf.mxu1  ;;  %v5905_v44 = vpop.f32.mrf.mxu0 }
 0x44b   : > { %v3494_v22 = vpop.permute.xlu0 %3493  ;;  %v3500_v10 = vpop.permute.xlu1 %3499 }
 0x44c   : > { %v3515_v3 = vmax.f32 %v3511_v35, 0.0  ;;  %v3505_v34 = vadd.f32 %v3494_v22, %v3386_v13  ;;  %v3508_v20 = vadd.f32 %v3500_v10, %v3389_v6  ;;  %v6925_v28 = vpop.f32.mrf.mxu1  ;;  %v6931_v63 = vpop.f32.mrf.mxu0 }
 0x44d   : > { %5366 = vrot.lane.b32.xlu0 %v5347_v33, %s7051_s29  ;;  %5717 = vrot.lane.b32.xlu1 %v6908_v18, %s7049_s18 }
 0x44e   : > { %3520 = vst.msk [vmem:[%s7790_s24 + $0x20] sm:$0xff] %vm3517_vm1, %v3515_v3  ;;  %v3509_v4 = vadd.f32 %v3505_v34, %v9503_v40  ;;  %v3512_v49 = vadd.f32 %v3508_v20, %v9501_v58  ;;  %v6009_v19 = vpop.f32.mrf.mxu1  ;;  %v6100_v37 = vpop.f32.mrf.mxu0 }
 0x44f   : > { %v3496_v50 = vpop.permute.xlu1 %3495  ;;  %v4066_v32 = vpop.permute.xlu0 %4065 }
 0x450   : > { %v3513_v60 = vmax.f32 %v3509_v4, 0.0  ;;  %v3516_v47 = vmax.f32 %v3512_v49, 0.0  ;;  %v3506_v23 = vadd.f32 %v3496_v50, %v3387_v54  ;;  %v6926_v35 = vpop.f32.mrf.mxu1  ;;  %v6932_v39 = vpop.f32.mrf.mxu0 }
 0x451   : > { %5711 = vrot.lane.b32.xlu0 %v5692_v43, %s7049_s18  ;;  %5368 = vrot.lane.b32.xlu1 %v5350_v42, %s7051_s29 }
 0x452   : > { %3518 = vst.msk [vmem:[%s7790_s24] sm:$0xff] %vm3517_vm1, %v3513_v60  ;;  %3521 = vst.msk [vmem:[%s7790_s24 + $0x30] sm:$0xff] %vm3517_vm1, %v3516_v47  ;;  %v3510_v17 = vadd.f32 %v3506_v23, %v9504_v30  ;;  %v6012_v34 = vpop.f32.mrf.mxu1 }
 0x453   : > { %v4062_v33 = vpop.permute.xlu0 %4061  ;;  %v4068_v11 = vpop.permute.xlu1 %4067 }
 0x454   : > { %v3514_v36 = vmax.f32 %v3510_v17, 0.0 }
 0x455   : > { %5608 = vrot.lane.b32.xlu0 %v6901_v48, %s7051_s29  ;;  %5713 = vrot.lane.b32.xlu1 %v5695_v15, %s7049_s18  ;;  %v6937_v15 = vpop.f32.mrf.mxu1 }
 0x456   : > { %3519 = vst.msk [vmem:[%s7790_s24 + $0x10] sm:$0xff] %vm3517_vm1, %v3514_v36 }
 0x457   : > { %v3947_v5 = vpop.permute.xlu0 %3946  ;;  %v4064_v1 = vpop.permute.xlu1 %4063 }
 0x458   : > { %v3956_v42 = vadd.f32 %v3947_v5, %v9505_v12 }
 0x459   : > { %5610 = vrot.lane.b32.xlu1 %v6902_v25, %s7051_s29  ;;  %5925 = vrot.lane.b32.xlu0 %v6919_v38, %s7049_s18 }
 0x45a   : > { %v4075_v24 = vadd.f32 %v4066_v32, %v3956_v42 }
 0x45b   : > { %v3949_v57 = vpop.permute.xlu1 %3948  ;;  %v4314_v27 = vpop.permute.xlu0 %4313 }
 0x45c   : > { %v3957_v14 = vadd.f32 %v3949_v57, %v9507_v21  ;;  %v4323_v23 = vadd.f32 %v4314_v27, %v9505_v12 }
 0x45d   : > { %5604 = vrot.lane.b32.xlu0 %v5585_v8, %s7051_s29  ;;  %5927 = vrot.lane.b32.xlu1 %v6920_v9, %s7049_s18 }
 0x45e   : > { %v4076_v8 = vadd.f32 %v4068_v11, %v3957_v14 }
 0x45f   : > { %v3943_v0 = vpop.permute.xlu0 %3942  ;;  %v9083_v26 = vpop.permute.xlu1 %4315 }
 0x460   : > { %v3954_v31 = vadd.f32 %v3943_v0, %v9506_v7  ;;  %v4324_v5 = vadd.f32 %v9083_v26, %v9507_v21 }
 0x461   : > { %5921 = vrot.lane.b32.xlu0 %v5902_v16, %s7049_s18  ;;  %5606 = vrot.lane.b32.xlu1 %v5588_v45, %s7051_s29  ;;  %v6103_v45 = vpop.f32.mrf.mxu0 }
 0x462   : > { %v4073_v25 = vadd.f32 %v4062_v33, %v3954_v31 }
 0x463   : > { %v9088_v53 = vpop.permute.xlu0 %4309  ;;  %v3945_v56 = vpop.permute.xlu1 %3944 }
 0x464   : > { %v3955_v22 = vadd.f32 %v3945_v56, %v9508_v62  ;;  %v4321_v9 = vadd.f32 %v9088_v53, %v9506_v7 }
 0x465   : > { %5806 = vrot.lane.b32.xlu0 %v6913_v41, %s7049_s18  ;;  %5923 = vrot.lane.b32.xlu1 %v5905_v44, %s7049_s18  ;;  %v6191_v41 = vpop.f32.mrf.mxu1 }
 0x466   : > { %v4074_v54 = vadd.f32 %v4064_v1, %v3955_v22 }
 0x467   : > { %v4185_v48 = vpop.permute.xlu0 %4184  ;;  %v9093_v51 = vpop.permute.xlu1 %4311 }
 0x468   : > { %v4194_v29 = vadd.f32 %v4185_v48, %v4075_v24  ;;  %v6938_v57 = vpop.f32.mrf.mxu1 }
 0x469   : > { %5808 = vrot.lane.b32.xlu1 %v6914_v2, %s7049_s18  ;;  %6123 = vrot.lane.b32.xlu0 %v6931_v63, %s7047_s13  ;;  %v4322_v63 = vadd.f32 %v9093_v51, %v9508_v62 }
 0x46a   : > { %v4198_v46 = vadd.f32 %v4194_v29, %v9499_v61  ;;  %v6194_v42 = vpop.f32.mrf.mxu1 }
 0x46b   : > { %v4187_v43 = vpop.permute.xlu1 %4186  ;;  %v4552_v59 = vpop.permute.xlu0 %4551 }
 0x46c   : > { %v4202_v13 = vmax.f32 %v4198_v46, 0.0  ;;  %v4195_v6 = vadd.f32 %v4187_v43, %v4076_v8 }
 0x46d   : > { %5802 = vrot.lane.b32.xlu0 %v5783_v52, %s7049_s18  ;;  %6125 = vrot.lane.b32.xlu1 %v6932_v39, %s7047_s13 }
 0x46e   : > { %4206 = vst.msk [vmem:[%s7790_s24 + $0x28] sm:$0xff] %vm1395_vm11, %v4202_v13  ;;  %v4199_v10 = vadd.f32 %v4195_v6, %v9501_v58 }
 0x46f   : > { %v4181_v18 = vpop.permute.xlu0 %4180  ;;  %v4554_v3 = vpop.permute.xlu1 %4553 }
 0x470   : > { %v4203_v20 = vmax.f32 %v4199_v10, 0.0  ;;  %v4192_v4 = vadd.f32 %v4181_v18, %v4073_v25 }
 0x471   : > { %6119 = vrot.lane.b32.xlu0 %v6100_v37, %s7047_s13  ;;  %5804 = vrot.lane.b32.xlu1 %v5786_v55, %s7049_s18 }
 0x472   : > { %4207 = vst.msk [vmem:[%s7790_s24 + $0x38] sm:$0xff] %vm1395_vm11, %v4203_v20  ;;  %v4196_v49 = vadd.f32 %v4192_v4, %v9503_v40 }
 0x473   : > { %v4548_v50 = vpop.permute.xlu0 %4547  ;;  %v4183_v32 = vpop.permute.xlu1 %4182 }
 0x474   : > { %v4200_v60 = vmax.f32 %v4196_v49, 0.0  ;;  %v4193_v47 = vadd.f32 %v4183_v32, %v4074_v54 }
 0x475   : > { %6032 = vrot.lane.b32.xlu0 %v6925_v28, %s7047_s13  ;;  %6121 = vrot.lane.b32.xlu1 %v6103_v45, %s7047_s13 }
 0x476   : > { %4204 = vst.msk [vmem:[%s7790_s24 + $0x8] sm:$0xff] %vm1395_vm11, %v4200_v60  ;;  %v4197_v17 = vadd.f32 %v4193_v47, %v9504_v30 }
 0x477   : > { %v4433_v33 = vpop.permute.xlu0 %4432  ;;  %v4550_v11 = vpop.permute.xlu1 %4549 }
 0x478   : > { %v4201_v38 = vmax.f32 %v4197_v17, 0.0  ;;  %v4442_v36 = vadd.f32 %v4433_v33, %v4323_v23 }
 0x479   : > { %6028 = vrot.lane.b32.xlu0 %v6009_v19, %s7047_s13  ;;  %6034 = vrot.lane.b32.xlu1 %v6926_v35, %s7047_s13 }
 0x47a   : > { %4205 = vst.msk [vmem:[%s7790_s24 + $0x18] sm:$0xff] %vm1395_vm11, %v4201_v38  ;;  %v4561_v1 = vadd.f32 %v4552_v59, %v4442_v36 }
 0x47b   : > { %v4435_v52 = vpop.permute.xlu1 %4434  ;;  %v4800_v16 = vpop.permute.xlu0 %4799 }
 0x47c   : > { %v4565_v27 = vadd.f32 %v4561_v1, %v9499_v61  ;;  %v4443_v2 = vadd.f32 %v4435_v52, %v4324_v5 }
 0x47d   : > { %6210 = vrot.lane.b32.xlu0 %v6191_v41, %s7047_s13  ;;  %6030 = vrot.lane.b32.xlu1 %v6012_v34, %s7047_s13 }
 0x47e   : > { %v4569_v0 = vmax.f32 %v4565_v27, 0.0  ;;  %v4562_v26 = vadd.f32 %v4554_v3, %v4443_v2 }
 0x47f   : > { %v4429_v55 = vpop.permute.xlu0 %4428  ;;  %v4802_v44 = vpop.permute.xlu1 %4801 }
 0x480   : > { %4573 = vst.msk [vmem:[%s7790_s24 + $0x28] sm:$0xff] %vm1723_vm12, %v4569_v0  ;;  %v4566_v56 = vadd.f32 %v4562_v26, %v9501_v58  ;;  %v4440_v28 = vadd.f32 %v4429_v55, %v4321_v9 }
 0x481   : > { %6214 = vrot.lane.b32.xlu0 %v6937_v15, %s7047_s13  ;;  %6212 = vrot.lane.b32.xlu1 %v6194_v42, %s7047_s13 }
 0x482   : > { %v4570_v53 = vmax.f32 %v4566_v56, 0.0  ;;  %v4559_v14 = vadd.f32 %v4548_v50, %v4440_v28 }
 0x483   : > { %v4796_v24 = vpop.permute.xlu0 %4795  ;;  %v4431_v48 = vpop.permute.xlu1 %4430 }
 0x484   : > { %4574 = vst.msk [vmem:[%s7790_s24 + $0x38] sm:$0xff] %vm1723_vm12, %v4570_v53  ;;  %v4563_v19 = vadd.f32 %v4559_v14, %v9503_v40  ;;  %v4441_v37 = vadd.f32 %v4431_v48, %v4322_v63 }
 0x485   : > { %6216 = vrot.lane.b32.xlu1 %v6938_v57, %s7047_s13 }
 0x486   : > { %v4567_v29 = vmax.f32 %v4563_v19, 0.0  ;;  %v4560_v31 = vadd.f32 %v4550_v11, %v4441_v37 }
 0x487   : > { %v4681_v46 = vpop.permute.xlu0 %4680  ;;  %v4798_v8 = vpop.permute.xlu1 %4797 }
 0x488   : > { %4571 = vst.msk [vmem:[%s7790_s24 + $0x8] sm:$0xff] %vm1723_vm12, %v4567_v29  ;;  %v4564_v51 = vadd.f32 %v4560_v31, %v9504_v30  ;;  %v4690_v6 = vadd.f32 %v4681_v46, %v9505_v12 }
 0x48a   : > { %v4568_v43 = vmax.f32 %v4564_v51, 0.0  ;;  %v4809_v18 = vadd.f32 %v4800_v16, %v4690_v6 }
 0x48b   : > { %v4683_v59 = vpop.permute.xlu1 %4682  ;;  %v5026_v35 = vpop.permute.xlu0 %5025 }
 0x48c   : > { %4572 = vst.msk [vmem:[%s7790_s24 + $0x18] sm:$0xff] %vm1723_vm12, %v4568_v43  ;;  %v4691_v25 = vadd.f32 %v4683_v59, %v9507_v21  ;;  %v5035_v57 = vadd.f32 %v5026_v35, %v9505_v12 }
 0x48e   : > { %v4810_v54 = vadd.f32 %v4802_v44, %v4691_v25 }
 0x48f   : > { %v4677_v39 = vpop.permute.xlu0 %4676  ;;  %v5028_v13 = vpop.permute.xlu1 %5027 }
 0x490   : > { %v4688_v4 = vadd.f32 %v4677_v39, %v9506_v7  ;;  %v5036_v55 = vadd.f32 %v5028_v13, %v9507_v21 }
 0x492   : > { %v4807_v23 = vadd.f32 %v4796_v24, %v4688_v4 }
 0x493   : > { %v5022_v22 = vpop.permute.xlu0 %5021  ;;  %v4679_v10 = vpop.permute.xlu1 %4678 }
 0x494   : > { %v4689_v60 = vadd.f32 %v4679_v10, %v9508_v62  ;;  %v5033_v53 = vadd.f32 %v5022_v22, %v9506_v7 }
 0x496   : > { %v4808_v36 = vadd.f32 %v4798_v8, %v4689_v60 }
 0x497   : > { %v4919_v3 = vpop.permute.xlu0 %4918  ;;  %v5024_v34 = vpop.permute.xlu1 %5023 }
 0x498   : > { %v4928_v20 = vadd.f32 %v4919_v3, %v4809_v18  ;;  %v5034_v31 = vadd.f32 %v5024_v34, %v9508_v62 }
 0x49a   : > { %v4932_v49 = vadd.f32 %v4928_v20, %v9499_v61 }
 0x49b   : > { %v4921_v50 = vpop.permute.xlu1 %4920  ;;  %v5264_v32 = vpop.permute.xlu0 %5263 }
 0x49c   : > { %v4936_v45 = vmax.f32 %v4932_v49, 0.0  ;;  %v4929_v15 = vadd.f32 %v4921_v50, %v4810_v54 }
 0x49e   : > { %4940 = vst.msk [vmem:[%s7790_s24 + $0x28] sm:$0xff] %vm2057_vm13, %v4936_v45  ;;  %v4933_v47 = vadd.f32 %v4929_v15, %v9501_v58 }
 0x49f   : > { %v4915_v17 = vpop.permute.xlu0 %4914  ;;  %v5266_v33 = vpop.permute.xlu1 %5265 }
 0x4a0   : > { %v4937_v11 = vmax.f32 %v4933_v47, 0.0  ;;  %v4926_v41 = vadd.f32 %v4915_v17, %v4807_v23 }
 0x4a2   : > { %4941 = vst.msk [vmem:[%s7790_s24 + $0x38] sm:$0xff] %vm2057_vm13, %v4937_v11  ;;  %v4930_v38 = vadd.f32 %v4926_v41, %v9503_v40 }
 0x4a3   : > { %v5260_v5 = vpop.permute.xlu0 %5259  ;;  %v4917_v1 = vpop.permute.xlu1 %4916 }
 0x4a4   : > { %v4934_v52 = vmax.f32 %v4930_v38, 0.0  ;;  %v4927_v16 = vadd.f32 %v4917_v1, %v4808_v36 }
 0x4a6   : > { %4938 = vst.msk [vmem:[%s7790_s24 + $0x8] sm:$0xff] %vm2057_vm13, %v4934_v52  ;;  %v4931_v27 = vadd.f32 %v4927_v16, %v9504_v30 }
 0x4a7   : > { %v5145_v2 = vpop.permute.xlu0 %5144  ;;  %v5262_v9 = vpop.permute.xlu1 %5261 }
 0x4a8   : > { %v4935_v0 = vmax.f32 %v4931_v27, 0.0  ;;  %v5154_v26 = vadd.f32 %v5145_v2, %v5035_v57 }
 0x4aa   : > { %4939 = vst.msk [vmem:[%s7790_s24 + $0x18] sm:$0xff] %vm2057_vm13, %v4935_v0  ;;  %v5273_v44 = vadd.f32 %v5264_v32, %v5154_v26 }
 0x4ab   : > { %v5147_v42 = vpop.permute.xlu1 %5146  ;;  %v5490_v56 = vpop.permute.xlu0 %5489 }
 0x4ac   : > { %v5277_v28 = vadd.f32 %v5273_v44, %v9499_v61  ;;  %v5155_v63 = vadd.f32 %v5147_v42, %v5036_v55 }
 0x4ae   : > { %v5281_v14 = vmax.f32 %v5277_v28, 0.0  ;;  %v5274_v24 = vadd.f32 %v5266_v33, %v5155_v63 }
 0x4af   : > { %v5141_v48 = vpop.permute.xlu0 %5140  ;;  %v5492_v19 = vpop.permute.xlu1 %5491 }
 0x4b0   : > { %5285 = vst.msk [vmem:[%s7790_s24 + $0x28] sm:$0xff] %vm2419_vm14, %v5281_v14  ;;  %v5278_v37 = vadd.f32 %v5274_v24, %v9501_v58  ;;  %v5152_v29 = vadd.f32 %v5141_v48, %v5033_v53 }
 0x4b2   : > { %v5282_v46 = vmax.f32 %v5278_v37, 0.0  ;;  %v5271_v8 = vadd.f32 %v5260_v5, %v5152_v29 }
 0x4b3   : > { %v5486_v51 = vpop.permute.xlu0 %5485  ;;  %v5143_v43 = vpop.permute.xlu1 %5142 }
 0x4b4   : > { %5286 = vst.msk [vmem:[%s7790_s24 + $0x38] sm:$0xff] %vm2419_vm14, %v5282_v46  ;;  %v5275_v59 = vadd.f32 %v5271_v8, %v9503_v40  ;;  %v5153_v35 = vadd.f32 %v5143_v43, %v5034_v31 }
 0x4b6   : > { %v5279_v39 = vmax.f32 %v5275_v59, 0.0  ;;  %v5272_v13 = vadd.f32 %v5262_v9, %v5153_v35 }
 0x4b7   : > { %v5371_v6 = vpop.permute.xlu0 %5370  ;;  %v5488_v22 = vpop.permute.xlu1 %5487 }
 0x4b8   : > { %5283 = vst.msk [vmem:[%s7790_s24 + $0x8] sm:$0xff] %vm2419_vm14, %v5279_v39  ;;  %v5276_v10 = vadd.f32 %v5272_v13, %v9504_v30  ;;  %v5380_v4 = vadd.f32 %v5371_v6, %v9505_v12 }
 0x4ba   : > { %v5280_v25 = vmax.f32 %v5276_v10, 0.0  ;;  %v5499_v32 = vadd.f32 %v5490_v56, %v5380_v4 }
 0x4bb   : > { %v5373_v18 = vpop.permute.xlu1 %5372  ;;  %v5716_v3 = vpop.permute.xlu0 %5715 }
 0x4bc   : > { %5284 = vst.msk [vmem:[%s7790_s24 + $0x18] sm:$0xff] %vm2419_vm14, %v5280_v25  ;;  %v5381_v50 = vadd.f32 %v5373_v18, %v9507_v21  ;;  %v5725_v42 = vadd.f32 %v5716_v3, %v9505_v12 }
 0x4be   : > { %v5500_v17 = vadd.f32 %v5492_v19, %v5381_v50 }
 0x4bf   : > { %v5367_v34 = vpop.permute.xlu0 %5366  ;;  %v5718_v20 = vpop.permute.xlu1 %5717 }
 0x4c0   : > { %v5378_v47 = vadd.f32 %v5367_v34, %v9506_v7  ;;  %v5726_v24 = vadd.f32 %v5718_v20, %v9507_v21 }
 0x4c2   : > { %v5497_v1 = vadd.f32 %v5486_v51, %v5378_v47 }
 0x4c3   : > { %v5712_v49 = vpop.permute.xlu0 %5711  ;;  %v5369_v54 = vpop.permute.xlu1 %5368 }
 0x4c4   : > { %v5379_v36 = vadd.f32 %v5369_v54, %v9508_v62  ;;  %v5723_v46 = vadd.f32 %v5712_v49, %v9506_v7 }
 0x4c6   : > { %v5498_v9 = vadd.f32 %v5488_v22, %v5379_v36 }
 0x4c7   : > { %v5609_v45 = vpop.permute.xlu0 %5608  ;;  %v5714_v15 = vpop.permute.xlu1 %5713 }
 0x4c8   : > { %v5618_v60 = vadd.f32 %v5609_v45, %v5499_v32  ;;  %v5724_v13 = vadd.f32 %v5714_v15, %v9508_v62 }
 0x4ca   : > { %v5622_v23 = vadd.f32 %v5618_v60, %v9499_v61 }
 0x4cb   : > { %v5611_v33 = vpop.permute.xlu1 %5610  ;;  %v5926_v11 = vpop.permute.xlu0 %5925 }
 0x4cc   : > { %v5626_v41 = vmax.f32 %v5622_v23, 0.0  ;;  %v5619_v38 = vadd.f32 %v5611_v33, %v5500_v17 }
 0x4ce   : > { %5630 = vst.msk [vmem:[%s7790_s24 + $0x28] sm:$0xff] %vm2781_vm15, %v5626_v41  ;;  %v5623_v5 = vadd.f32 %v5619_v38, %v9501_v58 }
 0x4cf   : > { %v5605_v52 = vpop.permute.xlu0 %5604  ;;  %v5928_v16 = vpop.permute.xlu1 %5927 }
 0x4d0   : > { %v5627_v57 = vmax.f32 %v5623_v5, 0.0  ;;  %v5616_v27 = vadd.f32 %v5605_v52, %v5497_v1 }
 0x4d2   : > { %5631 = vst.msk [vmem:[%s7790_s24 + $0x38] sm:$0xff] %vm2781_vm15, %v5627_v57  ;;  %v5620_v2 = vadd.f32 %v5616_v27, %v9503_v40 }
 0x4d3   : > { %v5922_v0 = vpop.permute.xlu0 %5921  ;;  %v5607_v26 = vpop.permute.xlu1 %5606 }
 0x4d4   : > { %v5624_v55 = vmax.f32 %v5620_v2, 0.0  ;;  %v5617_v44 = vadd.f32 %v5607_v26, %v5498_v9 }
 0x4d6   : > { %5628 = vst.msk [vmem:[%s7790_s24 + $0x8] sm:$0xff] %vm2781_vm15, %v5624_v55  ;;  %v5621_v56 = vadd.f32 %v5617_v44, %v9504_v30 }
 0x4d7   : > { %v5807_v28 = vpop.permute.xlu0 %5806  ;;  %v5924_v63 = vpop.permute.xlu1 %5923 }
 0x4d8   : > { %v5625_v53 = vmax.f32 %v5621_v56, 0.0  ;;  %v5816_v14 = vadd.f32 %v5807_v28, %v5725_v42 }
 0x4da   : > { %5629 = vst.msk [vmem:[%s7790_s24 + $0x18] sm:$0xff] %vm2781_vm15, %v5625_v53  ;;  %v5935_v48 = vadd.f32 %v5926_v11, %v5816_v14 }
 0x4db   : > { %v5809_v19 = vpop.permute.xlu1 %5808  ;;  %v6124_v37 = vpop.permute.xlu0 %6123 }
 0x4dc   : > { %v5939_v29 = vadd.f32 %v5935_v48, %v9499_v61  ;;  %v5817_v31 = vadd.f32 %v5809_v19, %v5726_v24 }
 0x4de   : > { %v5943_v8 = vmax.f32 %v5939_v29, 0.0  ;;  %v5936_v51 = vadd.f32 %v5928_v16, %v5817_v31 }
 0x4df   : > { %v5803_v43 = vpop.permute.xlu0 %5802  ;;  %v6126_v59 = vpop.permute.xlu1 %6125 }
 0x4e0   : > { %5947 = vst.msk [vmem:[%s7790_s24 + $0x28] sm:$0xff] %vm3149_vm0, %v5943_v8  ;;  %v5940_v35 = vadd.f32 %v5936_v51, %v9501_v58  ;;  %v5814_v39 = vadd.f32 %v5803_v43, %v5723_v46 }
 0x4e2   : > { %v5944_v6 = vmax.f32 %v5940_v35, 0.0  ;;  %v5933_v22 = vadd.f32 %v5922_v0, %v5814_v39 }
 0x4e3   : > { %v6120_v10 = vpop.permute.xlu0 %6119  ;;  %v5805_v25 = vpop.permute.xlu1 %5804 }
 0x4e4   : > { %5948 = vst.msk [vmem:[%s7790_s24 + $0x38] sm:$0xff] %vm3149_vm0, %v5944_v6  ;;  %v5937_v18 = vadd.f32 %v5933_v22, %v9503_v40  ;;  %v5815_v3 = vadd.f32 %v5805_v25, %v5724_v13 }
 0x4e6   : > { %v5941_v34 = vmax.f32 %v5937_v18, 0.0  ;;  %v5934_v20 = vadd.f32 %v5924_v63, %v5815_v3 }
 0x4e7   : > { %v6033_v4 = vpop.permute.xlu0 %6032  ;;  %v6122_v49 = vpop.permute.xlu1 %6121 }
 0x4e8   : > { %5945 = vst.msk [vmem:[%s7790_s24 + $0x8] sm:$0xff] %vm3149_vm0, %v5941_v34  ;;  %v5938_v54 = vadd.f32 %v5934_v20, %v9504_v30  ;;  %v6042_v60 = vadd.f32 %v6033_v4, %v9505_v12 }
 0x4ea   : > { %v5942_v50 = vmax.f32 %v5938_v54, 0.0  ;;  %v6133_v36 = vadd.f32 %v6124_v37, %v6042_v60 }
 0x4eb   : > { %v6029_v32 = vpop.permute.xlu0 %6028  ;;  %v6035_v45 = vpop.permute.xlu1 %6034 }
 0x4ec   : > { %5946 = vst.msk [vmem:[%s7790_s24 + $0x18] sm:$0xff] %vm3149_vm0, %v5942_v50  ;;  %v6040_v15 = vadd.f32 %v6029_v32, %v9506_v7  ;;  %v6043_v41 = vadd.f32 %v6035_v45, %v9507_v21 }
 0x4ee   : > { %v6131_v47 = vadd.f32 %v6120_v10, %v6040_v15  ;;  %v6134_v27 = vadd.f32 %v6126_v59, %v6043_v41 }
 0x4ef   : > { %v6211_v23 = vpop.permute.xlu0 %6210  ;;  %v6031_v17 = vpop.permute.xlu1 %6030 }
 0x4f0   : > { %v6222_v33 = vadd.f32 %v6211_v23, %v6131_v47  ;;  %v6041_v11 = vadd.f32 %v6031_v17, %v9508_v62 }
 0x4f2   : > { %v6226_v38 = vadd.f32 %v6222_v33, %v9503_v40  ;;  %v6132_v5 = vadd.f32 %v6122_v49, %v6041_v11 }
 0x4f3   : > { %v6215_v1 = vpop.permute.xlu0 %6214  ;;  %v6213_v52 = vpop.permute.xlu1 %6212 }
 0x4f4   : > { %v6230_v7 = vmax.f32 %v6226_v38, 0.0  ;;  %v6224_v16 = vadd.f32 %v6215_v1, %v6133_v36  ;;  %v6223_v12 = vadd.f32 %v6213_v52, %v6132_v5 }
 0x4f6   : > { %6234 = vst.msk [vmem:[%s7790_s24 + $0x8] sm:$0xff] %vm3517_vm1, %v6230_v7  ;;  %v6228_v57 = vadd.f32 %v6224_v16, %v9499_v61  ;;  %v6227_v62 = vadd.f32 %v6223_v12, %v9504_v30 }
 0x4f7   : > { %v6217_v21 = vpop.permute.xlu1 %6216 }
 0x4f8   : > { %v6232_v2 = vmax.f32 %v6228_v57, 0.0  ;;  %v6231_v40 = vmax.f32 %v6227_v62, 0.0  ;;  %v6225_v9 = vadd.f32 %v6217_v21, %v6134_v27 }
 0x4fa   : > { %6236 = vst.msk [vmem:[%s7790_s24 + $0x28] sm:$0xff] %vm3517_vm1, %v6232_v2  ;;  %6235 = vst.msk [vmem:[%s7790_s24 + $0x18] sm:$0xff] %vm3517_vm1, %v6231_v40  ;;  %v6229_v0 = vadd.f32 %v6225_v9, %v9501_v58 }
 0x4fc   : > { %v6233_v26 = vmax.f32 %v6229_v0, 0.0 }
 0x4fe   : > { %6237 = vst.msk [vmem:[%s7790_s24 + $0x38] sm:$0xff] %vm3517_vm1, %v6233_v26 }
 0x4ff PF: > { %s22_s21 = sadd.s32 1, %s7041_s21  }
 0x500   : > { %p19_p4 = scmp.ge.s32.totalorder %s22_s21, 4  }
 0x502   :  { %21 = sbr.rel (!%p19_p4) target bundleno = 1 (0x1), region = 107 }

</bundles_post_ra>
